<compile_context>
chip_gen: v5e
topology: v5e:2x2
jax: 0.10.0
libtpu: 0.0.40
codegen_flags: <defaults>
</compile_context>

<pallas_src>
import numpy as np
import jax
import jax.numpy as jnp
from jax.experimental import pallas as pl
from jax.experimental.pallas import tpu as pltpu

IN_FEATURE = 28
HIDDEN = 100
NUM_CLASS = 2
SEQ = 8
BATCH = 2

# Lane/sublane-aligned padded sizes.
FEAT_PAD = 128      # input features padded to one 128-lane tile
HP = 128            # hidden padded to one 128-lane tile (gate slices lane-aligned)
BATCH_PAD = 8       # f32 sublane count
OUT_PAD = 128       # classifier output padded to a full lane tile (unmasked store)


def _lstm_classify_kernel(x_ref, wih0_ref, whh0_ref, b0_ref,
                          wih1_ref, whh1_ref, b1_ref, wc_ref, bc_ref,
                          out_ref, xp_ref, h_all_ref):
    bp = BATCH_PAD
    seq = xp_ref.shape[0] // bp

    def sigmoid(v):
        # One EUP tanh pass + cheap VPU scale/shift (instead of exp+add+div).
        return 0.5 * jnp.tanh(0.5 * v) + 0.5

    def cell(pre, h, c, whh_ref):
        # Serial-chain matmul only: h @ W_hh (M=8, K=128, N=512) in bf16 on MXU,
        # f32 accumulate.  Input projection + bias already folded into `pre`.
        gates = pre + jnp.dot(h.astype(jnp.bfloat16), whh_ref[...],
                              preferred_element_type=jnp.float32)
        # Gate layout: [ i | f | o | g ], each HP=128 lanes wide.
        s = sigmoid(gates[:, :3 * HP])            # i, f, o in one EUP region
        g_g = jnp.tanh(gates[:, 3 * HP:])         # g in one EUP region
        i_g = s[:, 0 * HP:1 * HP]
        f_g = s[:, 1 * HP:2 * HP]
        o_g = s[:, 2 * HP:3 * HP]
        c_new = f_g * c + i_g * g_g
        h_new = o_g * jnp.tanh(c_new)
        return h_new, c_new

    # ---------------- Layer 0 ----------------
    # Input projection for ALL timesteps in one M=seq*8 matmul, bias folded in.
    xp_ref[...] = (jnp.dot(x_ref[...], wih0_ref[...],
                           preferred_element_type=jnp.float32) + b0_ref[...])
    h = jnp.zeros((bp, HP), jnp.float32)
    c = jnp.zeros((bp, HP), jnp.float32)
    for t in range(seq):
        h, c = cell(xp_ref[pl.ds(t * bp, bp), :], h, c, whh0_ref)
        h_all_ref[pl.ds(t * bp, bp), :] = h

    # ---------------- Layer 1 ----------------
    # Batched input projection of the stacked layer-0 outputs (M=seq*8, K=128).
    xp_ref[...] = (jnp.dot(h_all_ref[...].astype(jnp.bfloat16), wih1_ref[...],
                           preferred_element_type=jnp.float32) + b1_ref[...])
    h = jnp.zeros((bp, HP), jnp.float32)
    c = jnp.zeros((bp, HP), jnp.float32)
    for t in range(seq):
        h, c = cell(xp_ref[pl.ds(t * bp, bp), :], h, c, whh1_ref)

    # ---------------- Classifier ----------------
    out_ref[...] = (jnp.dot(h.astype(jnp.bfloat16), wc_ref[...],
                            preferred_element_type=jnp.float32) + bc_ref[...])


def rnn_classify_forward(x, packed_params):
    """x: (seq, batch, 1, IN_FEATURE) or already (seq, batch, IN_FEATURE)."""
    # x.squeeze() in the module; squeeze only the known singleton axis so a
    # batch==1 / seq==1 input cannot collapse the (seq, batch, feat) contract.
    if x.ndim == 4:
        x = jnp.squeeze(x, axis=2)
    x = x.astype(jnp.float32)
    seq, batch, feat = x.shape
    assert feat == IN_FEATURE and batch <= BATCH_PAD

    # Pad batch to the f32 sublane count, features to one lane tile, and
    # flatten (seq, BP, FEAT_PAD) -> (seq*BP, FEAT_PAD) for the batched
    # input-projection matmul.  bf16 for the MXU; padding zeros stay exact.
    x_p = jnp.pad(x, ((0, 0), (0, BATCH_PAD - batch), (0, FEAT_PAD - feat)))
    x_p = x_p.reshape(seq * BATCH_PAD, FEAT_PAD).astype(jnp.bfloat16)

    vmem = pl.BlockSpec(memory_space=pltpu.MemorySpace.VMEM)
    out = pl.pallas_call(
        _lstm_classify_kernel,
        out_shape=jax.ShapeDtypeStruct((BATCH_PAD, OUT_PAD), jnp.float32),
        in_specs=[vmem] * 9,
        out_specs=vmem,
        scratch_shapes=[
            pltpu.VMEM((seq * BATCH_PAD, 4 * HP), jnp.float32),  # xp (proj+bias)
            pltpu.VMEM((seq * BATCH_PAD, HP), jnp.float32),      # stacked h0_t
        ],
    )(x_p, *packed_params)
    return out[:batch, :NUM_CLASS]


def make_params(key):
    """Deterministic init with PyTorch LSTM/Linear parameter shapes (raw layout)."""
    ks = jax.random.split(key, 10)
    bound = 1.0 / np.sqrt(HIDDEN)

    def u(k, shape):
        return jax.random.uniform(k, shape, jnp.float32, -bound, bound)

    w_ih0 = u(ks[0], (4 * HIDDEN, IN_FEATURE))
    w_hh0 = u(ks[1], (4 * HIDDEN, HIDDEN))
    b_ih0 = u(ks[2], (4 * HIDDEN,))
    b_hh0 = u(ks[3], (4 * HIDDEN,))
    w_ih1 = u(ks[4], (4 * HIDDEN, HIDDEN))
    w_hh1 = u(ks[5], (4 * HIDDEN, HIDDEN))
    b_ih1 = u(ks[6], (4 * HIDDEN,))
    b_hh1 = u(ks[7], (4 * HIDDEN,))
    wc = u(ks[8], (NUM_CLASS, HIDDEN))
    bc = u(ks[9], (NUM_CLASS,))
    return (w_ih0, w_hh0, b_ih0, b_hh0,
            w_ih1, w_hh1, b_ih1, b_hh1, wc, bc)


def pack_params(raw):
    """PyTorch-layout params -> kernel layout: W_ih / W_hh kept SEPARATE (the
    input projection is precomputed outside the recurrence), gate order
    [i,f,o,g], per-gate columns padded 100->128, input rows padded to 128,
    weights in bf16, biases (b_ih + b_hh, folded into the projection) in f32."""
    (w_ih0, w_hh0, b_ih0, b_hh0,
     w_ih1, w_hh1, b_ih1, b_hh1, wc, bc) = raw
    H = HIDDEN
    order = (0, 1, 3, 2)   # torch [i, f, g, o] -> kernel [i, f, o, g]

    def w_to_kernel(w, rows_pad):
        wT = w.T                                         # (X, 4H)
        rows = wT.shape[0]
        blocks = [jnp.pad(wT[:, k * H:(k + 1) * H],
                          ((0, rows_pad - rows), (0, HP - H))) for k in order]
        return jnp.concatenate(blocks, axis=1).astype(jnp.bfloat16)  # (rows_pad, 4*HP)

    def b_to_kernel(b):
        blocks = [jnp.pad(b[k * H:(k + 1) * H], (0, HP - H)) for k in order]
        return jnp.concatenate(blocks)[None, :].astype(jnp.float32)  # (1, 4*HP)

    wih0 = w_to_kernel(w_ih0, FEAT_PAD)   # (128, 512)
    whh0 = w_to_kernel(w_hh0, HP)         # (128, 512)
    wih1 = w_to_kernel(w_ih1, HP)         # (128, 512)
    whh1 = w_to_kernel(w_hh1, HP)         # (128, 512)
    b0 = b_to_kernel(b_ih0 + b_hh0)       # (1, 512)
    b1 = b_to_kernel(b_ih1 + b_hh1)       # (1, 512)
    wc_k = jnp.pad(wc.T, ((0, HP - H), (0, OUT_PAD - NUM_CLASS))
                   ).astype(jnp.bfloat16)                           # (128, 128)
    bc_k = jnp.pad(bc, (0, OUT_PAD - NUM_CLASS))[None, :].astype(jnp.float32)  # (1, 128)
    return (wih0, whh0, b0, wih1, whh1, b1, wc_k, bc_k)


def ref_forward(x, raw):
    """Pure-JAX f32 reference mirroring PyTorch nn.LSTM semantics (unpadded)."""
    if x.ndim == 4:
        x = jnp.squeeze(x, axis=2)
    x = x.astype(jnp.float32)
    (w_ih0, w_hh0, b_ih0, b_hh0,
     w_ih1, w_hh1, b_ih1, b_hh1, wc, bc) = raw
    seq, batch, _ = x.shape
    H = HIDDEN
    h0 = jnp.zeros((batch, H), jnp.float32)
    c0 = jnp.zeros_like(h0)
    h1 = jnp.zeros_like(h0)
    c1 = jnp.zeros_like(h0)

    def cell(inp, h, c, w_ih, w_hh, b_ih, b_hh):
        g = inp @ w_ih.T + h @ w_hh.T + b_ih + b_hh
        i_g = jax.nn.sigmoid(g[:, 0 * H:1 * H])
        f_g = jax.nn.sigmoid(g[:, 1 * H:2 * H])
        g_g = jnp.tanh(g[:, 2 * H:3 * H])
        o_g = jax.nn.sigmoid(g[:, 3 * H:4 * H])
        c_new = f_g * c + i_g * g_g
        h_new = o_g * jnp.tanh(c_new)
        return h_new, c_new

    for t in range(seq):
        h0, c0 = cell(x[t], h0, c0, w_ih0, w_hh0, b_ih0, b_hh0)
        h1, c1 = cell(h0, h1, c1, w_ih1, w_hh1, b_ih1, b_hh1)
    return h1 @ wc.T + bc


if __name__ == "__main__":
    key = jax.random.PRNGKey(0)
    k_x, k_p = jax.random.split(key)

    # x squeezes to (seq=8, batch=2, in_feature=28), time-major as nn.LSTM expects.
    x = jax.random.normal(k_x, (SEQ, BATCH, 1, IN_FEATURE), jnp.float32)
    raw_params = make_params(k_p)
    packed_params = pack_params(raw_params)

    out = jax.block_until_ready(rnn_classify_forward(x, packed_params))
    ref = jax.block_until_ready(ref_forward(x, raw_params))

    assert out.shape == (BATCH, NUM_CLASS)
    # bf16 weights on the MXU path -> relaxed tolerance vs the f32 reference.
    np.testing.assert_allclose(np.asarray(out), np.asarray(ref), rtol=2e-2, atol=2e-2)

    print("KERNEL_OK")
</pallas_src>

<mosaic_0001>
module attributes {stable_mosaic.version = 11 : i64} {
  func.func @_lstm_classify_kernel(%arg0: memref<64x128xbf16, #tpu.memory_space<vmem>>, %arg1: memref<128x512xbf16, #tpu.memory_space<vmem>>, %arg2: memref<128x512xbf16, #tpu.memory_space<vmem>>, %arg3: memref<1x512xf32, #tpu.memory_space<vmem>>, %arg4: memref<128x512xbf16, #tpu.memory_space<vmem>>, %arg5: memref<128x512xbf16, #tpu.memory_space<vmem>>, %arg6: memref<1x512xf32, #tpu.memory_space<vmem>>, %arg7: memref<128x128xbf16, #tpu.memory_space<vmem>>, %arg8: memref<1x128xf32, #tpu.memory_space<vmem>>, %arg9: memref<8x128xf32, #tpu.memory_space<vmem>>, %arg10: memref<64x512xf32, #tpu.memory_space<vmem>>, %arg11: memref<64x128xf32, #tpu.memory_space<vmem>>) attributes {dimension_semantics = [], scalar_prefetch = 0 : i64, scratch_operands = 2 : i64, tpu.core_type = #tpu.core_type<tc>} {
    %c0 = arith.constant 0 : index
    %c0_0 = arith.constant 0 : index
    %0 = vector.load %arg0[%c0, %c0_0] : memref<64x128xbf16, #tpu.memory_space<vmem>>, vector<64x128xbf16>
    %c0_1 = arith.constant 0 : index
    %c0_2 = arith.constant 0 : index
    %1 = vector.load %arg1[%c0_1, %c0_2] : memref<128x512xbf16, #tpu.memory_space<vmem>>, vector<128x512xbf16>
    %cst = arith.constant dense<0.000000e+00> : vector<64x512xf32>
    %2 = tpu.matmul %0, %1, %cst {dimension_numbers = #tpu.dot_dimension_numbers<[1], [0], [0], [1], [0, 0, 1, 1], [], []>} : vector<64x128xbf16>, vector<128x512xbf16>, vector<64x512xf32> -> vector<64x512xf32>
    %c0_3 = arith.constant 0 : index
    %c0_4 = arith.constant 0 : index
    %3 = vector.load %arg3[%c0_3, %c0_4] : memref<1x512xf32, #tpu.memory_space<vmem>>, vector<1x512xf32>
    %4 = vector.broadcast %3 : vector<1x512xf32> to vector<64x512xf32>
    %5 = arith.addf %2, %4 : vector<64x512xf32>
    %c0_5 = arith.constant 0 : index
    %c0_6 = arith.constant 0 : index
    %6 = vector.load %arg10[%c0_5, %c0_6] : memref<64x512xf32, #tpu.memory_space<vmem>>, vector<64x512xf32>
    tpu.vector_store %arg10[%c0_5, %c0_6], %5 {strides = array<i32>} : memref<64x512xf32, #tpu.memory_space<vmem>>, vector<64x512xf32>,
    %cst_7 = arith.constant 0.000000e+00 : f32
    %7 = vector.broadcast %cst_7 : f32 to vector<8x128xf32>
    %cst_8 = arith.constant 0.000000e+00 : f32
    %8 = vector.broadcast %cst_8 : f32 to vector<8x128xf32>
    %c0_9 = arith.constant 0 : index
    %c0_10 = arith.constant 0 : index
    %9 = vector.load %arg10[%c0_9, %c0_10] : memref<64x512xf32, #tpu.memory_space<vmem>>, vector<8x512xf32>
    %10 = arith.truncf %7 : vector<8x128xf32> to vector<8x128xbf16>
    %c0_11 = arith.constant 0 : index
    %c0_12 = arith.constant 0 : index
    %11 = vector.load %arg2[%c0_11, %c0_12] : memref<128x512xbf16, #tpu.memory_space<vmem>>, vector<128x512xbf16>
    %cst_13 = arith.constant dense<0.000000e+00> : vector<8x512xf32>
    %12 = tpu.matmul %10, %11, %cst_13 {dimension_numbers = #tpu.dot_dimension_numbers<[1], [0], [0], [1], [0, 0, 1, 1], [], []>} : vector<8x128xbf16>, vector<128x512xbf16>, vector<8x512xf32> -> vector<8x512xf32>
    %13 = arith.addf %9, %12 : vector<8x512xf32>
    %14 = vector.extract_strided_slice %13 {offsets = [0, 0], sizes = [8, 384], strides = [1, 1]} : vector<8x512xf32> to vector<8x384xf32>
    %cst_14 = arith.constant 5.000000e-01 : f32
    %15 = vector.broadcast %cst_14 : f32 to vector<8x384xf32>
    %16 = arith.mulf %15, %14 : vector<8x384xf32>
    %17 = math.tanh %16 : vector<8x384xf32>
    %cst_15 = arith.constant 5.000000e-01 : f32
    %18 = vector.broadcast %cst_15 : f32 to vector<8x384xf32>
    %19 = arith.mulf %18, %17 : vector<8x384xf32>
    %cst_16 = arith.constant 5.000000e-01 : f32
    %20 = vector.broadcast %cst_16 : f32 to vector<8x384xf32>
    %21 = arith.addf %19, %20 : vector<8x384xf32>
    %22 = vector.extract_strided_slice %13 {offsets = [0, 384], sizes = [8, 128], strides = [1, 1]} : vector<8x512xf32> to vector<8x128xf32>
    %23 = math.tanh %22 : vector<8x128xf32>
    %24 = vector.extract_strided_slice %21 {offsets = [0, 0], sizes = [8, 128], strides = [1, 1]} : vector<8x384xf32> to vector<8x128xf32>
    %25 = vector.extract_strided_slice %21 {offsets = [0, 128], sizes = [8, 128], strides = [1, 1]} : vector<8x384xf32> to vector<8x128xf32>
    %26 = vector.extract_strided_slice %21 {offsets = [0, 256], sizes = [8, 128], strides = [1, 1]} : vector<8x384xf32> to vector<8x128xf32>
    %27 = arith.mulf %25, %8 : vector<8x128xf32>
    %28 = arith.mulf %24, %23 : vector<8x128xf32>
    %29 = arith.addf %27, %28 : vector<8x128xf32>
    %30 = math.tanh %29 : vector<8x128xf32>
    %31 = arith.mulf %26, %30 : vector<8x128xf32>
    %c0_17 = arith.constant 0 : index
    %c0_18 = arith.constant 0 : index
    %32 = vector.load %arg11[%c0_17, %c0_18] : memref<64x128xf32, #tpu.memory_space<vmem>>, vector<8x128xf32>
    tpu.vector_store %arg11[%c0_17, %c0_18], %31 {strides = array<i32>} : memref<64x128xf32, #tpu.memory_space<vmem>>, vector<8x128xf32>,
    %c8 = arith.constant 8 : index
    %c0_19 = arith.constant 0 : index
    %33 = vector.load %arg10[%c8, %c0_19] : memref<64x512xf32, #tpu.memory_space<vmem>>, vector<8x512xf32>
    %34 = arith.truncf %31 : vector<8x128xf32> to vector<8x128xbf16>
    %c0_20 = arith.constant 0 : index
    %c0_21 = arith.constant 0 : index
    %35 = vector.load %arg2[%c0_20, %c0_21] : memref<128x512xbf16, #tpu.memory_space<vmem>>, vector<128x512xbf16>
    %cst_22 = arith.constant dense<0.000000e+00> : vector<8x512xf32>
    %36 = tpu.matmul %34, %35, %cst_22 {dimension_numbers = #tpu.dot_dimension_numbers<[1], [0], [0], [1], [0, 0, 1, 1], [], []>} : vector<8x128xbf16>, vector<128x512xbf16>, vector<8x512xf32> -> vector<8x512xf32>
    %37 = arith.addf %33, %36 : vector<8x512xf32>
    %38 = vector.extract_strided_slice %37 {offsets = [0, 0], sizes = [8, 384], strides = [1, 1]} : vector<8x512xf32> to vector<8x384xf32>
    %cst_23 = arith.constant 5.000000e-01 : f32
    %39 = vector.broadcast %cst_23 : f32 to vector<8x384xf32>
    %40 = arith.mulf %39, %38 : vector<8x384xf32>
    %41 = math.tanh %40 : vector<8x384xf32>
    %cst_24 = arith.constant 5.000000e-01 : f32
    %42 = vector.broadcast %cst_24 : f32 to vector<8x384xf32>
    %43 = arith.mulf %42, %41 : vector<8x384xf32>
    %cst_25 = arith.constant 5.000000e-01 : f32
    %44 = vector.broadcast %cst_25 : f32 to vector<8x384xf32>
    %45 = arith.addf %43, %44 : vector<8x384xf32>
    %46 = vector.extract_strided_slice %37 {offsets = [0, 384], sizes = [8, 128], strides = [1, 1]} : vector<8x512xf32> to vector<8x128xf32>
    %47 = math.tanh %46 : vector<8x128xf32>
    %48 = vector.extract_strided_slice %45 {offsets = [0, 0], sizes = [8, 128], strides = [1, 1]} : vector<8x384xf32> to vector<8x128xf32>
    %49 = vector.extract_strided_slice %45 {offsets = [0, 128], sizes = [8, 128], strides = [1, 1]} : vector<8x384xf32> to vector<8x128xf32>
    %50 = vector.extract_strided_slice %45 {offsets = [0, 256], sizes = [8, 128], strides = [1, 1]} : vector<8x384xf32> to vector<8x128xf32>
    %51 = arith.mulf %49, %29 : vector<8x128xf32>
    %52 = arith.mulf %48, %47 : vector<8x128xf32>
    %53 = arith.addf %51, %52 : vector<8x128xf32>
    %54 = math.tanh %53 : vector<8x128xf32>
    %55 = arith.mulf %50, %54 : vector<8x128xf32>
    %c8_26 = arith.constant 8 : index
    %c0_27 = arith.constant 0 : index
    %56 = vector.load %arg11[%c8_26, %c0_27] : memref<64x128xf32, #tpu.memory_space<vmem>>, vector<8x128xf32>
    tpu.vector_store %arg11[%c8_26, %c0_27], %55 {strides = array<i32>} : memref<64x128xf32, #tpu.memory_space<vmem>>, vector<8x128xf32>,
    %c16 = arith.constant 16 : index
    %c0_28 = arith.constant 0 : index
    %57 = vector.load %arg10[%c16, %c0_28] : memref<64x512xf32, #tpu.memory_space<vmem>>, vector<8x512xf32>
    %58 = arith.truncf %55 : vector<8x128xf32> to vector<8x128xbf16>
    %c0_29 = arith.constant 0 : index
    %c0_30 = arith.constant 0 : index
    %59 = vector.load %arg2[%c0_29, %c0_30] : memref<128x512xbf16, #tpu.memory_space<vmem>>, vector<128x512xbf16>
    %cst_31 = arith.constant dense<0.000000e+00> : vector<8x512xf32>
    %60 = tpu.matmul %58, %59, %cst_31 {dimension_numbers = #tpu.dot_dimension_numbers<[1], [0], [0], [1], [0, 0, 1, 1], [], []>} : vector<8x128xbf16>, vector<128x512xbf16>, vector<8x512xf32> -> vector<8x512xf32>
    %61 = arith.addf %57, %60 : vector<8x512xf32>
    %62 = vector.extract_strided_slice %61 {offsets = [0, 0], sizes = [8, 384], strides = [1, 1]} : vector<8x512xf32> to vector<8x384xf32>
    %cst_32 = arith.constant 5.000000e-01 : f32
    %63 = vector.broadcast %cst_32 : f32 to vector<8x384xf32>
    %64 = arith.mulf %63, %62 : vector<8x384xf32>
    %65 = math.tanh %64 : vector<8x384xf32>
    %cst_33 = arith.constant 5.000000e-01 : f32
    %66 = vector.broadcast %cst_33 : f32 to vector<8x384xf32>
    %67 = arith.mulf %66, %65 : vector<8x384xf32>
    %cst_34 = arith.constant 5.000000e-01 : f32
    %68 = vector.broadcast %cst_34 : f32 to vector<8x384xf32>
    %69 = arith.addf %67, %68 : vector<8x384xf32>
    %70 = vector.extract_strided_slice %61 {offsets = [0, 384], sizes = [8, 128], strides = [1, 1]} : vector<8x512xf32> to vector<8x128xf32>
    %71 = math.tanh %70 : vector<8x128xf32>
    %72 = vector.extract_strided_slice %69 {offsets = [0, 0], sizes = [8, 128], strides = [1, 1]} : vector<8x384xf32> to vector<8x128xf32>
    %73 = vector.extract_strided_slice %69 {offsets = [0, 128], sizes = [8, 128], strides = [1, 1]} : vector<8x384xf32> to vector<8x128xf32>
    %74 = vector.extract_strided_slice %69 {offsets = [0, 256], sizes = [8, 128], strides = [1, 1]} : vector<8x384xf32> to vector<8x128xf32>
    %75 = arith.mulf %73, %53 : vector<8x128xf32>
    %76 = arith.mulf %72, %71 : vector<8x128xf32>
    %77 = arith.addf %75, %76 : vector<8x128xf32>
    %78 = math.tanh %77 : vector<8x128xf32>
    %79 = arith.mulf %74, %78 : vector<8x128xf32>
    %c16_35 = arith.constant 16 : index
    %c0_36 = arith.constant 0 : index
    %80 = vector.load %arg11[%c16_35, %c0_36] : memref<64x128xf32, #tpu.memory_space<vmem>>, vector<8x128xf32>
    tpu.vector_store %arg11[%c16_35, %c0_36], %79 {strides = array<i32>} : memref<64x128xf32, #tpu.memory_space<vmem>>, vector<8x128xf32>,
    %c24 = arith.constant 24 : index
    %c0_37 = arith.constant 0 : index
    %81 = vector.load %arg10[%c24, %c0_37] : memref<64x512xf32, #tpu.memory_space<vmem>>, vector<8x512xf32>
    %82 = arith.truncf %79 : vector<8x128xf32> to vector<8x128xbf16>
    %c0_38 = arith.constant 0 : index
    %c0_39 = arith.constant 0 : index
    %83 = vector.load %arg2[%c0_38, %c0_39] : memref<128x512xbf16, #tpu.memory_space<vmem>>, vector<128x512xbf16>
    %cst_40 = arith.constant dense<0.000000e+00> : vector<8x512xf32>
    %84 = tpu.matmul %82, %83, %cst_40 {dimension_numbers = #tpu.dot_dimension_numbers<[1], [0], [0], [1], [0, 0, 1, 1], [], []>} : vector<8x128xbf16>, vector<128x512xbf16>, vector<8x512xf32> -> vector<8x512xf32>
    %85 = arith.addf %81, %84 : vector<8x512xf32>
    %86 = vector.extract_strided_slice %85 {offsets = [0, 0], sizes = [8, 384], strides = [1, 1]} : vector<8x512xf32> to vector<8x384xf32>
    %cst_41 = arith.constant 5.000000e-01 : f32
    %87 = vector.broadcast %cst_41 : f32 to vector<8x384xf32>
    %88 = arith.mulf %87, %86 : vector<8x384xf32>
    %89 = math.tanh %88 : vector<8x384xf32>
    %cst_42 = arith.constant 5.000000e-01 : f32
    %90 = vector.broadcast %cst_42 : f32 to vector<8x384xf32>
    %91 = arith.mulf %90, %89 : vector<8x384xf32>
    %cst_43 = arith.constant 5.000000e-01 : f32
    %92 = vector.broadcast %cst_43 : f32 to vector<8x384xf32>
    %93 = arith.addf %91, %92 : vector<8x384xf32>
    %94 = vector.extract_strided_slice %85 {offsets = [0, 384], sizes = [8, 128], strides = [1, 1]} : vector<8x512xf32> to vector<8x128xf32>
    %95 = math.tanh %94 : vector<8x128xf32>
    %96 = vector.extract_strided_slice %93 {offsets = [0, 0], sizes = [8, 128], strides = [1, 1]} : vector<8x384xf32> to vector<8x128xf32>
    %97 = vector.extract_strided_slice %93 {offsets = [0, 128], sizes = [8, 128], strides = [1, 1]} : vector<8x384xf32> to vector<8x128xf32>
    %98 = vector.extract_strided_slice %93 {offsets = [0, 256], sizes = [8, 128], strides = [1, 1]} : vector<8x384xf32> to vector<8x128xf32>
    %99 = arith.mulf %97, %77 : vector<8x128xf32>
    %100 = arith.mulf %96, %95 : vector<8x128xf32>
    %101 = arith.addf %99, %100 : vector<8x128xf32>
    %102 = math.tanh %101 : vector<8x128xf32>
    %103 = arith.mulf %98, %102 : vector<8x128xf32>
    %c24_44 = arith.constant 24 : index
    %c0_45 = arith.constant 0 : index
    %104 = vector.load %arg11[%c24_44, %c0_45] : memref<64x128xf32, #tpu.memory_space<vmem>>, vector<8x128xf32>
    tpu.vector_store %arg11[%c24_44, %c0_45], %103 {strides = array<i32>} : memref<64x128xf32, #tpu.memory_space<vmem>>, vector<8x128xf32>,
    %c32 = arith.constant 32 : index
    %c0_46 = arith.constant 0 : index
    %105 = vector.load %arg10[%c32, %c0_46] : memref<64x512xf32, #tpu.memory_space<vmem>>, vector<8x512xf32>
    %106 = arith.truncf %103 : vector<8x128xf32> to vector<8x128xbf16>
    %c0_47 = arith.constant 0 : index
    %c0_48 = arith.constant 0 : index
    %107 = vector.load %arg2[%c0_47, %c0_48] : memref<128x512xbf16, #tpu.memory_space<vmem>>, vector<128x512xbf16>
    %cst_49 = arith.constant dense<0.000000e+00> : vector<8x512xf32>
    %108 = tpu.matmul %106, %107, %cst_49 {dimension_numbers = #tpu.dot_dimension_numbers<[1], [0], [0], [1], [0, 0, 1, 1], [], []>} : vector<8x128xbf16>, vector<128x512xbf16>, vector<8x512xf32> -> vector<8x512xf32>
    %109 = arith.addf %105, %108 : vector<8x512xf32>
    %110 = vector.extract_strided_slice %109 {offsets = [0, 0], sizes = [8, 384], strides = [1, 1]} : vector<8x512xf32> to vector<8x384xf32>
    %cst_50 = arith.constant 5.000000e-01 : f32
    %111 = vector.broadcast %cst_50 : f32 to vector<8x384xf32>
    %112 = arith.mulf %111, %110 : vector<8x384xf32>
    %113 = math.tanh %112 : vector<8x384xf32>
    %cst_51 = arith.constant 5.000000e-01 : f32
    %114 = vector.broadcast %cst_51 : f32 to vector<8x384xf32>
    %115 = arith.mulf %114, %113 : vector<8x384xf32>
    %cst_52 = arith.constant 5.000000e-01 : f32
    %116 = vector.broadcast %cst_52 : f32 to vector<8x384xf32>
    %117 = arith.addf %115, %116 : vector<8x384xf32>
    %118 = vector.extract_strided_slice %109 {offsets = [0, 384], sizes = [8, 128], strides = [1, 1]} : vector<8x512xf32> to vector<8x128xf32>
    %119 = math.tanh %118 : vector<8x128xf32>
    %120 = vector.extract_strided_slice %117 {offsets = [0, 0], sizes = [8, 128], strides = [1, 1]} : vector<8x384xf32> to vector<8x128xf32>
    %121 = vector.extract_strided_slice %117 {offsets = [0, 128], sizes = [8, 128], strides = [1, 1]} : vector<8x384xf32> to vector<8x128xf32>
    %122 = vector.extract_strided_slice %117 {offsets = [0, 256], sizes = [8, 128], strides = [1, 1]} : vector<8x384xf32> to vector<8x128xf32>
    %123 = arith.mulf %121, %101 : vector<8x128xf32>
    %124 = arith.mulf %120, %119 : vector<8x128xf32>
    %125 = arith.addf %123, %124 : vector<8x128xf32>
    %126 = math.tanh %125 : vector<8x128xf32>
    %127 = arith.mulf %122, %126 : vector<8x128xf32>
    %c32_53 = arith.constant 32 : index
    %c0_54 = arith.constant 0 : index
    %128 = vector.load %arg11[%c32_53, %c0_54] : memref<64x128xf32, #tpu.memory_space<vmem>>, vector<8x128xf32>
    tpu.vector_store %arg11[%c32_53, %c0_54], %127 {strides = array<i32>} : memref<64x128xf32, #tpu.memory_space<vmem>>, vector<8x128xf32>,
    %c40 = arith.constant 40 : index
    %c0_55 = arith.constant 0 : index
    %129 = vector.load %arg10[%c40, %c0_55] : memref<64x512xf32, #tpu.memory_space<vmem>>, vector<8x512xf32>
    %130 = arith.truncf %127 : vector<8x128xf32> to vector<8x128xbf16>
    %c0_56 = arith.constant 0 : index
    %c0_57 = arith.constant 0 : index
    %131 = vector.load %arg2[%c0_56, %c0_57] : memref<128x512xbf16, #tpu.memory_space<vmem>>, vector<128x512xbf16>
    %cst_58 = arith.constant dense<0.000000e+00> : vector<8x512xf32>
    %132 = tpu.matmul %130, %131, %cst_58 {dimension_numbers = #tpu.dot_dimension_numbers<[1], [0], [0], [1], [0, 0, 1, 1], [], []>} : vector<8x128xbf16>, vector<128x512xbf16>, vector<8x512xf32> -> vector<8x512xf32>
    %133 = arith.addf %129, %132 : vector<8x512xf32>
    %134 = vector.extract_strided_slice %133 {offsets = [0, 0], sizes = [8, 384], strides = [1, 1]} : vector<8x512xf32> to vector<8x384xf32>
    %cst_59 = arith.constant 5.000000e-01 : f32
    %135 = vector.broadcast %cst_59 : f32 to vector<8x384xf32>
    %136 = arith.mulf %135, %134 : vector<8x384xf32>
    %137 = math.tanh %136 : vector<8x384xf32>
    %cst_60 = arith.constant 5.000000e-01 : f32
    %138 = vector.broadcast %cst_60 : f32 to vector<8x384xf32>
    %139 = arith.mulf %138, %137 : vector<8x384xf32>
    %cst_61 = arith.constant 5.000000e-01 : f32
    %140 = vector.broadcast %cst_61 : f32 to vector<8x384xf32>
    %141 = arith.addf %139, %140 : vector<8x384xf32>
    %142 = vector.extract_strided_slice %133 {offsets = [0, 384], sizes = [8, 128], strides = [1, 1]} : vector<8x512xf32> to vector<8x128xf32>
    %143 = math.tanh %142 : vector<8x128xf32>
    %144 = vector.extract_strided_slice %141 {offsets = [0, 0], sizes = [8, 128], strides = [1, 1]} : vector<8x384xf32> to vector<8x128xf32>
    %145 = vector.extract_strided_slice %141 {offsets = [0, 128], sizes = [8, 128], strides = [1, 1]} : vector<8x384xf32> to vector<8x128xf32>
    %146 = vector.extract_strided_slice %141 {offsets = [0, 256], sizes = [8, 128], strides = [1, 1]} : vector<8x384xf32> to vector<8x128xf32>
    %147 = arith.mulf %145, %125 : vector<8x128xf32>
    %148 = arith.mulf %144, %143 : vector<8x128xf32>
    %149 = arith.addf %147, %148 : vector<8x128xf32>
    %150 = math.tanh %149 : vector<8x128xf32>
    %151 = arith.mulf %146, %150 : vector<8x128xf32>
    %c40_62 = arith.constant 40 : index
    %c0_63 = arith.constant 0 : index
    %152 = vector.load %arg11[%c40_62, %c0_63] : memref<64x128xf32, #tpu.memory_space<vmem>>, vector<8x128xf32>
    tpu.vector_store %arg11[%c40_62, %c0_63], %151 {strides = array<i32>} : memref<64x128xf32, #tpu.memory_space<vmem>>, vector<8x128xf32>,
    %c48 = arith.constant 48 : index
    %c0_64 = arith.constant 0 : index
    %153 = vector.load %arg10[%c48, %c0_64] : memref<64x512xf32, #tpu.memory_space<vmem>>, vector<8x512xf32>
    %154 = arith.truncf %151 : vector<8x128xf32> to vector<8x128xbf16>
    %c0_65 = arith.constant 0 : index
    %c0_66 = arith.constant 0 : index
    %155 = vector.load %arg2[%c0_65, %c0_66] : memref<128x512xbf16, #tpu.memory_space<vmem>>, vector<128x512xbf16>
    %cst_67 = arith.constant dense<0.000000e+00> : vector<8x512xf32>
    %156 = tpu.matmul %154, %155, %cst_67 {dimension_numbers = #tpu.dot_dimension_numbers<[1], [0], [0], [1], [0, 0, 1, 1], [], []>} : vector<8x128xbf16>, vector<128x512xbf16>, vector<8x512xf32> -> vector<8x512xf32>
    %157 = arith.addf %153, %156 : vector<8x512xf32>
    %158 = vector.extract_strided_slice %157 {offsets = [0, 0], sizes = [8, 384], strides = [1, 1]} : vector<8x512xf32> to vector<8x384xf32>
    %cst_68 = arith.constant 5.000000e-01 : f32
    %159 = vector.broadcast %cst_68 : f32 to vector<8x384xf32>
    %160 = arith.mulf %159, %158 : vector<8x384xf32>
    %161 = math.tanh %160 : vector<8x384xf32>
    %cst_69 = arith.constant 5.000000e-01 : f32
    %162 = vector.broadcast %cst_69 : f32 to vector<8x384xf32>
    %163 = arith.mulf %162, %161 : vector<8x384xf32>
    %cst_70 = arith.constant 5.000000e-01 : f32
    %164 = vector.broadcast %cst_70 : f32 to vector<8x384xf32>
    %165 = arith.addf %163, %164 : vector<8x384xf32>
    %166 = vector.extract_strided_slice %157 {offsets = [0, 384], sizes = [8, 128], strides = [1, 1]} : vector<8x512xf32> to vector<8x128xf32>
    %167 = math.tanh %166 : vector<8x128xf32>
    %168 = vector.extract_strided_slice %165 {offsets = [0, 0], sizes = [8, 128], strides = [1, 1]} : vector<8x384xf32> to vector<8x128xf32>
    %169 = vector.extract_strided_slice %165 {offsets = [0, 128], sizes = [8, 128], strides = [1, 1]} : vector<8x384xf32> to vector<8x128xf32>
    %170 = vector.extract_strided_slice %165 {offsets = [0, 256], sizes = [8, 128], strides = [1, 1]} : vector<8x384xf32> to vector<8x128xf32>
    %171 = arith.mulf %169, %149 : vector<8x128xf32>
    %172 = arith.mulf %168, %167 : vector<8x128xf32>
    %173 = arith.addf %171, %172 : vector<8x128xf32>
    %174 = math.tanh %173 : vector<8x128xf32>
    %175 = arith.mulf %170, %174 : vector<8x128xf32>
    %c48_71 = arith.constant 48 : index
    %c0_72 = arith.constant 0 : index
    %176 = vector.load %arg11[%c48_71, %c0_72] : memref<64x128xf32, #tpu.memory_space<vmem>>, vector<8x128xf32>
    tpu.vector_store %arg11[%c48_71, %c0_72], %175 {strides = array<i32>} : memref<64x128xf32, #tpu.memory_space<vmem>>, vector<8x128xf32>,
    %c56 = arith.constant 56 : index
    %c0_73 = arith.constant 0 : index
    %177 = vector.load %arg10[%c56, %c0_73] : memref<64x512xf32, #tpu.memory_space<vmem>>, vector<8x512xf32>
    %178 = arith.truncf %175 : vector<8x128xf32> to vector<8x128xbf16>
    %c0_74 = arith.constant 0 : index
    %c0_75 = arith.constant 0 : index
    %179 = vector.load %arg2[%c0_74, %c0_75] : memref<128x512xbf16, #tpu.memory_space<vmem>>, vector<128x512xbf16>
    %cst_76 = arith.constant dense<0.000000e+00> : vector<8x512xf32>
    %180 = tpu.matmul %178, %179, %cst_76 {dimension_numbers = #tpu.dot_dimension_numbers<[1], [0], [0], [1], [0, 0, 1, 1], [], []>} : vector<8x128xbf16>, vector<128x512xbf16>, vector<8x512xf32> -> vector<8x512xf32>
    %181 = arith.addf %177, %180 : vector<8x512xf32>
    %182 = vector.extract_strided_slice %181 {offsets = [0, 0], sizes = [8, 384], strides = [1, 1]} : vector<8x512xf32> to vector<8x384xf32>
    %cst_77 = arith.constant 5.000000e-01 : f32
    %183 = vector.broadcast %cst_77 : f32 to vector<8x384xf32>
    %184 = arith.mulf %183, %182 : vector<8x384xf32>
    %185 = math.tanh %184 : vector<8x384xf32>
    %cst_78 = arith.constant 5.000000e-01 : f32
    %186 = vector.broadcast %cst_78 : f32 to vector<8x384xf32>
    %187 = arith.mulf %186, %185 : vector<8x384xf32>
    %cst_79 = arith.constant 5.000000e-01 : f32
    %188 = vector.broadcast %cst_79 : f32 to vector<8x384xf32>
    %189 = arith.addf %187, %188 : vector<8x384xf32>
    %190 = vector.extract_strided_slice %181 {offsets = [0, 384], sizes = [8, 128], strides = [1, 1]} : vector<8x512xf32> to vector<8x128xf32>
    %191 = math.tanh %190 : vector<8x128xf32>
    %192 = vector.extract_strided_slice %189 {offsets = [0, 0], sizes = [8, 128], strides = [1, 1]} : vector<8x384xf32> to vector<8x128xf32>
    %193 = vector.extract_strided_slice %189 {offsets = [0, 128], sizes = [8, 128], strides = [1, 1]} : vector<8x384xf32> to vector<8x128xf32>
    %194 = vector.extract_strided_slice %189 {offsets = [0, 256], sizes = [8, 128], strides = [1, 1]} : vector<8x384xf32> to vector<8x128xf32>
    %195 = arith.mulf %193, %173 : vector<8x128xf32>
    %196 = arith.mulf %192, %191 : vector<8x128xf32>
    %197 = arith.addf %195, %196 : vector<8x128xf32>
    %198 = math.tanh %197 : vector<8x128xf32>
    %199 = arith.mulf %194, %198 : vector<8x128xf32>
    %c56_80 = arith.constant 56 : index
    %c0_81 = arith.constant 0 : index
    %200 = vector.load %arg11[%c56_80, %c0_81] : memref<64x128xf32, #tpu.memory_space<vmem>>, vector<8x128xf32>
    tpu.vector_store %arg11[%c56_80, %c0_81], %199 {strides = array<i32>} : memref<64x128xf32, #tpu.memory_space<vmem>>, vector<8x128xf32>,
    %c0_82 = arith.constant 0 : index
    %c0_83 = arith.constant 0 : index
    %201 = vector.load %arg11[%c0_82, %c0_83] : memref<64x128xf32, #tpu.memory_space<vmem>>, vector<64x128xf32>
    %202 = arith.truncf %201 : vector<64x128xf32> to vector<64x128xbf16>
    %c0_84 = arith.constant 0 : index
    %c0_85 = arith.constant 0 : index
    %203 = vector.load %arg4[%c0_84, %c0_85] : memref<128x512xbf16, #tpu.memory_space<vmem>>, vector<128x512xbf16>
    %cst_86 = arith.constant dense<0.000000e+00> : vector<64x512xf32>
    %204 = tpu.matmul %202, %203, %cst_86 {dimension_numbers = #tpu.dot_dimension_numbers<[1], [0], [0], [1], [0, 0, 1, 1], [], []>} : vector<64x128xbf16>, vector<128x512xbf16>, vector<64x512xf32> -> vector<64x512xf32>
    %c0_87 = arith.constant 0 : index
    %c0_88 = arith.constant 0 : index
    %205 = vector.load %arg6[%c0_87, %c0_88] : memref<1x512xf32, #tpu.memory_space<vmem>>, vector<1x512xf32>
    %206 = vector.broadcast %205 : vector<1x512xf32> to vector<64x512xf32>
    %207 = arith.addf %204, %206 : vector<64x512xf32>
    %c0_89 = arith.constant 0 : index
    %c0_90 = arith.constant 0 : index
    %208 = vector.load %arg10[%c0_89, %c0_90] : memref<64x512xf32, #tpu.memory_space<vmem>>, vector<64x512xf32>
    tpu.vector_store %arg10[%c0_89, %c0_90], %207 {strides = array<i32>} : memref<64x512xf32, #tpu.memory_space<vmem>>, vector<64x512xf32>,
    %cst_91 = arith.constant 0.000000e+00 : f32
    %209 = vector.broadcast %cst_91 : f32 to vector<8x128xf32>
    %cst_92 = arith.constant 0.000000e+00 : f32
    %210 = vector.broadcast %cst_92 : f32 to vector<8x128xf32>
    %c0_93 = arith.constant 0 : index
    %c0_94 = arith.constant 0 : index
    %211 = vector.load %arg10[%c0_93, %c0_94] : memref<64x512xf32, #tpu.memory_space<vmem>>, vector<8x512xf32>
    %212 = arith.truncf %209 : vector<8x128xf32> to vector<8x128xbf16>
    %c0_95 = arith.constant 0 : index
    %c0_96 = arith.constant 0 : index
    %213 = vector.load %arg5[%c0_95, %c0_96] : memref<128x512xbf16, #tpu.memory_space<vmem>>, vector<128x512xbf16>
    %cst_97 = arith.constant dense<0.000000e+00> : vector<8x512xf32>
    %214 = tpu.matmul %212, %213, %cst_97 {dimension_numbers = #tpu.dot_dimension_numbers<[1], [0], [0], [1], [0, 0, 1, 1], [], []>} : vector<8x128xbf16>, vector<128x512xbf16>, vector<8x512xf32> -> vector<8x512xf32>
    %215 = arith.addf %211, %214 : vector<8x512xf32>
    %216 = vector.extract_strided_slice %215 {offsets = [0, 0], sizes = [8, 384], strides = [1, 1]} : vector<8x512xf32> to vector<8x384xf32>
    %cst_98 = arith.constant 5.000000e-01 : f32
    %217 = vector.broadcast %cst_98 : f32 to vector<8x384xf32>
    %218 = arith.mulf %217, %216 : vector<8x384xf32>
    %219 = math.tanh %218 : vector<8x384xf32>
    %cst_99 = arith.constant 5.000000e-01 : f32
    %220 = vector.broadcast %cst_99 : f32 to vector<8x384xf32>
    %221 = arith.mulf %220, %219 : vector<8x384xf32>
    %cst_100 = arith.constant 5.000000e-01 : f32
    %222 = vector.broadcast %cst_100 : f32 to vector<8x384xf32>
    %223 = arith.addf %221, %222 : vector<8x384xf32>
    %224 = vector.extract_strided_slice %215 {offsets = [0, 384], sizes = [8, 128], strides = [1, 1]} : vector<8x512xf32> to vector<8x128xf32>
    %225 = math.tanh %224 : vector<8x128xf32>
    %226 = vector.extract_strided_slice %223 {offsets = [0, 0], sizes = [8, 128], strides = [1, 1]} : vector<8x384xf32> to vector<8x128xf32>
    %227 = vector.extract_strided_slice %223 {offsets = [0, 128], sizes = [8, 128], strides = [1, 1]} : vector<8x384xf32> to vector<8x128xf32>
    %228 = vector.extract_strided_slice %223 {offsets = [0, 256], sizes = [8, 128], strides = [1, 1]} : vector<8x384xf32> to vector<8x128xf32>
    %229 = arith.mulf %227, %210 : vector<8x128xf32>
    %230 = arith.mulf %226, %225 : vector<8x128xf32>
    %231 = arith.addf %229, %230 : vector<8x128xf32>
    %232 = math.tanh %231 : vector<8x128xf32>
    %233 = arith.mulf %228, %232 : vector<8x128xf32>
    %c8_101 = arith.constant 8 : index
    %c0_102 = arith.constant 0 : index
    %234 = vector.load %arg10[%c8_101, %c0_102] : memref<64x512xf32, #tpu.memory_space<vmem>>, vector<8x512xf32>
    %235 = arith.truncf %233 : vector<8x128xf32> to vector<8x128xbf16>
    %c0_103 = arith.constant 0 : index
    %c0_104 = arith.constant 0 : index
    %236 = vector.load %arg5[%c0_103, %c0_104] : memref<128x512xbf16, #tpu.memory_space<vmem>>, vector<128x512xbf16>
    %cst_105 = arith.constant dense<0.000000e+00> : vector<8x512xf32>
    %237 = tpu.matmul %235, %236, %cst_105 {dimension_numbers = #tpu.dot_dimension_numbers<[1], [0], [0], [1], [0, 0, 1, 1], [], []>} : vector<8x128xbf16>, vector<128x512xbf16>, vector<8x512xf32> -> vector<8x512xf32>
    %238 = arith.addf %234, %237 : vector<8x512xf32>
    %239 = vector.extract_strided_slice %238 {offsets = [0, 0], sizes = [8, 384], strides = [1, 1]} : vector<8x512xf32> to vector<8x384xf32>
    %cst_106 = arith.constant 5.000000e-01 : f32
    %240 = vector.broadcast %cst_106 : f32 to vector<8x384xf32>
    %241 = arith.mulf %240, %239 : vector<8x384xf32>
    %242 = math.tanh %241 : vector<8x384xf32>
    %cst_107 = arith.constant 5.000000e-01 : f32
    %243 = vector.broadcast %cst_107 : f32 to vector<8x384xf32>
    %244 = arith.mulf %243, %242 : vector<8x384xf32>
    %cst_108 = arith.constant 5.000000e-01 : f32
    %245 = vector.broadcast %cst_108 : f32 to vector<8x384xf32>
    %246 = arith.addf %244, %245 : vector<8x384xf32>
    %247 = vector.extract_strided_slice %238 {offsets = [0, 384], sizes = [8, 128], strides = [1, 1]} : vector<8x512xf32> to vector<8x128xf32>
    %248 = math.tanh %247 : vector<8x128xf32>
    %249 = vector.extract_strided_slice %246 {offsets = [0, 0], sizes = [8, 128], strides = [1, 1]} : vector<8x384xf32> to vector<8x128xf32>
    %250 = vector.extract_strided_slice %246 {offsets = [0, 128], sizes = [8, 128], strides = [1, 1]} : vector<8x384xf32> to vector<8x128xf32>
    %251 = vector.extract_strided_slice %246 {offsets = [0, 256], sizes = [8, 128], strides = [1, 1]} : vector<8x384xf32> to vector<8x128xf32>
    %252 = arith.mulf %250, %231 : vector<8x128xf32>
    %253 = arith.mulf %249, %248 : vector<8x128xf32>
    %254 = arith.addf %252, %253 : vector<8x128xf32>
    %255 = math.tanh %254 : vector<8x128xf32>
    %256 = arith.mulf %251, %255 : vector<8x128xf32>
    %c16_109 = arith.constant 16 : index
    %c0_110 = arith.constant 0 : index
    %257 = vector.load %arg10[%c16_109, %c0_110] : memref<64x512xf32, #tpu.memory_space<vmem>>, vector<8x512xf32>
    %258 = arith.truncf %256 : vector<8x128xf32> to vector<8x128xbf16>
    %c0_111 = arith.constant 0 : index
    %c0_112 = arith.constant 0 : index
    %259 = vector.load %arg5[%c0_111, %c0_112] : memref<128x512xbf16, #tpu.memory_space<vmem>>, vector<128x512xbf16>
    %cst_113 = arith.constant dense<0.000000e+00> : vector<8x512xf32>
    %260 = tpu.matmul %258, %259, %cst_113 {dimension_numbers = #tpu.dot_dimension_numbers<[1], [0], [0], [1], [0, 0, 1, 1], [], []>} : vector<8x128xbf16>, vector<128x512xbf16>, vector<8x512xf32> -> vector<8x512xf32>
    %261 = arith.addf %257, %260 : vector<8x512xf32>
    %262 = vector.extract_strided_slice %261 {offsets = [0, 0], sizes = [8, 384], strides = [1, 1]} : vector<8x512xf32> to vector<8x384xf32>
    %cst_114 = arith.constant 5.000000e-01 : f32
    %263 = vector.broadcast %cst_114 : f32 to vector<8x384xf32>
    %264 = arith.mulf %263, %262 : vector<8x384xf32>
    %265 = math.tanh %264 : vector<8x384xf32>
    %cst_115 = arith.constant 5.000000e-01 : f32
    %266 = vector.broadcast %cst_115 : f32 to vector<8x384xf32>
    %267 = arith.mulf %266, %265 : vector<8x384xf32>
    %cst_116 = arith.constant 5.000000e-01 : f32
    %268 = vector.broadcast %cst_116 : f32 to vector<8x384xf32>
    %269 = arith.addf %267, %268 : vector<8x384xf32>
    %270 = vector.extract_strided_slice %261 {offsets = [0, 384], sizes = [8, 128], strides = [1, 1]} : vector<8x512xf32> to vector<8x128xf32>
    %271 = math.tanh %270 : vector<8x128xf32>
    %272 = vector.extract_strided_slice %269 {offsets = [0, 0], sizes = [8, 128], strides = [1, 1]} : vector<8x384xf32> to vector<8x128xf32>
    %273 = vector.extract_strided_slice %269 {offsets = [0, 128], sizes = [8, 128], strides = [1, 1]} : vector<8x384xf32> to vector<8x128xf32>
    %274 = vector.extract_strided_slice %269 {offsets = [0, 256], sizes = [8, 128], strides = [1, 1]} : vector<8x384xf32> to vector<8x128xf32>
    %275 = arith.mulf %273, %254 : vector<8x128xf32>
    %276 = arith.mulf %272, %271 : vector<8x128xf32>
    %277 = arith.addf %275, %276 : vector<8x128xf32>
    %278 = math.tanh %277 : vector<8x128xf32>
    %279 = arith.mulf %274, %278 : vector<8x128xf32>
    %c24_117 = arith.constant 24 : index
    %c0_118 = arith.constant 0 : index
    %280 = vector.load %arg10[%c24_117, %c0_118] : memref<64x512xf32, #tpu.memory_space<vmem>>, vector<8x512xf32>
    %281 = arith.truncf %279 : vector<8x128xf32> to vector<8x128xbf16>
    %c0_119 = arith.constant 0 : index
    %c0_120 = arith.constant 0 : index
    %282 = vector.load %arg5[%c0_119, %c0_120] : memref<128x512xbf16, #tpu.memory_space<vmem>>, vector<128x512xbf16>
    %cst_121 = arith.constant dense<0.000000e+00> : vector<8x512xf32>
    %283 = tpu.matmul %281, %282, %cst_121 {dimension_numbers = #tpu.dot_dimension_numbers<[1], [0], [0], [1], [0, 0, 1, 1], [], []>} : vector<8x128xbf16>, vector<128x512xbf16>, vector<8x512xf32> -> vector<8x512xf32>
    %284 = arith.addf %280, %283 : vector<8x512xf32>
    %285 = vector.extract_strided_slice %284 {offsets = [0, 0], sizes = [8, 384], strides = [1, 1]} : vector<8x512xf32> to vector<8x384xf32>
    %cst_122 = arith.constant 5.000000e-01 : f32
    %286 = vector.broadcast %cst_122 : f32 to vector<8x384xf32>
    %287 = arith.mulf %286, %285 : vector<8x384xf32>
    %288 = math.tanh %287 : vector<8x384xf32>
    %cst_123 = arith.constant 5.000000e-01 : f32
    %289 = vector.broadcast %cst_123 : f32 to vector<8x384xf32>
    %290 = arith.mulf %289, %288 : vector<8x384xf32>
    %cst_124 = arith.constant 5.000000e-01 : f32
    %291 = vector.broadcast %cst_124 : f32 to vector<8x384xf32>
    %292 = arith.addf %290, %291 : vector<8x384xf32>
    %293 = vector.extract_strided_slice %284 {offsets = [0, 384], sizes = [8, 128], strides = [1, 1]} : vector<8x512xf32> to vector<8x128xf32>
    %294 = math.tanh %293 : vector<8x128xf32>
    %295 = vector.extract_strided_slice %292 {offsets = [0, 0], sizes = [8, 128], strides = [1, 1]} : vector<8x384xf32> to vector<8x128xf32>
    %296 = vector.extract_strided_slice %292 {offsets = [0, 128], sizes = [8, 128], strides = [1, 1]} : vector<8x384xf32> to vector<8x128xf32>
    %297 = vector.extract_strided_slice %292 {offsets = [0, 256], sizes = [8, 128], strides = [1, 1]} : vector<8x384xf32> to vector<8x128xf32>
    %298 = arith.mulf %296, %277 : vector<8x128xf32>
    %299 = arith.mulf %295, %294 : vector<8x128xf32>
    %300 = arith.addf %298, %299 : vector<8x128xf32>
    %301 = math.tanh %300 : vector<8x128xf32>
    %302 = arith.mulf %297, %301 : vector<8x128xf32>
    %c32_125 = arith.constant 32 : index
    %c0_126 = arith.constant 0 : index
    %303 = vector.load %arg10[%c32_125, %c0_126] : memref<64x512xf32, #tpu.memory_space<vmem>>, vector<8x512xf32>
    %304 = arith.truncf %302 : vector<8x128xf32> to vector<8x128xbf16>
    %c0_127 = arith.constant 0 : index
    %c0_128 = arith.constant 0 : index
    %305 = vector.load %arg5[%c0_127, %c0_128] : memref<128x512xbf16, #tpu.memory_space<vmem>>, vector<128x512xbf16>
    %cst_129 = arith.constant dense<0.000000e+00> : vector<8x512xf32>
    %306 = tpu.matmul %304, %305, %cst_129 {dimension_numbers = #tpu.dot_dimension_numbers<[1], [0], [0], [1], [0, 0, 1, 1], [], []>} : vector<8x128xbf16>, vector<128x512xbf16>, vector<8x512xf32> -> vector<8x512xf32>
    %307 = arith.addf %303, %306 : vector<8x512xf32>
    %308 = vector.extract_strided_slice %307 {offsets = [0, 0], sizes = [8, 384], strides = [1, 1]} : vector<8x512xf32> to vector<8x384xf32>
    %cst_130 = arith.constant 5.000000e-01 : f32
    %309 = vector.broadcast %cst_130 : f32 to vector<8x384xf32>
    %310 = arith.mulf %309, %308 : vector<8x384xf32>
    %311 = math.tanh %310 : vector<8x384xf32>
    %cst_131 = arith.constant 5.000000e-01 : f32
    %312 = vector.broadcast %cst_131 : f32 to vector<8x384xf32>
    %313 = arith.mulf %312, %311 : vector<8x384xf32>
    %cst_132 = arith.constant 5.000000e-01 : f32
    %314 = vector.broadcast %cst_132 : f32 to vector<8x384xf32>
    %315 = arith.addf %313, %314 : vector<8x384xf32>
    %316 = vector.extract_strided_slice %307 {offsets = [0, 384], sizes = [8, 128], strides = [1, 1]} : vector<8x512xf32> to vector<8x128xf32>
    %317 = math.tanh %316 : vector<8x128xf32>
    %318 = vector.extract_strided_slice %315 {offsets = [0, 0], sizes = [8, 128], strides = [1, 1]} : vector<8x384xf32> to vector<8x128xf32>
    %319 = vector.extract_strided_slice %315 {offsets = [0, 128], sizes = [8, 128], strides = [1, 1]} : vector<8x384xf32> to vector<8x128xf32>
    %320 = vector.extract_strided_slice %315 {offsets = [0, 256], sizes = [8, 128], strides = [1, 1]} : vector<8x384xf32> to vector<8x128xf32>
    %321 = arith.mulf %319, %300 : vector<8x128xf32>
    %322 = arith.mulf %318, %317 : vector<8x128xf32>
    %323 = arith.addf %321, %322 : vector<8x128xf32>
    %324 = math.tanh %323 : vector<8x128xf32>
    %325 = arith.mulf %320, %324 : vector<8x128xf32>
    %c40_133 = arith.constant 40 : index
    %c0_134 = arith.constant 0 : index
    %326 = vector.load %arg10[%c40_133, %c0_134] : memref<64x512xf32, #tpu.memory_space<vmem>>, vector<8x512xf32>
    %327 = arith.truncf %325 : vector<8x128xf32> to vector<8x128xbf16>
    %c0_135 = arith.constant 0 : index
    %c0_136 = arith.constant 0 : index
    %328 = vector.load %arg5[%c0_135, %c0_136] : memref<128x512xbf16, #tpu.memory_space<vmem>>, vector<128x512xbf16>
    %cst_137 = arith.constant dense<0.000000e+00> : vector<8x512xf32>
    %329 = tpu.matmul %327, %328, %cst_137 {dimension_numbers = #tpu.dot_dimension_numbers<[1], [0], [0], [1], [0, 0, 1, 1], [], []>} : vector<8x128xbf16>, vector<128x512xbf16>, vector<8x512xf32> -> vector<8x512xf32>
    %330 = arith.addf %326, %329 : vector<8x512xf32>
    %331 = vector.extract_strided_slice %330 {offsets = [0, 0], sizes = [8, 384], strides = [1, 1]} : vector<8x512xf32> to vector<8x384xf32>
    %cst_138 = arith.constant 5.000000e-01 : f32
    %332 = vector.broadcast %cst_138 : f32 to vector<8x384xf32>
    %333 = arith.mulf %332, %331 : vector<8x384xf32>
    %334 = math.tanh %333 : vector<8x384xf32>
    %cst_139 = arith.constant 5.000000e-01 : f32
    %335 = vector.broadcast %cst_139 : f32 to vector<8x384xf32>
    %336 = arith.mulf %335, %334 : vector<8x384xf32>
    %cst_140 = arith.constant 5.000000e-01 : f32
    %337 = vector.broadcast %cst_140 : f32 to vector<8x384xf32>
    %338 = arith.addf %336, %337 : vector<8x384xf32>
    %339 = vector.extract_strided_slice %330 {offsets = [0, 384], sizes = [8, 128], strides = [1, 1]} : vector<8x512xf32> to vector<8x128xf32>
    %340 = math.tanh %339 : vector<8x128xf32>
    %341 = vector.extract_strided_slice %338 {offsets = [0, 0], sizes = [8, 128], strides = [1, 1]} : vector<8x384xf32> to vector<8x128xf32>
    %342 = vector.extract_strided_slice %338 {offsets = [0, 128], sizes = [8, 128], strides = [1, 1]} : vector<8x384xf32> to vector<8x128xf32>
    %343 = vector.extract_strided_slice %338 {offsets = [0, 256], sizes = [8, 128], strides = [1, 1]} : vector<8x384xf32> to vector<8x128xf32>
    %344 = arith.mulf %342, %323 : vector<8x128xf32>
    %345 = arith.mulf %341, %340 : vector<8x128xf32>
    %346 = arith.addf %344, %345 : vector<8x128xf32>
    %347 = math.tanh %346 : vector<8x128xf32>
    %348 = arith.mulf %343, %347 : vector<8x128xf32>
    %c48_141 = arith.constant 48 : index
    %c0_142 = arith.constant 0 : index
    %349 = vector.load %arg10[%c48_141, %c0_142] : memref<64x512xf32, #tpu.memory_space<vmem>>, vector<8x512xf32>
    %350 = arith.truncf %348 : vector<8x128xf32> to vector<8x128xbf16>
    %c0_143 = arith.constant 0 : index
    %c0_144 = arith.constant 0 : index
    %351 = vector.load %arg5[%c0_143, %c0_144] : memref<128x512xbf16, #tpu.memory_space<vmem>>, vector<128x512xbf16>
    %cst_145 = arith.constant dense<0.000000e+00> : vector<8x512xf32>
    %352 = tpu.matmul %350, %351, %cst_145 {dimension_numbers = #tpu.dot_dimension_numbers<[1], [0], [0], [1], [0, 0, 1, 1], [], []>} : vector<8x128xbf16>, vector<128x512xbf16>, vector<8x512xf32> -> vector<8x512xf32>
    %353 = arith.addf %349, %352 : vector<8x512xf32>
    %354 = vector.extract_strided_slice %353 {offsets = [0, 0], sizes = [8, 384], strides = [1, 1]} : vector<8x512xf32> to vector<8x384xf32>
    %cst_146 = arith.constant 5.000000e-01 : f32
    %355 = vector.broadcast %cst_146 : f32 to vector<8x384xf32>
    %356 = arith.mulf %355, %354 : vector<8x384xf32>
    %357 = math.tanh %356 : vector<8x384xf32>
    %cst_147 = arith.constant 5.000000e-01 : f32
    %358 = vector.broadcast %cst_147 : f32 to vector<8x384xf32>
    %359 = arith.mulf %358, %357 : vector<8x384xf32>
    %cst_148 = arith.constant 5.000000e-01 : f32
    %360 = vector.broadcast %cst_148 : f32 to vector<8x384xf32>
    %361 = arith.addf %359, %360 : vector<8x384xf32>
    %362 = vector.extract_strided_slice %353 {offsets = [0, 384], sizes = [8, 128], strides = [1, 1]} : vector<8x512xf32> to vector<8x128xf32>
    %363 = math.tanh %362 : vector<8x128xf32>
    %364 = vector.extract_strided_slice %361 {offsets = [0, 0], sizes = [8, 128], strides = [1, 1]} : vector<8x384xf32> to vector<8x128xf32>
    %365 = vector.extract_strided_slice %361 {offsets = [0, 128], sizes = [8, 128], strides = [1, 1]} : vector<8x384xf32> to vector<8x128xf32>
    %366 = vector.extract_strided_slice %361 {offsets = [0, 256], sizes = [8, 128], strides = [1, 1]} : vector<8x384xf32> to vector<8x128xf32>
    %367 = arith.mulf %365, %346 : vector<8x128xf32>
    %368 = arith.mulf %364, %363 : vector<8x128xf32>
    %369 = arith.addf %367, %368 : vector<8x128xf32>
    %370 = math.tanh %369 : vector<8x128xf32>
    %371 = arith.mulf %366, %370 : vector<8x128xf32>
    %c56_149 = arith.constant 56 : index
    %c0_150 = arith.constant 0 : index
    %372 = vector.load %arg10[%c56_149, %c0_150] : memref<64x512xf32, #tpu.memory_space<vmem>>, vector<8x512xf32>
    %373 = arith.truncf %371 : vector<8x128xf32> to vector<8x128xbf16>
    %c0_151 = arith.constant 0 : index
    %c0_152 = arith.constant 0 : index
    %374 = vector.load %arg5[%c0_151, %c0_152] : memref<128x512xbf16, #tpu.memory_space<vmem>>, vector<128x512xbf16>
    %cst_153 = arith.constant dense<0.000000e+00> : vector<8x512xf32>
    %375 = tpu.matmul %373, %374, %cst_153 {dimension_numbers = #tpu.dot_dimension_numbers<[1], [0], [0], [1], [0, 0, 1, 1], [], []>} : vector<8x128xbf16>, vector<128x512xbf16>, vector<8x512xf32> -> vector<8x512xf32>
    %376 = arith.addf %372, %375 : vector<8x512xf32>
    %377 = vector.extract_strided_slice %376 {offsets = [0, 0], sizes = [8, 384], strides = [1, 1]} : vector<8x512xf32> to vector<8x384xf32>
    %cst_154 = arith.constant 5.000000e-01 : f32
    %378 = vector.broadcast %cst_154 : f32 to vector<8x384xf32>
    %379 = arith.mulf %378, %377 : vector<8x384xf32>
    %380 = math.tanh %379 : vector<8x384xf32>
    %cst_155 = arith.constant 5.000000e-01 : f32
    %381 = vector.broadcast %cst_155 : f32 to vector<8x384xf32>
    %382 = arith.mulf %381, %380 : vector<8x384xf32>
    %cst_156 = arith.constant 5.000000e-01 : f32
    %383 = vector.broadcast %cst_156 : f32 to vector<8x384xf32>
    %384 = arith.addf %382, %383 : vector<8x384xf32>
    %385 = vector.extract_strided_slice %376 {offsets = [0, 384], sizes = [8, 128], strides = [1, 1]} : vector<8x512xf32> to vector<8x128xf32>
    %386 = math.tanh %385 : vector<8x128xf32>
    %387 = vector.extract_strided_slice %384 {offsets = [0, 0], sizes = [8, 128], strides = [1, 1]} : vector<8x384xf32> to vector<8x128xf32>
    %388 = vector.extract_strided_slice %384 {offsets = [0, 128], sizes = [8, 128], strides = [1, 1]} : vector<8x384xf32> to vector<8x128xf32>
    %389 = vector.extract_strided_slice %384 {offsets = [0, 256], sizes = [8, 128], strides = [1, 1]} : vector<8x384xf32> to vector<8x128xf32>
    %390 = arith.mulf %388, %369 : vector<8x128xf32>
    %391 = arith.mulf %387, %386 : vector<8x128xf32>
    %392 = arith.addf %390, %391 : vector<8x128xf32>
    %393 = math.tanh %392 : vector<8x128xf32>
    %394 = arith.mulf %389, %393 : vector<8x128xf32>
    %395 = arith.truncf %394 : vector<8x128xf32> to vector<8x128xbf16>
    %c0_157 = arith.constant 0 : index
    %c0_158 = arith.constant 0 : index
    %396 = vector.load %arg7[%c0_157, %c0_158] : memref<128x128xbf16, #tpu.memory_space<vmem>>, vector<128x128xbf16>
    %cst_159 = arith.constant dense<0.000000e+00> : vector<8x128xf32>
    %397 = tpu.matmul %395, %396, %cst_159 {dimension_numbers = #tpu.dot_dimension_numbers<[1], [0], [0], [1], [0, 0, 1, 1], [], []>} : vector<8x128xbf16>, vector<128x128xbf16>, vector<8x128xf32> -> vector<8x128xf32>
    %c0_160 = arith.constant 0 : index
    %c0_161 = arith.constant 0 : index
    %398 = vector.load %arg8[%c0_160, %c0_161] : memref<1x128xf32, #tpu.memory_space<vmem>>, vector<1x128xf32>
    %399 = vector.broadcast %398 : vector<1x128xf32> to vector<8x128xf32>
    %400 = arith.addf %397, %399 : vector<8x128xf32>
    %c0_162 = arith.constant 0 : index
    %c0_163 = arith.constant 0 : index
    %401 = vector.load %arg9[%c0_162, %c0_163] : memref<8x128xf32, #tpu.memory_space<vmem>>, vector<8x128xf32>
    tpu.vector_store %arg9[%c0_162, %c0_163], %400 {strides = array<i32>} : memref<8x128xf32, #tpu.memory_space<vmem>>, vector<8x128xf32>,
    return
  }
}

</mosaic_0001>

<bundles_post_ra>
// kernel: tpu_custom_call.1
= control target key start
LH: loop header
LB: loop body
LE: loop exit
PB: predicated region body
PF: predicated region fallthrough
CT: control target
= control target key end

     0   :  { %14 = vsyncpa [#allocation5], 0  ;;  %s6958_s0 = inlined_call_operand.hbm [shape: bf16[64,128], index: 0, kind: input, shape index: {}]   ;;  %s6959_s1 = inlined_call_operand.hbm [shape: bf16[128,512], index: 1, kind: input, shape index: {}]   ;;  %s6960_s2 = inlined_call_operand.hbm [shape: bf16[128,512], index: 2, kind: input, shape index: {}]   ;;  %s6961_s3 = inlined_call_operand.hbm [shape: f32[1,512], index: 3, kind: input, shape index: {}]   ;;  %s6962_s4 = inlined_call_operand.hbm [shape: bf16[128,512], index: 4, kind: input, shape index: {}]   ;;  %s6963_s5 = inlined_call_operand.hbm [shape: bf16[128,512], index: 5, kind: input, shape index: {}]   ;;  %s6964_s6 = inlined_call_operand.vmem [shape: f32[1,512], index: 6, kind: input, shape index: {}]   ;;  %s6965_s7 = inlined_call_operand.hbm [shape: bf16[128,128], index: 7, kind: input, shape index: {}]   ;;  %s6966_s8 = inlined_call_operand.vmem [shape: f32[1,128], index: 8, kind: input, shape index: {}]   ;;  %s6967_s9 = inlined_call_operand.hbm [shape: f32[8,128], index: 9, kind: output, shape index: {}]  }
   0x1   :  { %15 = vsyncpa [#allocation8], 0 }
   0x2   :  { %16 = vsyncpa [#allocation11], 0 }
   0x3   :  { %17 = vsyncpa [#allocation14], 0  ;;  %s36_s11 = sshll.u32 %s6959_s1, 4  ;;  %s37_s11 = int_to_ptr.hbm [resolvable:$true] %s36_s11 }
   0x4   :  { %18 = vsyncpa [#allocation6], 0  ;;  %s6182_s12 = smov [#allocation7]   ;;  %s63_s16 = sshll.u32 %s6961_s3, 4  ;;  %s64_s16 = int_to_ptr.hbm [resolvable:$true] %s63_s16 }
   0x5   :  { %s38_s13 = sshll.u32 %s6182_s12, 4  ;;  %s6183_s17 = smov 256   ;;  %s39_s13 = int_to_ptr.vmem [resolvable:$true] %s38_s13 }
   0x6   :  { %s6184_s18 = smov 16   ;;  %s6185_s19 = smov [#allocation10]  }
   0x7   :  { %44 = dma.hbm_to_vmem [thread:$0]  %s37_s11, 4096, %s39_s13, [#allocation8], %s6183_s17, %s6183_s17, %s6184_s18  }
   0x8   :  { %s65_s20 = sshll.u32 %s6185_s19, 4  ;;  %s86_s22 = sshll.u32 %s6963_s5, 4  ;;  %s66_s20 = int_to_ptr.vmem [resolvable:$true] %s65_s20  ;;  %s87_s22 = int_to_ptr.hbm [resolvable:$true] %s86_s22 }
   0x9   :  { %68 = dma.hbm_to_vmem [thread:$0]  %s64_s16, 64, %s66_s20, [#allocation11]  }
   0xa   :  { %s23_s3 = sshll.u32 %s6958_s0, 4  ;;  %s6186_s25 = smov [#allocation13]   ;;  %s24_s3 = int_to_ptr.hbm [resolvable:$true] %s23_s3 }
   0xb   :  { %s88_s26 = sshll.u32 %s6186_s25, 4  ;;  %s6187_s27 = smov [#allocation4]   ;;  %s89_s26 = int_to_ptr.vmem [resolvable:$true] %s88_s26 }
   0xc   :  { %94 = dma.hbm_to_vmem [thread:$0]  %s87_s22, 4096, %s89_s26, [#allocation14], %s6183_s17, %s6183_s17, %s6184_s18  }
   0xd   :  { %s25_s28 = sshll.u32 %s6187_s27, 4  ;;  %s6188_s29 = smov 64   ;;  %s26_s28 = int_to_ptr.vmem [resolvable:$true] %s25_s28 }
   0xe   :  { %s6189_s5 = smov 4   ;;  %s49_s11 = sshll.u32 %s6960_s2, 4  ;;  %s50_s11 = int_to_ptr.hbm [resolvable:$true] %s49_s11 }
   0xf   :  { %31 = dma.hbm_to_vmem [thread:$0]  %s24_s3, 512, %s26_s28, [#allocation5], %s6188_s29, %s6188_s29, %s6189_s5  }
  0x10   :  { %s6190_s0 = smov [#allocation9]   ;;  %s73_s15 = sshll.u32 %s6962_s4, 4  ;;  %s74_s15 = int_to_ptr.hbm [resolvable:$true] %s73_s15 }
  0x11   :  { %s51_s12 = sshll.u32 %s6190_s0, 4  ;;  %s6191_s16 = smov [#allocation12]   ;;  %s52_s12 = int_to_ptr.vmem [resolvable:$true] %s51_s12 }
  0x12   :  { %57 = dma.hbm_to_vmem [thread:$0]  %s50_s11, 4096, %s52_s12, [#allocation8], %s6183_s17, %s6183_s17, %s6184_s18  }
  0x13   :  { %s75_s19 = sshll.u32 %s6191_s16, 4  ;;  %s101_s1 = sshll.u32 %s6965_s7, 4  ;;  %s76_s19 = int_to_ptr.vmem [resolvable:$true] %s75_s19  ;;  %s102_s1 = int_to_ptr.hbm [resolvable:$true] %s101_s1 }
  0x14   :  { %81 = dma.hbm_to_vmem [thread:$0]  %s74_s15, 4096, %s76_s19, [#allocation11], %s6183_s17, %s6183_s17, %s6184_s18  }
  0x15   :  { %s6192_s2 = smov [#allocation15]  }
  0x16   :  { %s103_s22 = sshll.u32 %s6192_s2, 4  ;;  %s104_s22 = int_to_ptr.vmem [resolvable:$true] %s103_s22 }
  0x17   :  { %109 = dma.hbm_to_vmem [thread:$0]  %s102_s1, 1024, %s104_s22, [#allocation14], %s6188_s29, %s6188_s29, %s6189_s5  }
  0x18   :  { %6172 = dma.done.wait [#allocation5], 512  }
  0x19   :  { %6173 = vsyncadd [#allocation5], 4294966784 }
  0x1a   :  { %6174 = dma.done.wait [#allocation8], 8192  }
  0x1b   :  { %6175 = vsyncadd [#allocation8], 4294959104 }
  0x1c   :  { %6176 = dma.done.wait [#allocation11], 4160  }
  0x1d   :  { %6177 = vsyncadd [#allocation11], 4294963136 }
  0x1e   :  { %6178 = dma.done.wait [#allocation14], 5120  }
  0x1f   :  { %6179 = vsyncadd [#allocation14], 4294962176  ;;  %v4116_v0 = vld [vmem:[#allocation7 + $0xe0] sm:$0xf]  ;;  %v5476_v1 = vld [vmem:[#allocation7 + $0xec] sm:$0xf0] }
  0x20   :  { %v5474_v2 = vld [vmem:[#allocation7 + $0xe4] sm:$0xf]  ;;  %v4117_v3 = vor.u32 %v5476_v1, %v4116_v0  ;;  %v4118_v4 = vld [vmem:[#allocation7 + $0xf0] sm:$0xf0]  ;;  %v4124_v5 = vld [vmem:[#allocation7 + $0xe8] sm:$0xf] }
  0x21   :  { %v5477_v6 = vld [vmem:[#allocation7 + $0xf4] sm:$0xf0]  ;;  %v4121_v7 = vor.u32 %v5474_v2, %v4118_v4  ;;  %v5475_v9 = vld [vmem:[#allocation7 + $0xec] sm:$0xf]  ;;  %v4126_v10 = vld [vmem:[#allocation7 + $0xf8] sm:$0xf0] }
  0x22   :  { %v4125_v8 = vor.u32 %v5477_v6, %v4124_v5  ;;  %v4100_v11 = vld [vmem:[#allocation7 + $0xc0] sm:$0xf]  ;;  %375 = vmatpush.bf16.msra.mxu0 %v4117_v3  ;;  %v4129_v12 = vor.u32 %v5475_v9, %v4126_v10  ;;  %v5472_v13 = vld [vmem:[#allocation7 + $0xcc] sm:$0xf0]  ;;  %v5470_v14 = vld [vmem:[#allocation7 + $0xc4] sm:$0xf] }
  0x23   :  { %v4102_v15 = vld [vmem:[#allocation7 + $0xd0] sm:$0xf0]  ;;  %404 = vmatpush.bf16.msra.mxu1 %v4121_v7  ;;  %v4101_v16 = vor.u32 %v5472_v13, %v4100_v11  ;;  %v4108_v18 = vld [vmem:[#allocation7 + $0xc8] sm:$0xf]  ;;  %v5473_v19 = vld [vmem:[#allocation7 + $0xd4] sm:$0xf0] }
  0x24   :  { %433 = vmatpush.bf16.msra.mxu2 %v4125_v8  ;;  %v4105_v17 = vor.u32 %v5470_v14, %v4102_v15  ;;  %v5471_v20 = vld [vmem:[#allocation7 + $0xcc] sm:$0xf]  ;;  %462 = vmatpush.bf16.msra.mxu3 %v4129_v12  ;;  %v4109_v21 = vor.u32 %v5473_v19, %v4108_v18  ;;  %v4110_v22 = vld [vmem:[#allocation7 + $0xd8] sm:$0xf0]  ;;  %v4084_v23 = vld [vmem:[#allocation7 + $0xa0] sm:$0xf] }
  0x25   :  { %v5468_v24 = vld [vmem:[#allocation7 + $0xac] sm:$0xf0]  ;;  %v4113_v25 = vor.u32 %v5471_v20, %v4110_v22  ;;  %v5466_v26 = vld [vmem:[#allocation7 + $0xa4] sm:$0xf]  ;;  %v4086_v27 = vld [vmem:[#allocation7 + $0xb0] sm:$0xf0] }
  0x26   :  { %v4092_v28 = vld [vmem:[#allocation7 + $0xa8] sm:$0xf]  ;;  %376 = vmatpush.bf16.msra.mxu0 %v4101_v16  ;;  %v4085_v29 = vor.u32 %v5468_v24, %v4084_v23  ;;  %v5469_v30 = vld [vmem:[#allocation7 + $0xb4] sm:$0xf0]  ;;  %v5467_v31 = vld [vmem:[#allocation7 + $0xac] sm:$0xf]  ;;  %v4089_v33 = vor.u32 %v5466_v26, %v4086_v27 }
  0x27   :  { %v4094_v32 = vld [vmem:[#allocation7 + $0xb8] sm:$0xf0]  ;;  %405 = vmatpush.bf16.msra.mxu1 %v4105_v17  ;;  %v4093_v34 = vor.u32 %v5469_v30, %v4092_v28  ;;  %v4068_v35 = vld [vmem:[#allocation7 + $0x80] sm:$0xf]  ;;  %v5464_v36 = vld [vmem:[#allocation7 + $0x8c] sm:$0xf0] }
  0x28   :  { %434 = vmatpush.bf16.msra.mxu2 %v4109_v21  ;;  %v5462_v37 = vld [vmem:[#allocation7 + $0x84] sm:$0xf]  ;;  %463 = vmatpush.bf16.msra.mxu3 %v4113_v25  ;;  %v4097_v38 = vor.u32 %v5467_v31, %v4094_v32  ;;  %v4070_v39 = vld [vmem:[#allocation7 + $0x90] sm:$0xf0]  ;;  %v4076_v40 = vld [vmem:[#allocation7 + $0x88] sm:$0xf]  ;;  %v4069_v44 = vor.u32 %v5464_v36, %v4068_v35 }
  0x29   :  { %v5465_v41 = vld [vmem:[#allocation7 + $0x94] sm:$0xf0]  ;;  %v5463_v42 = vld [vmem:[#allocation7 + $0x8c] sm:$0xf]  ;;  %v4078_v43 = vld [vmem:[#allocation7 + $0x98] sm:$0xf0]  ;;  %v4073_v45 = vor.u32 %v5462_v37, %v4070_v39 }
  0x2a   :  { %377 = vmatpush.bf16.msra.mxu0 %v4085_v29  ;;  %v4077_v46 = vor.u32 %v5465_v41, %v4076_v40  ;;  %v4052_v47 = vld [vmem:[#allocation7 + $0x60] sm:$0xf]  ;;  %v5460_v48 = vld [vmem:[#allocation7 + $0x6c] sm:$0xf0]  ;;  %v5458_v49 = vld [vmem:[#allocation7 + $0x64] sm:$0xf]  ;;  %v4081_v50 = vor.u32 %v5463_v42, %v4078_v43 }
  0x2b   :  { %406 = vmatpush.bf16.msra.mxu1 %v4089_v33  ;;  %v4054_v51 = vld [vmem:[#allocation7 + $0x70] sm:$0xf0]  ;;  %v4060_v52 = vld [vmem:[#allocation7 + $0x68] sm:$0xf]  ;;  %v5461_v53 = vld [vmem:[#allocation7 + $0x74] sm:$0xf0]  ;;  %v4053_v56 = vor.u32 %v5460_v48, %v4052_v47 }
  0x2c   :  { %435 = vmatpush.bf16.msra.mxu2 %v4093_v34  ;;  %464 = vmatpush.bf16.msra.mxu3 %v4097_v38  ;;  %v5459_v54 = vld [vmem:[#allocation7 + $0x6c] sm:$0xf]  ;;  %v4062_v55 = vld [vmem:[#allocation7 + $0x78] sm:$0xf0]  ;;  %v4057_v57 = vor.u32 %v5458_v49, %v4054_v51  ;;  %v4061_v58 = vor.u32 %v5461_v53, %v4060_v52  ;;  %v4036_v59 = vld [vmem:[#allocation7 + $0x40] sm:$0xf] }
  0x2d   :  { %v5456_v60 = vld [vmem:[#allocation7 + $0x4c] sm:$0xf0]  ;;  %v5454_v61 = vld [vmem:[#allocation7 + $0x44] sm:$0xf]  ;;  %v4065_v62 = vor.u32 %v5459_v54, %v4062_v55  ;;  %v4038_v63 = vld [vmem:[#allocation7 + $0x50] sm:$0xf0] }
  0x2e   :  { %378 = vmatpush.bf16.msra.mxu0 %v4069_v44  ;;  %v4044_v0 = vld [vmem:[#allocation7 + $0x48] sm:$0xf]  ;;  %v5457_v1 = vld [vmem:[#allocation7 + $0x54] sm:$0xf0]  ;;  %v5455_v2 = vld [vmem:[#allocation7 + $0x4c] sm:$0xf]  ;;  %v4037_v4 = vor.u32 %v5456_v60, %v4036_v59  ;;  %v4041_v5 = vor.u32 %v5454_v61, %v4038_v63 }
  0x2f   :  { %407 = vmatpush.bf16.msra.mxu1 %v4073_v45  ;;  %v4046_v3 = vld [vmem:[#allocation7 + $0x58] sm:$0xf0]  ;;  %v4045_v6 = vor.u32 %v5457_v1, %v4044_v0  ;;  %v4020_v7 = vld [vmem:[#allocation7 + $0x20] sm:$0xf]  ;;  %v5452_v8 = vld [vmem:[#allocation7 + $0x2c] sm:$0xf0] }
  0x30   :  { %436 = vmatpush.bf16.msra.mxu2 %v4077_v46  ;;  %465 = vmatpush.bf16.msra.mxu3 %v4081_v50  ;;  %v5450_v9 = vld [vmem:[#allocation7 + $0x24] sm:$0xf]  ;;  %v4049_v10 = vor.u32 %v5455_v2, %v4046_v3  ;;  %v4022_v11 = vld [vmem:[#allocation7 + $0x30] sm:$0xf0]  ;;  %v4028_v12 = vld [vmem:[#allocation7 + $0x28] sm:$0xf]  ;;  %v4021_v16 = vor.u32 %v5452_v8, %v4020_v7 }
  0x31   :  { %v5453_v13 = vld [vmem:[#allocation7 + $0x34] sm:$0xf0]  ;;  %v5451_v14 = vld [vmem:[#allocation7 + $0x2c] sm:$0xf]  ;;  %v4030_v15 = vld [vmem:[#allocation7 + $0x38] sm:$0xf0]  ;;  %v4025_v18 = vor.u32 %v5450_v9, %v4022_v11 }
  0x32   :  { %379 = vmatpush.bf16.msra.mxu0 %v4053_v56  ;;  %v4004_v17 = vld [vmem:[#allocation7] sm:$0xf]  ;;  %v4029_v19 = vor.u32 %v5453_v13, %v4028_v12  ;;  %v5448_v20 = vld [vmem:[#allocation7 + $0xc] sm:$0xf0]  ;;  %v5446_v21 = vld [vmem:[#allocation7 + $0x4] sm:$0xf]  ;;  %v4033_v23 = vor.u32 %v5451_v14, %v4030_v15 }
  0x33   :  { %408 = vmatpush.bf16.msra.mxu1 %v4057_v57  ;;  %v4006_v22 = vld [vmem:[#allocation7 + $0x10] sm:$0xf0]  ;;  %v4012_v24 = vld [vmem:[#allocation7 + $0x8] sm:$0xf]  ;;  %v5449_v25 = vld [vmem:[#allocation7 + $0x14] sm:$0xf0]  ;;  %v4005_v30 = vor.u32 %v5448_v20, %v4004_v17 }
  0x34   :  { %437 = vmatpush.bf16.msra.mxu2 %v4061_v58  ;;  %466 = vmatpush.bf16.msra.mxu3 %v4065_v62  ;;  %v5447_v26 = vld [vmem:[#allocation7 + $0xc] sm:$0xf]  ;;  %v4014_v27 = vld [vmem:[#allocation7 + $0x18] sm:$0xf0]  ;;  %v4244_v28 = vld [vmem:[#allocation9 + $0xe0] sm:$0xf]  ;;  %v4009_v33 = vor.u32 %v5446_v21, %v4006_v22  ;;  %v4013_v34 = vor.u32 %v5449_v25, %v4012_v24 }
  0x35   :  { %v5508_v29 = vld [vmem:[#allocation9 + $0xec] sm:$0xf0]  ;;  %v5506_v31 = vld [vmem:[#allocation9 + $0xe4] sm:$0xf]  ;;  %v4246_v32 = vld [vmem:[#allocation9 + $0xf0] sm:$0xf0]  ;;  %v4017_v36 = vor.u32 %v5447_v26, %v4014_v27 }
  0x36   :  { %380 = vmatpush.bf16.msra.mxu0 %v4037_v4  ;;  %v5442_v35 = vld [vmem:[#allocation4] sm:$0xff]  ;;  %v4245_v37 = vor.u32 %v5508_v29, %v4244_v28  ;;  %v5507_v38 = vld [vmem:[#allocation9 + $0xec] sm:$0xf]  ;;  %v4252_v39 = vld [vmem:[#allocation9 + $0xe8] sm:$0xf]  ;;  %v4249_v41 = vor.u32 %v5506_v31, %v4246_v32  ;;  %s6194_s18 = smov [#allocation16]  }
  0x37   :  { %409 = vmatpush.bf16.msra.mxu1 %v4041_v5  ;;  %v5509_v40 = vld [vmem:[#allocation9 + $0xf4] sm:$0xf0]  ;;  %v4254_v42 = vld [vmem:[#allocation9 + $0xf8] sm:$0xf0]  ;;  %v4228_v43 = vld [vmem:[#allocation9 + $0xc0] sm:$0xf] }
  0x38   :  { %438 = vmatpush.bf16.msra.mxu2 %v4045_v6  ;;  %467 = vmatpush.bf16.msra.mxu3 %v4049_v10  ;;  %v5504_v44 = vld [vmem:[#allocation9 + $0xcc] sm:$0xf0]  ;;  %v5502_v45 = vld [vmem:[#allocation9 + $0xc4] sm:$0xf]  ;;  %v4230_v46 = vld [vmem:[#allocation9 + $0xd0] sm:$0xf0]  ;;  %v4253_v47 = vor.u32 %v5509_v40, %v4252_v39  ;;  %v4257_v49 = vor.u32 %v5507_v38, %v4254_v42 }
  0x39   :  { %v5503_v48 = vld [vmem:[#allocation9 + $0xcc] sm:$0xf]  ;;  %v4229_v50 = vor.u32 %v5504_v44, %v4228_v43  ;;  %v4236_v51 = vld [vmem:[#allocation9 + $0xc8] sm:$0xf]  ;;  %v5505_v52 = vld [vmem:[#allocation9 + $0xd4] sm:$0xf0]  ;;  %v4233_v53 = vor.u32 %v5502_v45, %v4230_v46 }
  0x3a   :  { %381 = vmatpush.bf16.msra.mxu0 %v4021_v16  ;;  %v4238_v54 = vld [vmem:[#allocation9 + $0xd8] sm:$0xf0]  ;;  %v4212_v55 = vld [vmem:[#allocation9 + $0xa0] sm:$0xf]  ;;  %v5500_v56 = vld [vmem:[#allocation9 + $0xac] sm:$0xf0]  ;;  %v4237_v59 = vor.u32 %v5505_v52, %v4236_v51 }
  0x3b   :  { %410 = vmatpush.bf16.msra.mxu1 %v4025_v18  ;;  %v5498_v57 = vld [vmem:[#allocation9 + $0xa4] sm:$0xf]  ;;  %v4214_v58 = vld [vmem:[#allocation9 + $0xb0] sm:$0xf0]  ;;  %v4241_v60 = vor.u32 %v5503_v48, %v4238_v54  ;;  %v4213_v61 = vor.u32 %v5500_v56, %v4212_v55  ;;  %v5499_v62 = vld [vmem:[#allocation9 + $0xac] sm:$0xf] }
  0x3c   :  { %439 = vmatpush.bf16.msra.mxu2 %v4029_v19  ;;  %468 = vmatpush.bf16.msra.mxu3 %v4033_v23  ;;  %v4220_v63 = vld [vmem:[#allocation9 + $0xa8] sm:$0xf]  ;;  %v5501_v0 = vld [vmem:[#allocation9 + $0xb4] sm:$0xf0]  ;;  %v4217_v1 = vor.u32 %v5498_v57, %v4214_v58  ;;  %v4222_v2 = vld [vmem:[#allocation9 + $0xb8] sm:$0xf0] }
  0x3d   :  { %v4196_v3 = vld [vmem:[#allocation9 + $0x80] sm:$0xf]  ;;  %v5496_v4 = vld [vmem:[#allocation9 + $0x8c] sm:$0xf0]  ;;  %v5494_v5 = vld [vmem:[#allocation9 + $0x84] sm:$0xf]  ;;  %v4221_v7 = vor.u32 %v5501_v0, %v4220_v63  ;;  %v4225_v8 = vor.u32 %v5499_v62, %v4222_v2 }
  0x3e   :  { %382 = vmatpush.bf16.msra.mxu0 %v4005_v30  ;;  %v4198_v6 = vld [vmem:[#allocation9 + $0x90] sm:$0xf0]  ;;  %v4197_v9 = vor.u32 %v5496_v4, %v4196_v3  ;;  %v5495_v10 = vld [vmem:[#allocation9 + $0x8c] sm:$0xf]  ;;  %v4204_v11 = vld [vmem:[#allocation9 + $0x88] sm:$0xf] }
  0x3f   :  { %411 = vmatpush.bf16.msra.mxu1 %v4009_v33  ;;  %v5497_v12 = vld [vmem:[#allocation9 + $0x94] sm:$0xf0]  ;;  %v4201_v13 = vor.u32 %v5494_v5, %v4198_v6  ;;  %v4206_v14 = vld [vmem:[#allocation9 + $0x98] sm:$0xf0]  ;;  %v4180_v15 = vld [vmem:[#allocation9 + $0x60] sm:$0xf] }
  0x40   :  { %440 = vmatpush.bf16.msra.mxu2 %v4013_v34  ;;  %469 = vmatpush.bf16.msra.mxu3 %v4017_v36  ;;  %v5492_v16 = vld [vmem:[#allocation9 + $0x6c] sm:$0xf0]  ;;  %v5490_v17 = vld [vmem:[#allocation9 + $0x64] sm:$0xf]  ;;  %v4182_v18 = vld [vmem:[#allocation9 + $0x70] sm:$0xf0]  ;;  %v4205_v20 = vor.u32 %v5497_v12, %v4204_v11  ;;  %v4209_v21 = vor.u32 %v5495_v10, %v4206_v14 }
  0x41   :  { %383 = vmatmul.bf16.vlgmr.msra.gmra.mxu0 %v5442_v35  ;;  %v5443_v19 = vld [vmem:[#allocation4 + $0x8] sm:$0xff]  ;;  %v4181_v22 = vor.u32 %v5492_v16, %v4180_v15  ;;  %v5493_v25 = vld [vmem:[#allocation9 + $0x74] sm:$0xf0]  ;;  %v4185_v26 = vor.u32 %v5490_v17, %v4182_v18  ;;  %v4190_v27 = vld [vmem:[#allocation9 + $0x78] sm:$0xf0]  ;;  %v6193_v4 = vmov 0  }
  0x42   :  { %719 = vmatpush.bf16.msrb.mxu0 %v4245_v37  ;;  %412 = vmatmul.bf16.vlgmr.msra.gmra.mxu1 %v5442_v35  ;;  %v5491_v23 = vld [vmem:[#allocation9 + $0x6c] sm:$0xf]  ;;  %v4188_v24 = vld [vmem:[#allocation9 + $0x68] sm:$0xf]  ;;  %v4164_v28 = vld [vmem:[#allocation9 + $0x40] sm:$0xf] }
  0x43   :  { %732 = vmatpush.bf16.msrb.mxu1 %v4249_v41  ;;  %441 = vmatmul.bf16.vlgmr.msra.gmra.mxu2 %v5442_v35  ;;  %v5488_v29 = vld [vmem:[#allocation9 + $0x4c] sm:$0xf0]  ;;  %v5486_v30 = vld [vmem:[#allocation9 + $0x44] sm:$0xf]  ;;  %v4166_v31 = vld [vmem:[#allocation9 + $0x50] sm:$0xf0]  ;;  %v4189_v32 = vor.u32 %v5493_v25, %v4188_v24  ;;  %v4193_v33 = vor.u32 %v5491_v23, %v4190_v27 }
  0x44   :  { %470 = vmatmul.bf16.vlgmr.msra.gmra.mxu3 %v5442_v35  ;;  %745 = vmatpush.bf16.msrb.mxu2 %v4253_v47  ;;  %v4165_v34 = vor.u32 %v5488_v29, %v4164_v28  ;;  %v4172_v35 = vld [vmem:[#allocation9 + $0x48] sm:$0xf]  ;;  %v5489_v36 = vld [vmem:[#allocation9 + $0x54] sm:$0xf0]  ;;  %v4169_v37 = vor.u32 %v5486_v30, %v4166_v31  ;;  %v5487_v38 = vld [vmem:[#allocation9 + $0x4c] sm:$0xf] }
  0x45   :  { %758 = vmatpush.bf16.msrb.mxu3 %v4257_v49  ;;  %v4174_v39 = vld [vmem:[#allocation9 + $0x58] sm:$0xf0]  ;;  %v4173_v40 = vor.u32 %v5489_v36, %v4172_v35  ;;  %v4148_v41 = vld [vmem:[#allocation9 + $0x20] sm:$0xf]  ;;  %v5484_v42 = vld [vmem:[#allocation9 + $0x2c] sm:$0xf0] }
  0x46   :  { %720 = vmatpush.bf16.msrb.mxu0 %v4229_v50  ;;  %v5482_v43 = vld [vmem:[#allocation9 + $0x24] sm:$0xf]  ;;  %v4177_v44 = vor.u32 %v5487_v38, %v4174_v39  ;;  %v4149_v45 = vor.u32 %v5484_v42, %v4148_v41  ;;  %v4150_v46 = vld [vmem:[#allocation9 + $0x30] sm:$0xf0]  ;;  %v5483_v47 = vld [vmem:[#allocation9 + $0x2c] sm:$0xf] }
  0x47   :  { %733 = vmatpush.bf16.msrb.mxu1 %v4233_v53  ;;  %v4158_v48 = vld [vmem:[#allocation9 + $0x38] sm:$0xf0]  ;;  %v4153_v49 = vor.u32 %v5482_v43, %v4150_v46  ;;  %v4156_v50 = vld [vmem:[#allocation9 + $0x28] sm:$0xf]  ;;  %v5485_v51 = vld [vmem:[#allocation9 + $0x34] sm:$0xf0] }
  0x48   :  { %746 = vmatpush.bf16.msrb.mxu2 %v4237_v59  ;;  %v4132_v52 = vld [vmem:[#allocation9] sm:$0xf]  ;;  %v5480_v53 = vld [vmem:[#allocation9 + $0xc] sm:$0xf0]  ;;  %v5478_v54 = vld [vmem:[#allocation9 + $0x4] sm:$0xf]  ;;  %v4157_v56 = vor.u32 %v5485_v51, %v4156_v50  ;;  %v4161_v57 = vor.u32 %v5483_v47, %v4158_v48 }
  0x49   :  { %759 = vmatpush.bf16.msrb.mxu3 %v4241_v60  ;;  %v4134_v55 = vld [vmem:[#allocation9 + $0x10] sm:$0xf0]  ;;  %v4133_v58 = vor.u32 %v5480_v53, %v4132_v52  ;;  %v4140_v59 = vld [vmem:[#allocation9 + $0x8] sm:$0xf]  ;;  %v5481_v60 = vld [vmem:[#allocation9 + $0x14] sm:$0xf0] }
  0x4a   :  { %721 = vmatpush.bf16.msrb.mxu0 %v4213_v61  ;;  %v4137_v61 = vor.u32 %v5478_v54, %v4134_v55  ;;  %v5479_v62 = vld [vmem:[#allocation9 + $0xc] sm:$0xf]  ;;  %v4142_v63 = vld [vmem:[#allocation9 + $0x18] sm:$0xf0]  ;;  %v4141_v0 = vor.u32 %v5481_v60, %v4140_v59  ;;  %v5444_v2 = vld [vmem:[#allocation4 + $0x10] sm:$0xff]  ;;  %s3971_s23 = sshll.u32 %s6194_s18, 4  ;;  %s3972_s23 = int_to_ptr.vmem [resolvable:$true] %s3971_s23 }
  0x4b   :  { %734 = vmatpush.bf16.msrb.mxu1 %v4217_v1  ;;  %v4145_v1 = vor.u32 %v5479_v62, %v4142_v63  ;;  %v5445_v3 = vld [vmem:[#allocation4 + $0x18] sm:$0xff]  ;;  %v181_v11 = vld [vmem:[#allocation10] sm:$0xf]  ;;  %v5540_v30 = vld [vmem:[#allocation9 + $0xec] sm:$0xf0]  ;;  %s3973_s25 = sshll.u32 %s6967_s9, 4  ;;  %s3974_s25 = int_to_ptr.hbm [resolvable:$true] %s3973_s25 }
  0x4c   :  { %747 = vmatpush.bf16.msrb.mxu2 %v4221_v7  ;;  %v6294_v12 = vperm.slane %v181_v11, 0  ;;  %v6298_v14 = vperm.slane %v181_v11, 1  ;;  %v4372_v29 = vld [vmem:[#allocation9 + $0xe0] sm:$0xf]  ;;  %v5538_v31 = vld [vmem:[#allocation9 + $0xe4] sm:$0xf] }
  0x4d   :  { %760 = vmatpush.bf16.msrb.mxu3 %v4225_v8  ;;  %v4374_v35 = vld [vmem:[#allocation9 + $0xf0] sm:$0xf0]  ;;  %v4380_v36 = vld [vmem:[#allocation9 + $0xe8] sm:$0xf]  ;;  %v5539_v42 = vld [vmem:[#allocation9 + $0xec] sm:$0xf] }
  0x4e   :  { %722 = vmatpush.bf16.msrb.mxu0 %v4197_v9  ;;  %v4382_v43 = vld [vmem:[#allocation9 + $0xf8] sm:$0xf0]  ;;  %v4356_v46 = vld [vmem:[#allocation9 + $0xc0] sm:$0xf]  ;;  %v5536_v47 = vld [vmem:[#allocation9 + $0xcc] sm:$0xf0] }
  0x4f   :  { %735 = vmatpush.bf16.msrb.mxu1 %v4201_v13  ;;  %v5534_v48 = vld [vmem:[#allocation9 + $0xc4] sm:$0xf]  ;;  %v4358_v50 = vld [vmem:[#allocation9 + $0xd0] sm:$0xf0]  ;;  %v4364_v51 = vld [vmem:[#allocation9 + $0xc8] sm:$0xf] }
  0x50   :  { %748 = vmatpush.bf16.msrb.mxu2 %v4205_v20  ;;  %v6308_v20 = vperm.slane %v181_v11, 2  ;;  %v5537_v52 = vld [vmem:[#allocation9 + $0xd4] sm:$0xf0]  ;;  %v4361_v53 = vor.u32 %v5534_v48, %v4358_v50  ;;  %v5535_v55 = vld [vmem:[#allocation9 + $0xcc] sm:$0xf] }
  0x51   :  { %761 = vmatpush.bf16.msrb.mxu3 %v4209_v21  ;;  %388 = vmatmul.bf16.gmra.mxu0 %v5443_v19  ;;  %v6310_v21 = vperm.slane %v181_v11, 3  ;;  %v4365_v54 = vor.u32 %v5537_v52, %v4364_v51  ;;  %v4340_v59 = vld [vmem:[#allocation9 + $0xa0] sm:$0xf]  ;;  %v5532_v60 = vld [vmem:[#allocation9 + $0xac] sm:$0xf0] }
  0x52   :  { %723 = vmatpush.bf16.msrb.mxu0 %v4181_v22  ;;  %417 = vmatmul.bf16.gmra.mxu1 %v5443_v19  ;;  %v5533_v11 = vld [vmem:[#allocation9 + $0xb4] sm:$0xf0]  ;;  %v4308_v48 = vld [vmem:[#allocation9 + $0x60] sm:$0xf]  ;;  %v5522_v50 = vld [vmem:[#allocation9 + $0x64] sm:$0xf] }
  0x53   :  { %736 = vmatpush.bf16.msrb.mxu1 %v4185_v26  ;;  %446 = vmatmul.bf16.gmra.mxu2 %v5443_v19 }
  0x54   :  { %475 = vmatmul.bf16.gmra.mxu3 %v5443_v19  ;;  %749 = vmatpush.bf16.msrb.mxu2 %v4189_v32 }
  0x55   :  { %762 = vmatpush.bf16.msrb.mxu3 %v4193_v33 }
  0x56   :  { %724 = vmatpush.bf16.msrb.mxu0 %v4165_v34  ;;  %v4373_v34 = vor.u32 %v5540_v30, %v4372_v29  ;;  %v5531_v29 = vld [vmem:[#allocation9 + $0xac] sm:$0xf]  ;;  %v4350_v30 = vld [vmem:[#allocation9 + $0xb8] sm:$0xf0] }
  0x57   :  { %737 = vmatpush.bf16.msrb.mxu1 %v4169_v37  ;;  %v5541_v37 = vld [vmem:[#allocation9 + $0xf4] sm:$0xf0] }
  0x58   :  { %750 = vmatpush.bf16.msrb.mxu2 %v4173_v40  ;;  %v4377_v40 = vor.u32 %v5538_v31, %v4374_v35  ;;  %v4381_v41 = vor.u32 %v5541_v37, %v4380_v36  ;;  %v4353_v31 = vor.u32 %v5531_v29, %v4350_v30  ;;  %v5526_v35 = vld [vmem:[#allocation9 + $0x84] sm:$0xf]  ;;  %v4326_v37 = vld [vmem:[#allocation9 + $0x90] sm:$0xf0]  ;;  %v4300_v30 = vld [vmem:[#allocation9 + $0x48] sm:$0xf] }
  0x59   :  { %763 = vmatpush.bf16.msrb.mxu3 %v4177_v44  ;;  %v4294_v29 = vld [vmem:[#allocation9 + $0x50] sm:$0xf0] }
  0x5a   :  { %725 = vmatpush.bf16.msrb.mxu0 %v4149_v45  ;;  %v4385_v45 = vor.u32 %v5539_v42, %v4382_v43  ;;  %v5527_v43 = vld [vmem:[#allocation9 + $0x8c] sm:$0xf] }
  0x5b   :  { %738 = vmatpush.bf16.msrb.mxu1 %v4153_v49  ;;  %v4357_v49 = vor.u32 %v5536_v47, %v4356_v46 }
  0x5c   :  { %751 = vmatpush.bf16.msrb.mxu2 %v4157_v56  ;;  %v4366_v56 = vld [vmem:[#allocation9 + $0xd8] sm:$0xf0] }
  0x5d   :  { %764 = vmatpush.bf16.msrb.mxu3 %v4161_v57  ;;  %v4369_v57 = vor.u32 %v5535_v55, %v4366_v56  ;;  %v4316_v55 = vld [vmem:[#allocation9 + $0x68] sm:$0xf]  ;;  %v5525_v56 = vld [vmem:[#allocation9 + $0x74] sm:$0xf0] }
  0x5e   :  { %726 = vmatpush.bf16.msrb.mxu0 %v4133_v58 }
  0x5f   :  { %739 = vmatpush.bf16.msrb.mxu1 %v4137_v61  ;;  %v5530_v61 = vld [vmem:[#allocation9 + $0xa4] sm:$0xf] }
  0x60   :  { %752 = vmatpush.bf16.msrb.mxu2 %v4141_v0 }
  0x61   :  { %765 = vmatpush.bf16.msrb.mxu3 %v4145_v1  ;;  %393 = vmatmul.bf16.gmra.mxu0 %v5444_v2  ;;  %v4341_v1 = vor.u32 %v5532_v60, %v4340_v59  ;;  %v4317_v60 = vor.u32 %v5525_v56, %v4316_v55  ;;  %v5515_v55 = vld [vmem:[#allocation9 + $0x2c] sm:$0xf]  ;;  %v4286_v56 = vld [vmem:[#allocation9 + $0x38] sm:$0xf0] }
  0x62   :  { %422 = vmatmul.bf16.gmra.mxu1 %v5444_v2  ;;  %991 = vmatpush.bf16.msra.mxu0 %v4373_v34  ;;  %v5528_v34 = vld [vmem:[#allocation9 + $0x8c] sm:$0xf0] }
  0x63   :  { %451 = vmatmul.bf16.gmra.mxu2 %v5444_v2  ;;  %1004 = vmatpush.bf16.msra.mxu1 %v4377_v40  ;;  %v5529_v40 = vld [vmem:[#allocation9 + $0x94] sm:$0xf0] }
  0x64   :  { %480 = vmatmul.bf16.gmra.mxu3 %v5444_v2  ;;  %1017 = vmatpush.bf16.msra.mxu2 %v4381_v41  ;;  %v4342_v2 = vld [vmem:[#allocation9 + $0xb0] sm:$0xf0]  ;;  %v4329_v41 = vor.u32 %v5526_v35, %v4326_v37  ;;  %v5519_v35 = vld [vmem:[#allocation9 + $0x4c] sm:$0xf] }
  0x65   :  { %1030 = vmatpush.bf16.msra.mxu3 %v4385_v45  ;;  %v4334_v45 = vld [vmem:[#allocation9 + $0x98] sm:$0xf0] }
  0x66   :  { %992 = vmatpush.bf16.msra.mxu0 %v4357_v49  ;;  %v4337_v46 = vor.u32 %v5527_v43, %v4334_v45  ;;  %v5524_v49 = vld [vmem:[#allocation9 + $0x6c] sm:$0xf0]  ;;  %v4278_v45 = vld [vmem:[#allocation9 + $0x30] sm:$0xf0] }
  0x67   :  { %1005 = vmatpush.bf16.msra.mxu1 %v4361_v53  ;;  %v4309_v53 = vor.u32 %v5524_v49, %v4308_v48  ;;  %v5517_v48 = vld [vmem:[#allocation9 + $0x34] sm:$0xf0] }
  0x68   :  { %1018 = vmatpush.bf16.msra.mxu2 %v4365_v54  ;;  %v4310_v54 = vld [vmem:[#allocation9 + $0x70] sm:$0xf0] }
  0x69   :  { %1031 = vmatpush.bf16.msra.mxu3 %v4369_v57  ;;  %v4313_v59 = vor.u32 %v5522_v50, %v4310_v54 }
  0x6a   :  { %993 = vmatpush.bf16.msra.mxu0 %v4341_v1 }
  0x6d   :  { %1032 = vmatpush.bf16.msra.mxu3 %v4353_v31  ;;  %v5521_v31 = vld [vmem:[#allocation9 + $0x54] sm:$0xf0] }
  0x71   :  { %398 = vmatmul.bf16.gmra.mxu0 %v5445_v3  ;;  %1033 = vmatpush.bf16.msra.mxu3 %v4337_v46  ;;  %v4284_v46 = vld [vmem:[#allocation9 + $0x28] sm:$0xf] }
  0x72   :  { %427 = vmatmul.bf16.gmra.mxu1 %v5445_v3  ;;  %v4285_v54 = vor.u32 %v5517_v48, %v4284_v46 }
  0x73   :  { %456 = vmatmul.bf16.gmra.mxu2 %v5445_v3 }
  0x74   :  { %485 = vmatmul.bf16.gmra.mxu3 %v5445_v3  ;;  %v4348_v3 = vld [vmem:[#allocation9 + $0xa8] sm:$0xf] }
  0x81   :  { %727 = vmatmul.bf16.vlgmr.msrb.gmra.mxu0 %v6193_v4 }
  0x82   :  { %740 = vmatmul.bf16.vlgmr.msrb.gmra.mxu1 %v6193_v4 }
  0x83   :  { %753 = vmatmul.bf16.vlgmr.msrb.gmra.mxu2 %v6193_v4 }
  0x84   :  { %766 = vmatmul.bf16.vlgmr.msrb.gmra.mxu3 %v6193_v4 }
  0xbe   :  { %v6282_v5 = vpop.f32.mrf.mxu0 }
  0xbf   :  { %v6284_v6 = vpop.f32.mrf.mxu1 }
  0xc6   :  { %v6286_v7 = vpop.f32.mrf.mxu2  ;;  %v6290_v9 = vpop.f32.mrf.mxu0 }
  0xc7   :  { %v6288_v8 = vpop.f32.mrf.mxu3  ;;  %v6292_v10 = vpop.f32.mrf.mxu1 }
  0xc8   :  { %v472_v48 = vadd.f32 %v6288_v8, %v6310_v21 }
  0xce   :  { %v6296_v13 = vpop.f32.mrf.mxu2  ;;  %v389_v16 = vpop.f32.mrf.mxu0 }
  0xcf   :  { %v6300_v15 = vpop.f32.mrf.mxu3  ;;  %v6303_v17 = vadd.f32 %v389_v16, %v6294_v12  ;;  %v418_v18 = vpop.f32.mrf.mxu1 }
  0xd0   :  { %v6306_v19 = vadd.f32 %v418_v18, %v6298_v14 }
  0xd6   :  { %v447_v22 = vpop.f32.mrf.mxu2  ;;  %v6315_v25 = vpop.f32.mrf.mxu0 }
  0xd7   :  { %v6313_v23 = vadd.f32 %v447_v22, %v6308_v20  ;;  %v476_v24 = vpop.f32.mrf.mxu3  ;;  %v6320_v27 = vpop.f32.mrf.mxu1  ;;  %v4345_v22 = vor.u32 %v5530_v61, %v4342_v2  ;;  %v5523_v61 = vld [vmem:[#allocation9 + $0x6c] sm:$0xf] }
  0xd8   :  { %v6318_v26 = vadd.f32 %v476_v24, %v6310_v21  ;;  %v4349_v24 = vor.u32 %v5533_v11, %v4348_v3  ;;  %v4292_v3 = vld [vmem:[#allocation9 + $0x40] sm:$0xf]  ;;  %v5520_v11 = vld [vmem:[#allocation9 + $0x4c] sm:$0xf0] }
  0xd9   :  { %1006 = vmatpush.bf16.msra.mxu1 %v4345_v22  ;;  %v5518_v22 = vld [vmem:[#allocation9 + $0x44] sm:$0xf] }
  0xda   :  { %1019 = vmatpush.bf16.msra.mxu2 %v4349_v24  ;;  %v4293_v24 = vor.u32 %v5520_v11, %v4292_v3  ;;  %v4262_v3 = vld [vmem:[#allocation9 + $0x10] sm:$0xf0] }
  0xdd   :  { %1007 = vmatpush.bf16.msra.mxu1 %v4329_v41  ;;  %v5514_v41 = vld [vmem:[#allocation9 + $0x24] sm:$0xf] }
  0xde   :  { %v6322_v28 = vpop.f32.mrf.mxu2  ;;  %v394_v33 = vpop.f32.mrf.mxu0 }
  0xdf   :  { %v6324_v32 = vpop.f32.mrf.mxu3  ;;  %v6327_v38 = vadd.f32 %v394_v33, %v6294_v12  ;;  %v423_v39 = vpop.f32.mrf.mxu1  ;;  %v4324_v33 = vld [vmem:[#allocation9 + $0x80] sm:$0xf] }
  0xe0   :  { %v6330_v44 = vadd.f32 %v423_v39, %v6298_v14  ;;  %v4325_v36 = vor.u32 %v5528_v34, %v4324_v33  ;;  %v4332_v39 = vld [vmem:[#allocation9 + $0x88] sm:$0xf]  ;;  %v4297_v33 = vor.u32 %v5518_v22, %v4294_v29  ;;  %v4301_v34 = vor.u32 %v5521_v31, %v4300_v30  ;;  %v5511_v29 = vld [vmem:[#allocation9 + $0xc] sm:$0xf] }
  0xe1   :  { %v4333_v42 = vor.u32 %v5529_v40, %v4332_v39  ;;  %1008 = vmatpush.bf16.msra.mxu1 %v4313_v59  ;;  %v4276_v39 = vld [vmem:[#allocation9 + $0x20] sm:$0xf]  ;;  %v5516_v40 = vld [vmem:[#allocation9 + $0x2c] sm:$0xf0]  ;;  %v4268_v22 = vld [vmem:[#allocation9 + $0x8] sm:$0xf] }
  0xe2   :  { %994 = vmatpush.bf16.msra.mxu0 %v4325_v36  ;;  %v4302_v36 = vld [vmem:[#allocation9 + $0x58] sm:$0xf0]  ;;  %v4277_v43 = vor.u32 %v5516_v40, %v4276_v39 }
  0xe3   :  { %1020 = vmatpush.bf16.msra.mxu2 %v4333_v42  ;;  %v4305_v37 = vor.u32 %v5519_v35, %v4302_v36  ;;  %v385_v35 = vadd.f32 %v6282_v5, %v6294_v12  ;;  %v443_v5 = vadd.f32 %v6286_v7, %v6308_v20 }
  0xe5   :  { %1009 = vmatpush.bf16.msra.mxu1 %v4297_v33  ;;  %v4270_v33 = vld [vmem:[#allocation9 + $0x18] sm:$0xf0] }
  0xe6   :  { %v452_v58 = vpop.f32.mrf.mxu2  ;;  %v6335_v0 = vpop.f32.mrf.mxu0  ;;  %995 = vmatpush.bf16.msra.mxu0 %v4309_v53  ;;  %v4281_v53 = vor.u32 %v5514_v41, %v4278_v45 }
  0xe7   :  { %v6333_v62 = vadd.f32 %v452_v58, %v6308_v20  ;;  %v481_v63 = vpop.f32.mrf.mxu3  ;;  %v6340_v18 = vpop.f32.mrf.mxu1  ;;  %1021 = vmatpush.bf16.msra.mxu2 %v4317_v60 }
  0xe8   :  { %v6338_v16 = vadd.f32 %v481_v63, %v6310_v21  ;;  %v4318_v63 = vld [vmem:[#allocation9 + $0x78] sm:$0xf0] }
  0xe9   :  { %v4321_v2 = vor.u32 %v5523_v61, %v4318_v63  ;;  %v4289_v61 = vor.u32 %v5515_v55, %v4286_v56  ;;  %v5512_v63 = vld [vmem:[#allocation9 + $0xc] sm:$0xf0]  ;;  %1010 = vmatpush.bf16.msra.mxu1 %v4281_v53 }
  0xea   :  { %996 = vmatpush.bf16.msra.mxu0 %v4293_v24  ;;  %v5513_v24 = vld [vmem:[#allocation9 + $0x14] sm:$0xf0] }
  0xeb   :  { %1034 = vmatpush.bf16.msra.mxu3 %v4321_v2  ;;  %1022 = vmatpush.bf16.msra.mxu2 %v4301_v34  ;;  %v5510_v2 = vld [vmem:[#allocation9 + $0x4] sm:$0xf]  ;;  %v4269_v31 = vor.u32 %v5513_v24, %v4268_v22  ;;  %v4273_v34 = vor.u32 %v5511_v29, %v4270_v33 }
  0xec   :  { %v4265_v30 = vor.u32 %v5510_v2, %v4262_v3 }
  0xee   :  { %v6342_v47 = vpop.f32.mrf.mxu2  ;;  %v399_v52 = vpop.f32.mrf.mxu0  ;;  %997 = vmatpush.bf16.msra.mxu0 %v4277_v43  ;;  %1011 = vmatpush.bf16.msra.mxu1 %v4265_v30 }
  0xef   :  { %v6344_v51 = vpop.f32.mrf.mxu3  ;;  %v6347_v57 = vadd.f32 %v399_v52, %v6294_v12  ;;  %v428_v58 = vpop.f32.mrf.mxu1  ;;  %1035 = vmatpush.bf16.msra.mxu3 %v4305_v37  ;;  %1023 = vmatpush.bf16.msra.mxu2 %v4285_v54  ;;  %v414_v37 = vadd.f32 %v6284_v6, %v6298_v14 }
  0xf0   :  { %v6350_v1 = vadd.f32 %v428_v58, %v6298_v14  ;;  %v4260_v58 = vld [vmem:[#allocation9] sm:$0xf] }
  0xf1   :  { %v4261_v11 = vor.u32 %v5512_v63, %v4260_v58 }
  0xf3   :  { %1036 = vmatpush.bf16.msra.mxu3 %v4289_v61  ;;  %998 = vmatpush.bf16.msra.mxu0 %v4261_v11 }
  0xf4   :  { %1024 = vmatpush.bf16.msra.mxu2 %v4269_v31 }
  0xf6   :  { %v457_v42 = vpop.f32.mrf.mxu2  ;;  %v6355_v52 = vpop.f32.mrf.mxu0 }
  0xf7   :  { %v6353_v49 = vadd.f32 %v457_v42, %v6308_v20  ;;  %v486_v50 = vpop.f32.mrf.mxu3  ;;  %v6360_v60 = vpop.f32.mrf.mxu1  ;;  %1037 = vmatpush.bf16.msra.mxu3 %v4273_v34 }
  0xf8   :  { %v6358_v59 = vadd.f32 %v486_v50, %v6310_v21 }
  0xfe   :  { %v6364_v36 = vpop.f32.mrf.mxu2  ;;  %v728_v40 = vpop.f32.mrf.mxu0 }
  0xff   :  { %v6368_v39 = vpop.f32.mrf.mxu3  ;;  %v771_v41 = vadd.f32 %v728_v40, %v385_v35  ;;  %v741_v42 = vpop.f32.mrf.mxu1 }
 0x100   :  { %v772_v43 = vadd.f32 %v741_v42, %v414_v37  ;;  %v4500_v42 = vld [vmem:[#allocation9 + $0xe0] sm:$0xf] }
 0x101   :  { %v775_v45 = vmul.f32 0.5, %v771_v41 }
 0x102   :  { %v776_v46 = vmul.f32 0.5, %v772_v43  ;;  %v5572_v43 = vld [vmem:[#allocation9 + $0xec] sm:$0xf0] }
 0x103   :  { %5820 = vtanh.f32 %v775_v45  ;;  %v5570_v45 = vld [vmem:[#allocation9 + $0xe4] sm:$0xf] }
 0x104   :  { %5822 = vtanh.f32 %v776_v46  ;;  %v4501_v46 = vor.u32 %v5572_v43, %v4500_v42  ;;  %v4476_v42 = vld [vmem:[#allocation9 + $0xa8] sm:$0xf]  ;;  %v5565_v43 = vld [vmem:[#allocation9 + $0xb4] sm:$0xf0] }
 0x106   :  { %v754_v50 = vpop.f32.mrf.mxu2  ;;  %v730_v54 = vpop.f32.mrf.mxu0  ;;  %1263 = vmatpush.bf16.msrb.mxu0 %v4501_v46  ;;  %v4477_v46 = vor.u32 %v5565_v43, %v4476_v42  ;;  %v4446_v42 = vld [vmem:[#allocation9 + $0x78] sm:$0xf0] }
 0x107   :  { %v773_v53 = vadd.f32 %v754_v50, %v443_v5  ;;  %v767_v6 = vpop.f32.mrf.mxu3  ;;  %v743_v56 = vpop.f32.mrf.mxu1  ;;  %v4502_v5 = vld [vmem:[#allocation9 + $0xf0] sm:$0xf0]  ;;  %v5573_v50 = vld [vmem:[#allocation9 + $0xf4] sm:$0xf0]  ;;  %v5571_v54 = vld [vmem:[#allocation9 + $0xec] sm:$0xf] }
 0x108   :  { %v774_v55 = vadd.f32 %v767_v6, %v472_v48  ;;  %v4508_v48 = vld [vmem:[#allocation9 + $0xe8] sm:$0xf] }
 0x109   :  { %v777_v58 = vmul.f32 0.5, %v773_v53  ;;  %v5821_v61 = vpop.eup %5820  ;;  %v4505_v53 = vor.u32 %v5570_v45, %v4502_v5  ;;  %v4509_v6 = vor.u32 %v5573_v50, %v4508_v48  ;;  %v5563_v5 = vld [vmem:[#allocation9 + $0xac] sm:$0xf]  ;;  %v4478_v48 = vld [vmem:[#allocation9 + $0xb8] sm:$0xf0] }
 0x10a   :  { %5824 = vtanh.f32 %v774_v55  ;;  %v5823_v63 = vpop.eup %5822  ;;  %v781_v2 = vmul.f32 0.5, %v5821_v61  ;;  %v4510_v55 = vld [vmem:[#allocation9 + $0xf8] sm:$0xf0]  ;;  %v5568_v61 = vld [vmem:[#allocation9 + $0xcc] sm:$0xf0]  ;;  %v4481_v50 = vor.u32 %v5563_v5, %v4478_v48 }
 0x10b   :  { %v782_v3 = vmul.f32 0.5, %v5823_v63  ;;  %5826 = vtanh.f32 %v777_v58  ;;  %v4513_v56 = vor.u32 %v5571_v54, %v4510_v55  ;;  %1276 = vmatpush.bf16.msrb.mxu1 %v4505_v53  ;;  %1289 = vmatpush.bf16.msrb.mxu2 %v4509_v6  ;;  %v4484_v58 = vld [vmem:[#allocation9 + $0xc0] sm:$0xf]  ;;  %v5566_v63 = vld [vmem:[#allocation9 + $0xc4] sm:$0xf] }
 0x10c   :  { %v784_v11 = vadd.f32 0.5, %v781_v2  ;;  %v4485_v2 = vor.u32 %v5568_v61, %v4484_v58  ;;  %v4452_v53 = vld [vmem:[#allocation9 + $0x80] sm:$0xf]  ;;  %v5560_v6 = vld [vmem:[#allocation9 + $0x8c] sm:$0xf0] }
 0x10d   :  { %v785_v22 = vadd.f32 0.5, %v782_v3  ;;  %1302 = vmatpush.bf16.msrb.mxu3 %v4513_v56  ;;  %v4486_v3 = vld [vmem:[#allocation9 + $0xd0] sm:$0xf0]  ;;  %v5558_v54 = vld [vmem:[#allocation9 + $0x84] sm:$0xf]  ;;  %v4453_v55 = vor.u32 %v5560_v6, %v4452_v53 }
 0x10e   :  { %v756_v7 = vpop.f32.mrf.mxu2  ;;  %1264 = vmatpush.bf16.msrb.mxu0 %v4485_v2  ;;  %v4454_v56 = vld [vmem:[#allocation9 + $0x90] sm:$0xf0]  ;;  %v4460_v58 = vld [vmem:[#allocation9 + $0x88] sm:$0xf]  ;;  %v5561_v61 = vld [vmem:[#allocation9 + $0x94] sm:$0xf0] }
 0x10f   :  { %v769_v24 = vpop.f32.mrf.mxu3  ;;  %v788_v30 = vmul.f32 0.0, %v785_v22  ;;  %v5569_v22 = vld [vmem:[#allocation9 + $0xd4] sm:$0xf0]  ;;  %v4489_v7 = vor.u32 %v5566_v63, %v4486_v3  ;;  %v4457_v63 = vor.u32 %v5558_v54, %v4454_v56  ;;  %v4461_v2 = vor.u32 %v5561_v61, %v4460_v58  ;;  %v5559_v3 = vld [vmem:[#allocation9 + $0x8c] sm:$0xf] }
 0x110   :  { %v5825_v29 = vpop.eup %5824  ;;  %v5550_v5 = vld [vmem:[#allocation9 + $0x44] sm:$0xf]  ;;  %v4428_v53 = vld [vmem:[#allocation9 + $0x48] sm:$0xf]  ;;  %v5553_v6 = vld [vmem:[#allocation9 + $0x54] sm:$0xf0] }
 0x111   :  { %v789_v8 = vmul.f32 %v5825_v29, %v784_v11  ;;  %v5827_v31 = vpop.eup %5826  ;;  %v4492_v11 = vld [vmem:[#allocation9 + $0xc8] sm:$0xf]  ;;  %v5567_v29 = vld [vmem:[#allocation9 + $0xcc] sm:$0xf]  ;;  %1277 = vmatpush.bf16.msrb.mxu1 %v4489_v7  ;;  %v4436_v7 = vld [vmem:[#allocation9 + $0x60] sm:$0xf] }
 0x112   :  { %v783_v34 = vmul.f32 0.5, %v5827_v31  ;;  %v4493_v24 = vor.u32 %v5569_v22, %v4492_v11  ;;  %v4468_v31 = vld [vmem:[#allocation9 + $0xa0] sm:$0xf]  ;;  %v4462_v11 = vld [vmem:[#allocation9 + $0x98] sm:$0xf0] }
 0x113   :  { %v6374_v33 = vadd.f32 %v789_v8, %v788_v30  ;;  %v4494_v30 = vld [vmem:[#allocation9 + $0xd8] sm:$0xf0]  ;;  %v4465_v22 = vor.u32 %v5559_v3, %v4462_v11  ;;  %v5551_v56 = vld [vmem:[#allocation9 + $0x4c] sm:$0xf]  ;;  %v5546_v3 = vld [vmem:[#allocation9 + $0x24] sm:$0xf] }
 0x114   :  { %v786_v35 = vadd.f32 0.5, %v783_v34  ;;  %v4497_v8 = vor.u32 %v5567_v29, %v4494_v30  ;;  %1290 = vmatpush.bf16.msrb.mxu2 %v4493_v24  ;;  %v5564_v34 = vld [vmem:[#allocation9 + $0xac] sm:$0xf0]  ;;  %v5554_v29 = vld [vmem:[#allocation9 + $0x64] sm:$0xf] }
 0x115   :  { %5828 = vtanh.f32 %v6374_v33  ;;  %v5556_v24 = vld [vmem:[#allocation9 + $0x6c] sm:$0xf0]  ;;  %v4430_v58 = vld [vmem:[#allocation9 + $0x58] sm:$0xf0] }
 0x116   :  { %1303 = vmatpush.bf16.msrb.mxu3 %v4497_v8  ;;  %v4437_v30 = vor.u32 %v5556_v24, %v4436_v7  ;;  %v4438_v8 = vld [vmem:[#allocation9 + $0x70] sm:$0xf0]  ;;  %v4433_v61 = vor.u32 %v5551_v56, %v4430_v58  ;;  %v4412_v7 = vld [vmem:[#allocation9 + $0x28] sm:$0xf]  ;;  %v5549_v24 = vld [vmem:[#allocation9 + $0x34] sm:$0xf0] }
 0x118   :  { %1291 = vmatpush.bf16.msrb.mxu2 %v4477_v46  ;;  %v5552_v46 = vld [vmem:[#allocation9 + $0x4c] sm:$0xf0] }
 0x11a   :  { %1304 = vmatpush.bf16.msrb.mxu3 %v4481_v50  ;;  %v4422_v50 = vld [vmem:[#allocation9 + $0x50] sm:$0xf0] }
 0x11b   :  { %v5829_v37 = vpop.eup %5828  ;;  %v4425_v54 = vor.u32 %v5550_v5, %v4422_v50  ;;  %v5543_v5 = vld [vmem:[#allocation9 + $0xc] sm:$0xf] }
 0x11c   :  { %v6377_v40 = vmul.f32 %v5829_v37, %v786_v35  ;;  %v5562_v35 = vld [vmem:[#allocation9 + $0xa4] sm:$0xf]  ;;  %v4469_v37 = vor.u32 %v5564_v34, %v4468_v31  ;;  %1292 = vmatpush.bf16.msrb.mxu2 %v4461_v2  ;;  %v4444_v31 = vld [vmem:[#allocation9 + $0x68] sm:$0xf]  ;;  %v5557_v34 = vld [vmem:[#allocation9 + $0x74] sm:$0xf0] }
 0x11d   :  { %v5548_v2 = vld [vmem:[#allocation9 + $0x2c] sm:$0xf0] }
 0x11e   :  { %v798_v41 = vpack.c.bf16 %v6377_v40, %v6377_v40  ;;  %1265 = vmatpush.bf16.msrb.mxu0 %v4469_v37  ;;  %1305 = vmatpush.bf16.msrb.mxu3 %v4465_v22  ;;  %v4445_v37 = vor.u32 %v5557_v34, %v4444_v31  ;;  %v4406_v22 = vld [vmem:[#allocation9 + $0x30] sm:$0xf0]  ;;  %v4414_v31 = vld [vmem:[#allocation9 + $0x38] sm:$0xf0]  ;;  %v4388_v34 = vld [vmem:[#allocation9] sm:$0xf] }
 0x120   :  { %999 = vmatmul.bf16.vlgmr.msra.gmra.mxu0 %v798_v41  ;;  %1012 = vmatmul.bf16.vlgmr.msra.gmra.mxu1 %v798_v41 }
 0x121   :  { %1025 = vmatmul.bf16.vlgmr.msra.gmra.mxu2 %v798_v41  ;;  %1038 = vmatmul.bf16.vlgmr.msra.gmra.mxu3 %v798_v41  ;;  %v4470_v41 = vld [vmem:[#allocation9 + $0xb0] sm:$0xf0] }
 0x122   :  { %v4473_v45 = vor.u32 %v5562_v35, %v4470_v41  ;;  %1266 = vmatpush.bf16.msrb.mxu0 %v4453_v55  ;;  %v4441_v35 = vor.u32 %v5554_v29, %v4438_v8  ;;  %v5555_v41 = vld [vmem:[#allocation9 + $0x6c] sm:$0xf]  ;;  %1293 = vmatpush.bf16.msrb.mxu2 %v4445_v37  ;;  %v4429_v55 = vor.u32 %v5553_v6, %v4428_v53  ;;  %v5544_v37 = vld [vmem:[#allocation9 + $0xc] sm:$0xf0]  ;;  %v4398_v53 = vld [vmem:[#allocation9 + $0x18] sm:$0xf0] }
 0x123   :  { %v4449_v43 = vor.u32 %v5555_v41, %v4446_v42  ;;  %v4409_v29 = vor.u32 %v5546_v3, %v4406_v22  ;;  %v5547_v8 = vld [vmem:[#allocation9 + $0x2c] sm:$0xf]  ;;  %v5542_v41 = vld [vmem:[#allocation9 + $0x4] sm:$0xf]  ;;  %v4390_v42 = vld [vmem:[#allocation9 + $0x10] sm:$0xf0]  ;;  %v4401_v6 = vor.u32 %v5543_v5, %v4398_v53  ;;  %v474_v22 = vadd.f32 %v6300_v15, %v6310_v21 }
 0x124   :  { %1278 = vmatpush.bf16.msrb.mxu1 %v4473_v45  ;;  %v4420_v45 = vld [vmem:[#allocation9 + $0x40] sm:$0xf] }
 0x125   :  { %1306 = vmatpush.bf16.msrb.mxu3 %v4449_v43  ;;  %v4421_v48 = vor.u32 %v5552_v46, %v4420_v45  ;;  %v4389_v43 = vor.u32 %v5544_v37, %v4388_v34  ;;  %v4396_v45 = vld [vmem:[#allocation9 + $0x8] sm:$0xf]  ;;  %v5545_v46 = vld [vmem:[#allocation9 + $0x14] sm:$0xf0] }
 0x126   :  { %1267 = vmatpush.bf16.msrb.mxu0 %v4437_v30  ;;  %1294 = vmatpush.bf16.msrb.mxu2 %v4429_v55  ;;  %v4413_v30 = vor.u32 %v5549_v24, %v4412_v7  ;;  %v4397_v50 = vor.u32 %v5545_v46, %v4396_v45  ;;  %v416_v55 = vadd.f32 %v6292_v10, %v6298_v14 }
 0x128   :  { %1279 = vmatpush.bf16.msrb.mxu1 %v4457_v63  ;;  %v4404_v63 = vld [vmem:[#allocation9 + $0x20] sm:$0xf] }
 0x129   :  { %v4405_v11 = vor.u32 %v5548_v2, %v4404_v63  ;;  %1307 = vmatpush.bf16.msrb.mxu3 %v4433_v61 }
 0x12a   :  { %1268 = vmatpush.bf16.msrb.mxu0 %v4421_v48  ;;  %1295 = vmatpush.bf16.msrb.mxu2 %v4413_v30  ;;  %v4393_v48 = vor.u32 %v5542_v41, %v4390_v42 }
 0x12c   :  { %1280 = vmatpush.bf16.msrb.mxu1 %v4441_v35  ;;  %v4417_v35 = vor.u32 %v5547_v8, %v4414_v31 }
 0x12e   :  { %1269 = vmatpush.bf16.msrb.mxu0 %v4405_v11  ;;  %1308 = vmatpush.bf16.msrb.mxu3 %v4417_v35  ;;  %v445_v11 = vadd.f32 %v6296_v13, %v6308_v20 }
 0x12f   :  { %1296 = vmatpush.bf16.msrb.mxu2 %v4397_v50 }
 0x130   :  { %1281 = vmatpush.bf16.msrb.mxu1 %v4425_v54  ;;  %v387_v54 = vadd.f32 %v6290_v9, %v6294_v12 }
 0x132   :  { %1270 = vmatpush.bf16.msrb.mxu0 %v4389_v43  ;;  %1309 = vmatpush.bf16.msrb.mxu3 %v4401_v6 }
 0x134   :  { %1282 = vmatpush.bf16.msrb.mxu1 %v4409_v29 }
 0x138   :  { %1283 = vmatpush.bf16.msrb.mxu1 %v4393_v48 }
 0x19d   :  { %v1000_v56 = vpop.f32.mrf.mxu0  ;;  %v1013_v58 = vpop.f32.mrf.mxu1 }
 0x19e   :  { %v1043_v61 = vadd.f32 %v1000_v56, %v387_v54  ;;  %v1044_v63 = vadd.f32 %v1013_v58, %v416_v55  ;;  %v4628_v56 = vld [vmem:[#allocation9 + $0xe0] sm:$0xf]  ;;  %v5602_v58 = vld [vmem:[#allocation9 + $0xe4] sm:$0xf] }
 0x1a0   :  { %v1047_v2 = vmul.f32 0.5, %v1043_v61  ;;  %v1048_v3 = vmul.f32 0.5, %v1044_v63  ;;  %v4630_v63 = vld [vmem:[#allocation9 + $0xf0] sm:$0xf0] }
 0x1a2   :  { %5830 = vtanh.f32 %v1047_v2  ;;  %v4636_v2 = vld [vmem:[#allocation9 + $0xe8] sm:$0xf] }
 0x1a3   :  { %5832 = vtanh.f32 %v1048_v3  ;;  %v5605_v3 = vld [vmem:[#allocation9 + $0xf4] sm:$0xf0] }
 0x1a4   :  { %v1026_v7 = vpop.f32.mrf.mxu2  ;;  %v1039_v9 = vpop.f32.mrf.mxu3 }
 0x1a5   :  { %v1045_v24 = vadd.f32 %v1026_v7, %v445_v11  ;;  %v1046_v29 = vadd.f32 %v1039_v9, %v474_v22  ;;  %v1002_v10 = vpop.f32.mrf.mxu0  ;;  %v1015_v30 = vpop.f32.mrf.mxu1  ;;  %v4633_v11 = vor.u32 %v5602_v58, %v4630_v63  ;;  %v4637_v22 = vor.u32 %v5605_v3, %v4636_v2  ;;  %v5603_v7 = vld [vmem:[#allocation9 + $0xec] sm:$0xf]  ;;  %v4638_v9 = vld [vmem:[#allocation9 + $0xf8] sm:$0xf0]  ;;  %v4580_v63 = vld [vmem:[#allocation9 + $0x80] sm:$0xf] }
 0x1a6   :  { %v5600_v10 = vld [vmem:[#allocation9 + $0xcc] sm:$0xf0]  ;;  %v5598_v30 = vld [vmem:[#allocation9 + $0xc4] sm:$0xf]  ;;  %v4606_v58 = vld [vmem:[#allocation9 + $0xb8] sm:$0xf0] }
 0x1a7   :  { %v1049_v8 = vmul.f32 0.5, %v1045_v24  ;;  %5834 = vtanh.f32 %v1046_v29  ;;  %v4641_v24 = vor.u32 %v5603_v7, %v4638_v9  ;;  %1548 = vmatpush.bf16.msra.mxu1 %v4633_v11  ;;  %1561 = vmatpush.bf16.msra.mxu2 %v4637_v22  ;;  %v4612_v29 = vld [vmem:[#allocation9 + $0xc0] sm:$0xf]  ;;  %v5592_v2 = vld [vmem:[#allocation9 + $0x8c] sm:$0xf0] }
 0x1a8   :  { %v5831_v31 = vpop.eup %5830  ;;  %v5590_v3 = vld [vmem:[#allocation9 + $0x84] sm:$0xf]  ;;  %v4581_v11 = vor.u32 %v5592_v2, %v4580_v63  ;;  %v4582_v22 = vld [vmem:[#allocation9 + $0x90] sm:$0xf0]  ;;  %v4588_v7 = vld [vmem:[#allocation9 + $0x88] sm:$0xf] }
 0x1a9   :  { %v5833_v34 = vpop.eup %5832  ;;  %v1053_v35 = vmul.f32 0.5, %v5831_v31  ;;  %5836 = vtanh.f32 %v1049_v8  ;;  %1574 = vmatpush.bf16.msra.mxu3 %v4641_v24  ;;  %v4613_v8 = vor.u32 %v5600_v10, %v4612_v29  ;;  %v4614_v31 = vld [vmem:[#allocation9 + $0xd0] sm:$0xf0]  ;;  %v5593_v9 = vld [vmem:[#allocation9 + $0x94] sm:$0xf0]  ;;  %v4585_v24 = vor.u32 %v5590_v3, %v4582_v22 }
 0x1aa   :  { %v1054_v37 = vmul.f32 0.5, %v5833_v34  ;;  %v4620_v34 = vld [vmem:[#allocation9 + $0xc8] sm:$0xf]  ;;  %v4589_v29 = vor.u32 %v5593_v9, %v4588_v7  ;;  %v5591_v10 = vld [vmem:[#allocation9 + $0x8c] sm:$0xf] }
 0x1ab   :  { %v1056_v41 = vadd.f32 0.5, %v1053_v35  ;;  %v5601_v35 = vld [vmem:[#allocation9 + $0xd4] sm:$0xf0]  ;;  %v5583_v2 = vld [vmem:[#allocation9 + $0x4c] sm:$0xf] }
 0x1ac   :  { %v1057_v42 = vadd.f32 0.5, %v1054_v37  ;;  %v1028_v13 = vpop.f32.mrf.mxu2  ;;  %v1041_v43 = vpop.f32.mrf.mxu3  ;;  %v4617_v37 = vor.u32 %v5598_v30, %v4614_v31  ;;  %v4590_v30 = vld [vmem:[#allocation9 + $0x98] sm:$0xf0]  ;;  %v4564_v31 = vld [vmem:[#allocation9 + $0x60] sm:$0xf] }
 0x1ad   :  { %v5835_v45 = vpop.eup %5834  ;;  %v4622_v13 = vld [vmem:[#allocation9 + $0xd8] sm:$0xf0]  ;;  %v4532_v22 = vld [vmem:[#allocation9 + $0x20] sm:$0xf]  ;;  %v5580_v7 = vld [vmem:[#allocation9 + $0x2c] sm:$0xf0] }
 0x1ae   :  { %v1060_v15 = vmul.f32 %v1057_v42, %v6374_v33  ;;  %v1061_v46 = vmul.f32 %v5835_v45, %v1056_v41  ;;  %v5604_v33 = vld [vmem:[#allocation9 + $0xec] sm:$0xf0]  ;;  %v4621_v41 = vor.u32 %v5601_v35, %v4620_v34  ;;  %v5599_v42 = vld [vmem:[#allocation9 + $0xcc] sm:$0xf]  ;;  %1549 = vmatpush.bf16.msra.mxu1 %v4617_v37  ;;  %v4596_v45 = vld [vmem:[#allocation9 + $0xa0] sm:$0xf] }
 0x1af   :  { %v5837_v5 = vpop.eup %5836  ;;  %v4629_v61 = vor.u32 %v5604_v33, %v4628_v56  ;;  %v4625_v43 = vor.u32 %v5599_v42, %v4622_v13  ;;  %v5595_v33 = vld [vmem:[#allocation9 + $0xac] sm:$0xf]  ;;  %v5588_v34 = vld [vmem:[#allocation9 + $0x6c] sm:$0xf0]  ;;  %v5586_v35 = vld [vmem:[#allocation9 + $0x64] sm:$0xf] }
 0x1b0   :  { %v6390_v48 = vadd.f32 %v1061_v46, %v1060_v15  ;;  %v1055_v50 = vmul.f32 0.5, %v5837_v5  ;;  %1562 = vmatpush.bf16.msra.mxu2 %v4621_v41  ;;  %v5596_v15 = vld [vmem:[#allocation9 + $0xac] sm:$0xf0]  ;;  %v5594_v46 = vld [vmem:[#allocation9 + $0xa4] sm:$0xf]  ;;  %v4565_v37 = vor.u32 %v5588_v34, %v4564_v31 }
 0x1b1   :  { %1535 = vmatpush.bf16.msra.mxu0 %v4629_v61  ;;  %1575 = vmatpush.bf16.msra.mxu3 %v4625_v43  ;;  %v4597_v5 = vor.u32 %v5596_v15, %v4596_v45  ;;  %v4609_v61 = vor.u32 %v5595_v33, %v4606_v58  ;;  %v4566_v41 = vld [vmem:[#allocation9 + $0x70] sm:$0xf0]  ;;  %v4572_v42 = vld [vmem:[#allocation9 + $0x68] sm:$0xf]  ;;  %v5589_v13 = vld [vmem:[#allocation9 + $0x74] sm:$0xf0] }
 0x1b2   :  { %5838 = vtanh.f32 %v6390_v48  ;;  %v1058_v53 = vadd.f32 0.5, %v1055_v50  ;;  %v4598_v50 = vld [vmem:[#allocation9 + $0xb0] sm:$0xf0]  ;;  %v4569_v43 = vor.u32 %v5586_v35, %v4566_v41  ;;  %v4573_v45 = vor.u32 %v5589_v13, %v4572_v42  ;;  %v5587_v15 = vld [vmem:[#allocation9 + $0x6c] sm:$0xf] }
 0x1b3   :  { %v4556_v33 = vld [vmem:[#allocation9 + $0x48] sm:$0xf]  ;;  %v5585_v58 = vld [vmem:[#allocation9 + $0x54] sm:$0xf0]  ;;  %v4558_v3 = vld [vmem:[#allocation9 + $0x58] sm:$0xf0] }
 0x1b4   :  { %v4557_v63 = vor.u32 %v5585_v58, %v4556_v33  ;;  %v5578_v9 = vld [vmem:[#allocation9 + $0x24] sm:$0xf]  ;;  %v5579_v34 = vld [vmem:[#allocation9 + $0x2c] sm:$0xf]  ;;  %v4542_v35 = vld [vmem:[#allocation9 + $0x38] sm:$0xf0] }
 0x1b5   :  { %1536 = vmatpush.bf16.msra.mxu0 %v4613_v8  ;;  %1576 = vmatpush.bf16.msra.mxu3 %v4609_v61  ;;  %v4593_v8 = vor.u32 %v5591_v10, %v4590_v30  ;;  %v4540_v10 = vld [vmem:[#allocation9 + $0x28] sm:$0xf]  ;;  %v5581_v30 = vld [vmem:[#allocation9 + $0x34] sm:$0xf0]  ;;  %v4545_v41 = vor.u32 %v5579_v34, %v4542_v35  ;;  %v5576_v42 = vld [vmem:[#allocation9 + $0xc] sm:$0xf0] }
 0x1b6   :  { %v4541_v31 = vor.u32 %v5581_v30, %v4540_v10  ;;  %v5574_v13 = vld [vmem:[#allocation9 + $0x4] sm:$0xf] }
 0x1b8   :  { %v5839_v6 = vpop.eup %5838 }
 0x1b9   :  { %v6393_v54 = vmul.f32 %v5839_v6, %v1058_v53  ;;  %v4604_v53 = vld [vmem:[#allocation9 + $0xa8] sm:$0xf]  ;;  %v5597_v6 = vld [vmem:[#allocation9 + $0xb4] sm:$0xf0]  ;;  %1537 = vmatpush.bf16.msra.mxu0 %v4597_v5  ;;  %1577 = vmatpush.bf16.msra.mxu3 %v4593_v8 }
 0x1ba   :  { %v4605_v56 = vor.u32 %v5597_v6, %v4604_v53  ;;  %v5584_v53 = vld [vmem:[#allocation9 + $0x4c] sm:$0xf0]  ;;  %v5582_v6 = vld [vmem:[#allocation9 + $0x44] sm:$0xf] }
 0x1bb   :  { %v1070_v55 = vpack.c.bf16 %v6393_v54, %v6393_v54 }
 0x1bc   :  { %1563 = vmatpush.bf16.msra.mxu2 %v4605_v56  ;;  %v4550_v56 = vld [vmem:[#allocation9 + $0x50] sm:$0xf0] }
 0x1bd   :  { %1271 = vmatmul.bf16.vlgmr.msrb.gmra.mxu0 %v1070_v55  ;;  %1284 = vmatmul.bf16.vlgmr.msrb.gmra.mxu1 %v1070_v55  ;;  %v4553_v61 = vor.u32 %v5582_v6, %v4550_v56  ;;  %v4526_v6 = vld [vmem:[#allocation9 + $0x18] sm:$0xf0] }
 0x1be   :  { %1297 = vmatmul.bf16.vlgmr.msrb.gmra.mxu2 %v1070_v55  ;;  %1310 = vmatmul.bf16.vlgmr.msrb.gmra.mxu3 %v1070_v55  ;;  %v4601_v55 = vor.u32 %v5594_v46, %v4598_v50  ;;  %v4574_v46 = vld [vmem:[#allocation9 + $0x78] sm:$0xf0]  ;;  %v4548_v50 = vld [vmem:[#allocation9 + $0x40] sm:$0xf] }
 0x1bf   :  { %1538 = vmatpush.bf16.msra.mxu0 %v4581_v11  ;;  %v4577_v5 = vor.u32 %v5587_v15, %v4574_v46  ;;  %v4561_v11 = vor.u32 %v5583_v2, %v4558_v3  ;;  %v4524_v15 = vld [vmem:[#allocation9 + $0x8] sm:$0xf]  ;;  %v5577_v46 = vld [vmem:[#allocation9 + $0x14] sm:$0xf0] }
 0x1c0   :  { %1550 = vmatpush.bf16.msra.mxu1 %v4601_v55  ;;  %1564 = vmatpush.bf16.msra.mxu2 %v4589_v29  ;;  %v4549_v55 = vor.u32 %v5584_v53, %v4548_v50  ;;  %v4534_v29 = vld [vmem:[#allocation9 + $0x30] sm:$0xf0]  ;;  %v4525_v53 = vor.u32 %v5577_v46, %v4524_v15 }
 0x1c1   :  { %1578 = vmatpush.bf16.msra.mxu3 %v4577_v5  ;;  %v4537_v8 = vor.u32 %v5578_v9, %v4534_v29  ;;  %v5575_v5 = vld [vmem:[#allocation9 + $0xc] sm:$0xf] }
 0x1c3   :  { %1539 = vmatpush.bf16.msra.mxu0 %v4565_v37  ;;  %v4516_v37 = vld [vmem:[#allocation9] sm:$0xf] }
 0x1c4   :  { %1551 = vmatpush.bf16.msra.mxu1 %v4585_v24  ;;  %1565 = vmatpush.bf16.msra.mxu2 %v4573_v45  ;;  %v4533_v24 = vor.u32 %v5580_v7, %v4532_v22  ;;  %v4517_v45 = vor.u32 %v5576_v42, %v4516_v37 }
 0x1c5   :  { %1579 = vmatpush.bf16.msra.mxu3 %v4561_v11 }
 0x1c7   :  { %1540 = vmatpush.bf16.msra.mxu0 %v4549_v55  ;;  %v4529_v55 = vor.u32 %v5575_v5, %v4526_v6  ;;  %v4756_v5 = vld [vmem:[#allocation9 + $0xe0] sm:$0xf]  ;;  %v4758_v6 = vld [vmem:[#allocation9 + $0xf0] sm:$0xf0] }
 0x1c8   :  { %1552 = vmatpush.bf16.msra.mxu1 %v4569_v43  ;;  %1566 = vmatpush.bf16.msra.mxu2 %v4557_v63  ;;  %v4518_v43 = vld [vmem:[#allocation9 + $0x10] sm:$0xf0] }
 0x1c9   :  { %v4521_v50 = vor.u32 %v5574_v13, %v4518_v43  ;;  %1580 = vmatpush.bf16.msra.mxu3 %v4545_v41 }
 0x1cb   :  { %1541 = vmatpush.bf16.msra.mxu0 %v4533_v24 }
 0x1cc   :  { %1553 = vmatpush.bf16.msra.mxu1 %v4553_v61  ;;  %1567 = vmatpush.bf16.msra.mxu2 %v4541_v31 }
 0x1cd   :  { %1581 = vmatpush.bf16.msra.mxu3 %v4529_v55  ;;  %v4764_v55 = vld [vmem:[#allocation9 + $0xe8] sm:$0xf] }
 0x1cf   :  { %1542 = vmatpush.bf16.msra.mxu0 %v4517_v45 }
 0x1d0   :  { %1554 = vmatpush.bf16.msra.mxu1 %v4537_v8  ;;  %1568 = vmatpush.bf16.msra.mxu2 %v4525_v53 }
 0x1d4   :  { %1555 = vmatpush.bf16.msra.mxu1 %v4521_v50  ;;  %v5634_v50 = vld [vmem:[#allocation9 + $0xe4] sm:$0xf] }
 0x23a   :  { %v1272_v56 = vpop.f32.mrf.mxu0  ;;  %v1285_v33 = vpop.f32.mrf.mxu1 }
 0x23b   :  { %v1315_v58 = vadd.f32 %v1272_v56, %v6303_v17  ;;  %v1316_v61 = vadd.f32 %v1285_v33, %v6306_v19  ;;  %v5637_v56 = vld [vmem:[#allocation9 + $0xf4] sm:$0xf0]  ;;  %v4761_v33 = vor.u32 %v5634_v50, %v4758_v6  ;;  %v5624_v50 = vld [vmem:[#allocation9 + $0x8c] sm:$0xf0] }
 0x23d   :  { %v1319_v63 = vmul.f32 0.5, %v1315_v58  ;;  %v1320_v2 = vmul.f32 0.5, %v1316_v61  ;;  %v4765_v58 = vor.u32 %v5637_v56, %v4764_v55  ;;  %v5635_v61 = vld [vmem:[#allocation9 + $0xec] sm:$0xf]  ;;  %1820 = vmatpush.bf16.msrb.mxu1 %v4761_v33  ;;  %v4710_v55 = vld [vmem:[#allocation9 + $0x90] sm:$0xf0] }
 0x23e   :  { %v4716_v56 = vld [vmem:[#allocation9 + $0x88] sm:$0xf]  ;;  %v5625_v33 = vld [vmem:[#allocation9 + $0x94] sm:$0xf0] }
 0x23f   :  { %5840 = vtanh.f32 %v1319_v63  ;;  %v4766_v63 = vld [vmem:[#allocation9 + $0xf8] sm:$0xf0]  ;;  %1833 = vmatpush.bf16.msrb.mxu2 %v4765_v58 }
 0x240   :  { %5842 = vtanh.f32 %v1320_v2  ;;  %v4769_v2 = vor.u32 %v5635_v61, %v4766_v63  ;;  %v4717_v61 = vor.u32 %v5625_v33, %v4716_v56  ;;  %v5623_v63 = vld [vmem:[#allocation9 + $0x8c] sm:$0xf]  ;;  %v4662_v56 = vld [vmem:[#allocation9 + $0x30] sm:$0xf0]  ;;  %v4668_v33 = vld [vmem:[#allocation9 + $0x28] sm:$0xf] }
 0x241   :  { %v1298_v3 = vpop.f32.mrf.mxu2  ;;  %v1311_v11 = vpop.f32.mrf.mxu3 }
 0x242   :  { %v1317_v22 = vadd.f32 %v1298_v3, %v6313_v23  ;;  %v1318_v7 = vadd.f32 %v1311_v11, %v6318_v26  ;;  %v1274_v9 = vpop.f32.mrf.mxu0  ;;  %v1287_v24 = vpop.f32.mrf.mxu1  ;;  %v4740_v3 = vld [vmem:[#allocation9 + $0xc0] sm:$0xf]  ;;  %v5632_v11 = vld [vmem:[#allocation9 + $0xcc] sm:$0xf0]  ;;  %1846 = vmatpush.bf16.msrb.mxu3 %v4769_v2  ;;  %v4718_v2 = vld [vmem:[#allocation9 + $0x98] sm:$0xf0] }
 0x243   :  { %v4742_v9 = vld [vmem:[#allocation9 + $0xd0] sm:$0xf0]  ;;  %v4748_v24 = vld [vmem:[#allocation9 + $0xc8] sm:$0xf] }
 0x244   :  { %v1321_v29 = vmul.f32 0.5, %v1317_v22  ;;  %5844 = vtanh.f32 %v1318_v7  ;;  %v5630_v22 = vld [vmem:[#allocation9 + $0xc4] sm:$0xf]  ;;  %v4741_v7 = vor.u32 %v5632_v11, %v4740_v3  ;;  %v4721_v3 = vor.u32 %v5623_v63, %v4718_v2  ;;  %v4692_v11 = vld [vmem:[#allocation9 + $0x60] sm:$0xf] }
 0x245   :  { %v5841_v10 = vpop.eup %5840  ;;  %v5611_v2 = vld [vmem:[#allocation9 + $0x2c] sm:$0xf] }
 0x246   :  { %v5843_v30 = vpop.eup %5842  ;;  %v1325_v8 = vmul.f32 0.5, %v5841_v10  ;;  %5846 = vtanh.f32 %v1321_v29  ;;  %v5633_v29 = vld [vmem:[#allocation9 + $0xd4] sm:$0xf0]  ;;  %v4745_v10 = vor.u32 %v5630_v22, %v4742_v9  ;;  %v5620_v22 = vld [vmem:[#allocation9 + $0x6c] sm:$0xf0] }
 0x247   :  { %v1326_v17 = vmul.f32 0.5, %v5843_v30  ;;  %v4749_v30 = vor.u32 %v5633_v29, %v4748_v24  ;;  %v4693_v9 = vor.u32 %v5620_v22, %v4692_v11  ;;  %v4694_v24 = vld [vmem:[#allocation9 + $0x70] sm:$0xf0]  ;;  %v4700_v29 = vld [vmem:[#allocation9 + $0x68] sm:$0xf] }
 0x248   :  { %v1328_v19 = vadd.f32 0.5, %v1325_v8  ;;  %v5631_v8 = vld [vmem:[#allocation9 + $0xcc] sm:$0xf]  ;;  %1821 = vmatpush.bf16.msrb.mxu1 %v4745_v10  ;;  %v5621_v10 = vld [vmem:[#allocation9 + $0x74] sm:$0xf0] }
 0x249   :  { %v1329_v31 = vadd.f32 0.5, %v1326_v17  ;;  %v1300_v34 = vpop.f32.mrf.mxu2  ;;  %v1313_v35 = vpop.f32.mrf.mxu3  ;;  %v4750_v17 = vld [vmem:[#allocation9 + $0xd8] sm:$0xf0]  ;;  %1834 = vmatpush.bf16.msrb.mxu2 %v4749_v30  ;;  %v4644_v11 = vld [vmem:[#allocation9] sm:$0xf] }
 0x24a   :  { %v5845_v37 = vpop.eup %5844  ;;  %v5628_v34 = vld [vmem:[#allocation9 + $0xac] sm:$0xf0]  ;;  %v5626_v35 = vld [vmem:[#allocation9 + $0xa4] sm:$0xf] }
 0x24b   :  { %v1332_v41 = vmul.f32 %v1329_v31, %v6390_v48  ;;  %v1333_v42 = vmul.f32 %v5845_v37, %v1328_v19  ;;  %v5636_v48 = vld [vmem:[#allocation9 + $0xec] sm:$0xf0]  ;;  %v4753_v19 = vor.u32 %v5631_v8, %v4750_v17  ;;  %v4724_v31 = vld [vmem:[#allocation9 + $0xa0] sm:$0xf]  ;;  %v4701_v8 = vor.u32 %v5621_v10, %v4700_v29  ;;  %v5619_v17 = vld [vmem:[#allocation9 + $0x6c] sm:$0xf] }
 0x24c   :  { %v5847_v23 = vpop.eup %5846  ;;  %v4757_v53 = vor.u32 %v5636_v48, %v4756_v5  ;;  %v4725_v37 = vor.u32 %v5628_v34, %v4724_v31  ;;  %v4708_v48 = vld [vmem:[#allocation9 + $0x80] sm:$0xf]  ;;  %v4652_v10 = vld [vmem:[#allocation9 + $0x8] sm:$0xf] }
 0x24d   :  { %v6402_v13 = vadd.f32 %v1333_v42, %v1332_v41  ;;  %v1327_v26 = vmul.f32 0.5, %v5847_v23  ;;  %1847 = vmatpush.bf16.msrb.mxu3 %v4753_v19  ;;  %v4726_v41 = vld [vmem:[#allocation9 + $0xb0] sm:$0xf0]  ;;  %v4732_v42 = vld [vmem:[#allocation9 + $0xa8] sm:$0xf]  ;;  %v4709_v6 = vor.u32 %v5624_v50, %v4708_v48 }
 0x24e   :  { %1807 = vmatpush.bf16.msrb.mxu0 %v4757_v53  ;;  %v5629_v23 = vld [vmem:[#allocation9 + $0xb4] sm:$0xf0]  ;;  %v5622_v53 = vld [vmem:[#allocation9 + $0x84] sm:$0xf]  ;;  %v4702_v19 = vld [vmem:[#allocation9 + $0x78] sm:$0xf0] }
 0x24f   :  { %5848 = vtanh.f32 %v6402_v13  ;;  %v1330_v43 = vadd.f32 0.5, %v1327_v26  ;;  %v4729_v26 = vor.u32 %v5626_v35, %v4726_v41  ;;  %v4713_v58 = vor.u32 %v5622_v53, %v4710_v55  ;;  %v4676_v34 = vld [vmem:[#allocation9 + $0x40] sm:$0xf]  ;;  %v5616_v35 = vld [vmem:[#allocation9 + $0x4c] sm:$0xf0] }
 0x250   :  { %v4705_v31 = vor.u32 %v5619_v17, %v4702_v19  ;;  %v4677_v41 = vor.u32 %v5616_v35, %v4676_v34  ;;  %v4660_v50 = vld [vmem:[#allocation9 + $0x20] sm:$0xf]  ;;  %v5612_v53 = vld [vmem:[#allocation9 + $0x2c] sm:$0xf0]  ;;  %v392_v35 = vadd.f32 %v6315_v25, %v6294_v12 }
 0x251   :  { %1822 = vmatpush.bf16.msrb.mxu1 %v4729_v26  ;;  %v5617_v26 = vld [vmem:[#allocation9 + $0x54] sm:$0xf0]  ;;  %v4661_v55 = vor.u32 %v5612_v53, %v4660_v50 }
 0x252   :  { %1808 = vmatpush.bf16.msrb.mxu0 %v4741_v7  ;;  %v5618_v7 = vld [vmem:[#allocation9 + $0x64] sm:$0xf] }
 0x253   :  { %v4697_v30 = vor.u32 %v5618_v7, %v4694_v24  ;;  %v5608_v7 = vld [vmem:[#allocation9 + $0xc] sm:$0xf0]  ;;  %v4646_v24 = vld [vmem:[#allocation9 + $0x10] sm:$0xf0] }
 0x254   :  { %v4645_v29 = vor.u32 %v5608_v7, %v4644_v11 }
 0x255   :  { %v5849_v45 = vpop.eup %5848  ;;  %1823 = vmatpush.bf16.msrb.mxu1 %v4713_v58  ;;  %v5613_v58 = vld [vmem:[#allocation9 + $0x34] sm:$0xf0] }
 0x256   :  { %v6405_v15 = vmul.f32 %v5849_v45, %v1330_v43  ;;  %v4733_v43 = vor.u32 %v5629_v23, %v4732_v42  ;;  %v5627_v45 = vld [vmem:[#allocation9 + $0xac] sm:$0xf]  ;;  %1809 = vmatpush.bf16.msrb.mxu0 %v4725_v37  ;;  %v5614_v37 = vld [vmem:[#allocation9 + $0x44] sm:$0xf]  ;;  %v4678_v42 = vld [vmem:[#allocation9 + $0x50] sm:$0xf0]  ;;  %v4669_v63 = vor.u32 %v5613_v58, %v4668_v33 }
 0x257   :  { %v4684_v23 = vld [vmem:[#allocation9 + $0x48] sm:$0xf] }
 0x258   :  { %v1342_v46 = vpack.c.bf16 %v6405_v15, %v6405_v15  ;;  %1835 = vmatpush.bf16.msrb.mxu2 %v4733_v43  ;;  %v4681_v43 = vor.u32 %v5614_v37, %v4678_v42  ;;  %v421_v37 = vadd.f32 %v6320_v27, %v6298_v14 }
 0x259   :  { %1824 = vmatpush.bf16.msrb.mxu1 %v4697_v30  ;;  %v5609_v30 = vld [vmem:[#allocation9 + $0x14] sm:$0xf0] }
 0x25a   :  { %1543 = vmatmul.bf16.vlgmr.msra.gmra.mxu0 %v1342_v46  ;;  %1556 = vmatmul.bf16.vlgmr.msra.gmra.mxu1 %v1342_v46  ;;  %v4653_v19 = vor.u32 %v5609_v30, %v4652_v10 }
 0x25b   :  { %1569 = vmatmul.bf16.vlgmr.msra.gmra.mxu2 %v1342_v46  ;;  %1582 = vmatmul.bf16.vlgmr.msra.gmra.mxu3 %v1342_v46  ;;  %v4734_v46 = vld [vmem:[#allocation9 + $0xb8] sm:$0xf0] }
 0x25c   :  { %v4737_v5 = vor.u32 %v5627_v45, %v4734_v46  ;;  %1810 = vmatpush.bf16.msrb.mxu0 %v4709_v6  ;;  %1836 = vmatpush.bf16.msrb.mxu2 %v4717_v61  ;;  %v4685_v45 = vor.u32 %v5617_v26, %v4684_v23  ;;  %v5615_v46 = vld [vmem:[#allocation9 + $0x4c] sm:$0xf]  ;;  %v5610_v6 = vld [vmem:[#allocation9 + $0x24] sm:$0xf] }
 0x25d   :  { %1825 = vmatpush.bf16.msrb.mxu1 %v4681_v43  ;;  %v4665_v61 = vor.u32 %v5610_v6, %v4662_v56 }
 0x25e   :  { %1848 = vmatpush.bf16.msrb.mxu3 %v4737_v5  ;;  %v4686_v5 = vld [vmem:[#allocation9 + $0x58] sm:$0xf0] }
 0x25f   :  { %v4689_v48 = vor.u32 %v5615_v46, %v4686_v5  ;;  %v450_v46 = vadd.f32 %v6322_v28, %v6308_v20  ;;  %v479_v5 = vadd.f32 %v6324_v32, %v6310_v21 }
 0x260   :  { %1811 = vmatpush.bf16.msrb.mxu0 %v4693_v9  ;;  %1837 = vmatpush.bf16.msrb.mxu2 %v4701_v8  ;;  %v5606_v9 = vld [vmem:[#allocation9 + $0x4] sm:$0xf]  ;;  %v5607_v8 = vld [vmem:[#allocation9 + $0xc] sm:$0xf] }
 0x261   :  { %1826 = vmatpush.bf16.msrb.mxu1 %v4665_v61  ;;  %v4649_v17 = vor.u32 %v5606_v9, %v4646_v24 }
 0x262   :  { %1849 = vmatpush.bf16.msrb.mxu3 %v4721_v3  ;;  %v4670_v3 = vld [vmem:[#allocation9 + $0x38] sm:$0xf0] }
 0x263   :  { %v4673_v22 = vor.u32 %v5611_v2, %v4670_v3 }
 0x264   :  { %1812 = vmatpush.bf16.msrb.mxu0 %v4677_v41  ;;  %1838 = vmatpush.bf16.msrb.mxu2 %v4685_v45 }
 0x265   :  { %1827 = vmatpush.bf16.msrb.mxu1 %v4649_v17  ;;  %v4884_v17 = vld [vmem:[#allocation9 + $0xe0] sm:$0xf] }
 0x266   :  { %1850 = vmatpush.bf16.msrb.mxu3 %v4705_v31  ;;  %v4654_v31 = vld [vmem:[#allocation9 + $0x18] sm:$0xf0] }
 0x267   :  { %v4657_v34 = vor.u32 %v5607_v8, %v4654_v31 }
 0x268   :  { %1813 = vmatpush.bf16.msrb.mxu0 %v4661_v55  ;;  %1839 = vmatpush.bf16.msrb.mxu2 %v4669_v63 }
 0x26a   :  { %1851 = vmatpush.bf16.msrb.mxu3 %v4689_v48 }
 0x26c   :  { %1814 = vmatpush.bf16.msrb.mxu0 %v4645_v29  ;;  %1840 = vmatpush.bf16.msrb.mxu2 %v4653_v19  ;;  %v5666_v19 = vld [vmem:[#allocation9 + $0xe4] sm:$0xf] }
 0x26e   :  { %1852 = vmatpush.bf16.msrb.mxu3 %v4673_v22 }
 0x272   :  { %1853 = vmatpush.bf16.msrb.mxu3 %v4657_v34  ;;  %v4886_v34 = vld [vmem:[#allocation9 + $0xf0] sm:$0xf0] }
 0x2d7   :  { %v1544_v41 = vpop.f32.mrf.mxu0  ;;  %v1557_v42 = vpop.f32.mrf.mxu1 }
 0x2d8   :  { %v1587_v23 = vadd.f32 %v1544_v41, %v392_v35  ;;  %v1588_v26 = vadd.f32 %v1557_v42, %v421_v37  ;;  %v4892_v35 = vld [vmem:[#allocation9 + $0xe8] sm:$0xf]  ;;  %v5669_v37 = vld [vmem:[#allocation9 + $0xf4] sm:$0xf0]  ;;  %v4889_v41 = vor.u32 %v5666_v19, %v4886_v34  ;;  %v4838_v19 = vld [vmem:[#allocation9 + $0x90] sm:$0xf0] }
 0x2d9   :  { %v4893_v42 = vor.u32 %v5669_v37, %v4892_v35  ;;  %v5657_v34 = vld [vmem:[#allocation9 + $0x94] sm:$0xf0] }
 0x2da   :  { %v1591_v43 = vmul.f32 0.5, %v1587_v23  ;;  %v1592_v45 = vmul.f32 0.5, %v1588_v26  ;;  %v5667_v23 = vld [vmem:[#allocation9 + $0xec] sm:$0xf]  ;;  %v4894_v26 = vld [vmem:[#allocation9 + $0xf8] sm:$0xf0]  ;;  %2092 = vmatpush.bf16.msra.mxu1 %v4889_v41 }
 0x2db   :  { %2105 = vmatpush.bf16.msra.mxu2 %v4893_v42  ;;  %v5655_v41 = vld [vmem:[#allocation9 + $0x8c] sm:$0xf]  ;;  %v4846_v42 = vld [vmem:[#allocation9 + $0x98] sm:$0xf0] }
 0x2dc   :  { %5850 = vtanh.f32 %v1591_v43  ;;  %v4897_v43 = vor.u32 %v5667_v23, %v4894_v26  ;;  %v4849_v23 = vor.u32 %v5655_v41, %v4846_v42  ;;  %v4820_v26 = vld [vmem:[#allocation9 + $0x60] sm:$0xf] }
 0x2dd   :  { %5852 = vtanh.f32 %v1592_v45  ;;  %v4868_v45 = vld [vmem:[#allocation9 + $0xc0] sm:$0xf] }
 0x2de   :  { %v1570_v48 = vpop.f32.mrf.mxu2  ;;  %v1583_v25 = vpop.f32.mrf.mxu3  ;;  %2118 = vmatpush.bf16.msra.mxu3 %v4897_v43  ;;  %v5652_v43 = vld [vmem:[#allocation9 + $0x6c] sm:$0xf0]  ;;  %v4772_v41 = vld [vmem:[#allocation9] sm:$0xf] }
 0x2df   :  { %v1589_v50 = vadd.f32 %v1570_v48, %v450_v46  ;;  %v1590_v53 = vadd.f32 %v1583_v25, %v479_v5  ;;  %v1546_v27 = vpop.f32.mrf.mxu0  ;;  %v1559_v6 = vpop.f32.mrf.mxu1  ;;  %v5664_v46 = vld [vmem:[#allocation9 + $0xcc] sm:$0xf0]  ;;  %v5662_v5 = vld [vmem:[#allocation9 + $0xc4] sm:$0xf]  ;;  %v4870_v25 = vld [vmem:[#allocation9 + $0xd0] sm:$0xf0] }
 0x2e0   :  { %v4869_v48 = vor.u32 %v5664_v46, %v4868_v45  ;;  %v4873_v27 = vor.u32 %v5662_v5, %v4870_v25  ;;  %v5650_v45 = vld [vmem:[#allocation9 + $0x64] sm:$0xf]  ;;  %v4821_v46 = vor.u32 %v5652_v43, %v4820_v26  ;;  %v4822_v5 = vld [vmem:[#allocation9 + $0x70] sm:$0xf0]  ;;  %v5653_v25 = vld [vmem:[#allocation9 + $0x74] sm:$0xf0] }
 0x2e1   :  { %v1593_v55 = vmul.f32 0.5, %v1589_v50  ;;  %5854 = vtanh.f32 %v1590_v53  ;;  %v4876_v50 = vld [vmem:[#allocation9 + $0xc8] sm:$0xf]  ;;  %v5665_v53 = vld [vmem:[#allocation9 + $0xd4] sm:$0xf0] }
 0x2e2   :  { %v5851_v56 = vpop.eup %5850  ;;  %v4877_v6 = vor.u32 %v5665_v53, %v4876_v50  ;;  %2093 = vmatpush.bf16.msra.mxu1 %v4873_v27  ;;  %v4825_v50 = vor.u32 %v5650_v45, %v4822_v5  ;;  %v5651_v27 = vld [vmem:[#allocation9 + $0x6c] sm:$0xf]  ;;  %v5638_v26 = vld [vmem:[#allocation9 + $0x4] sm:$0xf]  ;;  %v4774_v43 = vld [vmem:[#allocation9 + $0x10] sm:$0xf0] }
 0x2e3   :  { %v5853_v33 = vpop.eup %5852  ;;  %v1597_v58 = vmul.f32 0.5, %v5851_v56  ;;  %5856 = vtanh.f32 %v1593_v55  ;;  %v5663_v55 = vld [vmem:[#allocation9 + $0xcc] sm:$0xf]  ;;  %v4878_v56 = vld [vmem:[#allocation9 + $0xd8] sm:$0xf0] }
 0x2e4   :  { %v1598_v61 = vmul.f32 0.5, %v5853_v33  ;;  %v4881_v33 = vor.u32 %v5663_v55, %v4878_v56  ;;  %2106 = vmatpush.bf16.msra.mxu2 %v4877_v6  ;;  %v4830_v6 = vld [vmem:[#allocation9 + $0x78] sm:$0xf0]  ;;  %v4804_v56 = vld [vmem:[#allocation9 + $0x40] sm:$0xf] }
 0x2e5   :  { %v1600_v63 = vadd.f32 0.5, %v1597_v58  ;;  %v4852_v58 = vld [vmem:[#allocation9 + $0xa0] sm:$0xf]  ;;  %v4833_v55 = vor.u32 %v5651_v27, %v4830_v6  ;;  %v5641_v5 = vld [vmem:[#allocation9 + $0x14] sm:$0xf0] }
 0x2e6   :  { %v1601_v2 = vadd.f32 0.5, %v1598_v61  ;;  %v1572_v28 = vpop.f32.mrf.mxu2  ;;  %v1585_v3 = vpop.f32.mrf.mxu3  ;;  %v5660_v61 = vld [vmem:[#allocation9 + $0xac] sm:$0xf0]  ;;  %2119 = vmatpush.bf16.msra.mxu3 %v4881_v33 }
 0x2e7   :  { %v5855_v11 = vpop.eup %5854  ;;  %v4854_v28 = vld [vmem:[#allocation9 + $0xb0] sm:$0xf0]  ;;  %v4860_v3 = vld [vmem:[#allocation9 + $0xa8] sm:$0xf]  ;;  %v5648_v33 = vld [vmem:[#allocation9 + $0x4c] sm:$0xf0] }
 0x2e8   :  { %v1604_v32 = vmul.f32 %v1601_v2, %v6402_v13  ;;  %v1605_v22 = vmul.f32 %v5855_v11, %v1600_v63  ;;  %v5668_v13 = vld [vmem:[#allocation9 + $0xec] sm:$0xf0]  ;;  %v5658_v63 = vld [vmem:[#allocation9 + $0xa4] sm:$0xf]  ;;  %v4853_v2 = vor.u32 %v5660_v61, %v4852_v58  ;;  %v5661_v11 = vld [vmem:[#allocation9 + $0xb4] sm:$0xf0]  ;;  %v4805_v61 = vor.u32 %v5648_v33, %v4804_v56 }
 0x2e9   :  { %v5857_v7 = vpop.eup %5856  ;;  %v4885_v31 = vor.u32 %v5668_v13, %v4884_v17  ;;  %v5654_v17 = vld [vmem:[#allocation9 + $0x84] sm:$0xf] }
 0x2ea   :  { %v6418_v9 = vadd.f32 %v1605_v22, %v1604_v32  ;;  %v1599_v24 = vmul.f32 0.5, %v5857_v7  ;;  %v4857_v32 = vor.u32 %v5658_v63, %v4854_v28  ;;  %v4861_v22 = vor.u32 %v5661_v11, %v4860_v3  ;;  %v5659_v7 = vld [vmem:[#allocation9 + $0xac] sm:$0xf]  ;;  %v5646_v58 = vld [vmem:[#allocation9 + $0x44] sm:$0xf] }
 0x2eb   :  { %2079 = vmatpush.bf16.msra.mxu0 %v4885_v31  ;;  %v4844_v31 = vld [vmem:[#allocation9 + $0x88] sm:$0xf]  ;;  %v4841_v35 = vor.u32 %v5654_v17, %v4838_v19  ;;  %v4806_v63 = vld [vmem:[#allocation9 + $0x50] sm:$0xf0]  ;;  %v5649_v28 = vld [vmem:[#allocation9 + $0x54] sm:$0xf0] }
 0x2ec   :  { %5858 = vtanh.f32 %v6418_v9  ;;  %v1602_v29 = vadd.f32 0.5, %v1599_v24  ;;  %v4862_v24 = vld [vmem:[#allocation9 + $0xb8] sm:$0xf0]  ;;  %2094 = vmatpush.bf16.msra.mxu1 %v4857_v32  ;;  %2107 = vmatpush.bf16.msra.mxu2 %v4861_v22  ;;  %v4845_v37 = vor.u32 %v5657_v34, %v4844_v31  ;;  %v4809_v3 = vor.u32 %v5646_v58, %v4806_v63  ;;  %v5647_v32 = vld [vmem:[#allocation9 + $0x4c] sm:$0xf] }
 0x2ed   :  { %v4814_v22 = vld [vmem:[#allocation9 + $0x58] sm:$0xf0]  ;;  %v4790_v17 = vld [vmem:[#allocation9 + $0x30] sm:$0xf0]  ;;  %v5645_v19 = vld [vmem:[#allocation9 + $0x34] sm:$0xf0] }
 0x2ef   :  { %2080 = vmatpush.bf16.msra.mxu0 %v4869_v48  ;;  %v4828_v48 = vld [vmem:[#allocation9 + $0x68] sm:$0xf] }
 0x2f0   :  { %2095 = vmatpush.bf16.msra.mxu1 %v4841_v35  ;;  %2108 = vmatpush.bf16.msra.mxu2 %v4845_v37  ;;  %v4829_v53 = vor.u32 %v5653_v25, %v4828_v48  ;;  %v5643_v35 = vld [vmem:[#allocation9 + $0x2c] sm:$0xf]  ;;  %v4798_v37 = vld [vmem:[#allocation9 + $0x38] sm:$0xf0]  ;;  %v4777_v25 = vor.u32 %v5638_v26, %v4774_v43  ;;  %v5698_v26 = vld [vmem:[#allocation9 + $0xe4] sm:$0xf] }
 0x2f1   :  { %v4801_v42 = vor.u32 %v5643_v35, %v4798_v37  ;;  %v5639_v48 = vld [vmem:[#allocation9 + $0xc] sm:$0xf] }
 0x2f2   :  { %v5859_v10 = vpop.eup %5858 }
 0x2f3   :  { %v6421_v30 = vmul.f32 %v5859_v10, %v1602_v29  ;;  %2081 = vmatpush.bf16.msra.mxu0 %v4853_v2  ;;  %v4865_v29 = vor.u32 %v5659_v7, %v4862_v24  ;;  %v4836_v10 = vld [vmem:[#allocation9 + $0x80] sm:$0xf]  ;;  %v4812_v2 = vld [vmem:[#allocation9 + $0x48] sm:$0xf]  ;;  %v4817_v7 = vor.u32 %v5647_v32, %v4814_v22 }
 0x2f4   :  { %2096 = vmatpush.bf16.msra.mxu1 %v4825_v50  ;;  %2109 = vmatpush.bf16.msra.mxu2 %v4829_v53  ;;  %v4813_v11 = vor.u32 %v5649_v28, %v4812_v2  ;;  %v4788_v24 = vld [vmem:[#allocation9 + $0x20] sm:$0xf]  ;;  %v4782_v53 = vld [vmem:[#allocation9 + $0x18] sm:$0xf0] }
 0x2f5   :  { %v1614_v8 = vpack.c.bf16 %v6421_v30, %v6421_v30  ;;  %2120 = vmatpush.bf16.msra.mxu3 %v4865_v29  ;;  %v5644_v29 = vld [vmem:[#allocation9 + $0x2c] sm:$0xf0]  ;;  %v4785_v27 = vor.u32 %v5639_v48, %v4782_v53  ;;  %v5022_v53 = vld [vmem:[#allocation9 + $0xf8] sm:$0xf0] }
 0x2f7   :  { %1815 = vmatmul.bf16.vlgmr.msrb.gmra.mxu0 %v1614_v8  ;;  %1828 = vmatmul.bf16.vlgmr.msrb.gmra.mxu1 %v1614_v8 }
 0x2f8   :  { %1841 = vmatmul.bf16.vlgmr.msrb.gmra.mxu2 %v1614_v8  ;;  %1854 = vmatmul.bf16.vlgmr.msrb.gmra.mxu3 %v1614_v8  ;;  %v5656_v8 = vld [vmem:[#allocation9 + $0x8c] sm:$0xf0] }
 0x2f9   :  { %v4837_v13 = vor.u32 %v5656_v8, %v4836_v10  ;;  %2121 = vmatpush.bf16.msra.mxu3 %v4849_v23  ;;  %v5642_v10 = vld [vmem:[#allocation9 + $0x24] sm:$0xf]  ;;  %2097 = vmatpush.bf16.msra.mxu1 %v4809_v3  ;;  %v4789_v8 = vor.u32 %v5644_v29, %v4788_v24  ;;  %v5640_v23 = vld [vmem:[#allocation9 + $0xc] sm:$0xf0] }
 0x2fa   :  { %2110 = vmatpush.bf16.msra.mxu2 %v4813_v11  ;;  %v4793_v31 = vor.u32 %v5642_v10, %v4790_v17  ;;  %v4773_v45 = vor.u32 %v5640_v23, %v4772_v41  ;;  %v5012_v23 = vld [vmem:[#allocation9 + $0xe0] sm:$0xf] }
 0x2fb   :  { %2082 = vmatpush.bf16.msra.mxu0 %v4837_v13  ;;  %v4796_v13 = vld [vmem:[#allocation9 + $0x28] sm:$0xf] }
 0x2fc   :  { %v4797_v34 = vor.u32 %v5645_v19, %v4796_v13 }
 0x2fd   :  { %2122 = vmatpush.bf16.msra.mxu3 %v4833_v55  ;;  %2098 = vmatpush.bf16.msra.mxu1 %v4793_v31 }
 0x2fe   :  { %2111 = vmatpush.bf16.msra.mxu2 %v4797_v34 }
 0x2ff   :  { %2083 = vmatpush.bf16.msra.mxu0 %v4821_v46  ;;  %v4780_v46 = vld [vmem:[#allocation9 + $0x8] sm:$0xf] }
 0x300   :  { %v4781_v50 = vor.u32 %v5641_v5, %v4780_v46  ;;  %v5020_v46 = vld [vmem:[#allocation9 + $0xe8] sm:$0xf]  ;;  %v5701_v5 = vld [vmem:[#allocation9 + $0xf4] sm:$0xf0] }
 0x301   :  { %2123 = vmatpush.bf16.msra.mxu3 %v4817_v7  ;;  %2099 = vmatpush.bf16.msra.mxu1 %v4777_v25  ;;  %v5021_v25 = vor.u32 %v5701_v5, %v5020_v46  ;;  %v4974_v46 = vld [vmem:[#allocation9 + $0x98] sm:$0xf0] }
 0x302   :  { %2112 = vmatpush.bf16.msra.mxu2 %v4781_v50  ;;  %v5699_v50 = vld [vmem:[#allocation9 + $0xec] sm:$0xf] }
 0x303   :  { %2084 = vmatpush.bf16.msra.mxu0 %v4805_v61 }
 0x305   :  { %2124 = vmatpush.bf16.msra.mxu3 %v4801_v42 }
 0x306   :  { %2377 = vmatpush.bf16.msrb.mxu2 %v5021_v25  ;;  %v5684_v25 = vld [vmem:[#allocation9 + $0x6c] sm:$0xf0] }
 0x307   :  { %2085 = vmatpush.bf16.msra.mxu0 %v4789_v8 }
 0x309   :  { %2125 = vmatpush.bf16.msra.mxu3 %v4785_v27  ;;  %v5025_v27 = vor.u32 %v5699_v50, %v5022_v53  ;;  %v5682_v50 = vld [vmem:[#allocation9 + $0x64] sm:$0xf] }
 0x30b   :  { %2086 = vmatpush.bf16.msra.mxu0 %v4773_v45  ;;  %v5014_v45 = vld [vmem:[#allocation9 + $0xf0] sm:$0xf0] }
 0x30c   :  { %v5017_v48 = vor.u32 %v5698_v26, %v5014_v45  ;;  %v5687_v45 = vld [vmem:[#allocation9 + $0x8c] sm:$0xf] }
 0x30d   :  { %2390 = vmatpush.bf16.msrb.mxu3 %v5025_v27  ;;  %v4977_v5 = vor.u32 %v5687_v45, %v4974_v46  ;;  %v4950_v27 = vld [vmem:[#allocation9 + $0x70] sm:$0xf0]  ;;  %v5670_v45 = vld [vmem:[#allocation9 + $0x4] sm:$0xf] }
 0x30e   :  { %2364 = vmatpush.bf16.msrb.mxu1 %v5017_v48  ;;  %v4948_v48 = vld [vmem:[#allocation9 + $0x60] sm:$0xf]  ;;  %v4902_v46 = vld [vmem:[#allocation9 + $0x10] sm:$0xf0] }
 0x30f   :  { %v4949_v53 = vor.u32 %v5684_v25, %v4948_v48  ;;  %v4908_v48 = vld [vmem:[#allocation9 + $0x8] sm:$0xf]  ;;  %v5673_v25 = vld [vmem:[#allocation9 + $0x14] sm:$0xf0] }
 0x374   :  { %v1816_v6 = vpop.f32.mrf.mxu0  ;;  %v1829_v55 = vpop.f32.mrf.mxu1 }
 0x375   :  { %v1859_v56 = vadd.f32 %v1816_v6, %v6327_v38  ;;  %v1860_v33 = vadd.f32 %v1829_v55, %v6330_v44  ;;  %v4996_v6 = vld [vmem:[#allocation9 + $0xc0] sm:$0xf]  ;;  %v5696_v55 = vld [vmem:[#allocation9 + $0xcc] sm:$0xf0] }
 0x377   :  { %v1863_v58 = vmul.f32 0.5, %v1859_v56  ;;  %v1864_v61 = vmul.f32 0.5, %v1860_v33  ;;  %v5694_v56 = vld [vmem:[#allocation9 + $0xc4] sm:$0xf]  ;;  %v4997_v33 = vor.u32 %v5696_v55, %v4996_v6  ;;  %v4956_v6 = vld [vmem:[#allocation9 + $0x68] sm:$0xf] }
 0x378   :  { %v5685_v55 = vld [vmem:[#allocation9 + $0x74] sm:$0xf0] }
 0x379   :  { %5860 = vtanh.f32 %v1863_v58  ;;  %v4998_v58 = vld [vmem:[#allocation9 + $0xd0] sm:$0xf0] }
 0x37a   :  { %5862 = vtanh.f32 %v1864_v61  ;;  %v5004_v61 = vld [vmem:[#allocation9 + $0xc8] sm:$0xf] }
 0x37b   :  { %v1842_v63 = vpop.f32.mrf.mxu2  ;;  %v1855_v2 = vpop.f32.mrf.mxu3 }
 0x37c   :  { %v1861_v28 = vadd.f32 %v1842_v63, %v6333_v62  ;;  %v1862_v3 = vadd.f32 %v1855_v2, %v6338_v16  ;;  %v1818_v11 = vpop.f32.mrf.mxu0  ;;  %v1831_v32 = vpop.f32.mrf.mxu1  ;;  %v5697_v63 = vld [vmem:[#allocation9 + $0xd4] sm:$0xf0]  ;;  %v5001_v2 = vor.u32 %v5694_v56, %v4998_v58  ;;  %v4953_v56 = vor.u32 %v5682_v50, %v4950_v27  ;;  %v5683_v58 = vld [vmem:[#allocation9 + $0x6c] sm:$0xf] }
 0x37d   :  { %v5006_v11 = vld [vmem:[#allocation9 + $0xd8] sm:$0xf0]  ;;  %v5671_v50 = vld [vmem:[#allocation9 + $0xc] sm:$0xf]  ;;  %v4909_v27 = vor.u32 %v5673_v25, %v4908_v48  ;;  %v5724_v48 = vld [vmem:[#allocation9 + $0xac] sm:$0xf0] }
 0x37e   :  { %v1865_v22 = vmul.f32 0.5, %v1861_v28  ;;  %5864 = vtanh.f32 %v1862_v3  ;;  %v5005_v28 = vor.u32 %v5697_v63, %v5004_v61  ;;  %v5695_v3 = vld [vmem:[#allocation9 + $0xcc] sm:$0xf]  ;;  %2365 = vmatpush.bf16.msrb.mxu1 %v5001_v2  ;;  %v4958_v61 = vld [vmem:[#allocation9 + $0x78] sm:$0xf0] }
 0x37f   :  { %v5861_v7 = vpop.eup %5860  ;;  %v5009_v32 = vor.u32 %v5695_v3, %v5006_v11  ;;  %v4961_v63 = vor.u32 %v5683_v58, %v4958_v61  ;;  %v4932_v2 = vld [vmem:[#allocation9 + $0x40] sm:$0xf]  ;;  %v5678_v3 = vld [vmem:[#allocation9 + $0x44] sm:$0xf] }
 0x380   :  { %v5863_v24 = vpop.eup %5862  ;;  %v1869_v29 = vmul.f32 0.5, %v5861_v7  ;;  %5866 = vtanh.f32 %v1865_v22  ;;  %2378 = vmatpush.bf16.msrb.mxu2 %v5005_v28  ;;  %v4980_v22 = vld [vmem:[#allocation9 + $0xa0] sm:$0xf]  ;;  %v5692_v7 = vld [vmem:[#allocation9 + $0xac] sm:$0xf0] }
 0x381   :  { %v1870_v38 = vmul.f32 0.5, %v5863_v24  ;;  %v5690_v24 = vld [vmem:[#allocation9 + $0xa4] sm:$0xf]  ;;  %2391 = vmatpush.bf16.msrb.mxu3 %v5009_v32  ;;  %v5680_v28 = vld [vmem:[#allocation9 + $0x4c] sm:$0xf0] }
 0x382   :  { %v1872_v44 = vadd.f32 0.5, %v1869_v29  ;;  %v4981_v29 = vor.u32 %v5692_v7, %v4980_v22  ;;  %v4933_v11 = vor.u32 %v5680_v28, %v4932_v2  ;;  %v4934_v32 = vld [vmem:[#allocation9 + $0x50] sm:$0xf0]  ;;  %v4940_v22 = vld [vmem:[#allocation9 + $0x48] sm:$0xf] }
 0x383   :  { %v1873_v10 = vadd.f32 0.5, %v1870_v38  ;;  %v1844_v8 = vpop.f32.mrf.mxu2  ;;  %v1857_v17 = vpop.f32.mrf.mxu3  ;;  %v4982_v38 = vld [vmem:[#allocation9 + $0xb0] sm:$0xf0]  ;;  %v5681_v7 = vld [vmem:[#allocation9 + $0x54] sm:$0xf0] }
 0x384   :  { %v5865_v13 = vpop.eup %5864  ;;  %v4985_v8 = vor.u32 %v5690_v24, %v4982_v38  ;;  %v4937_v24 = vor.u32 %v5678_v3, %v4934_v32  ;;  %v5679_v38 = vld [vmem:[#allocation9 + $0x4c] sm:$0xf]  ;;  %v5140_v28 = vld [vmem:[#allocation9 + $0xe0] sm:$0xf]  ;;  %v5732_v3 = vld [vmem:[#allocation9 + $0xec] sm:$0xf0] }
 0x385   :  { %v1876_v19 = vmul.f32 %v1873_v10, %v6418_v9  ;;  %v1877_v31 = vmul.f32 %v5865_v13, %v1872_v44  ;;  %v5700_v9 = vld [vmem:[#allocation9 + $0xec] sm:$0xf0]  ;;  %v4988_v44 = vld [vmem:[#allocation9 + $0xa8] sm:$0xf]  ;;  %v5693_v10 = vld [vmem:[#allocation9 + $0xb4] sm:$0xf0]  ;;  %v5141_v32 = vor.u32 %v5732_v3, %v5140_v28 }
 0x386   :  { %v5867_v62 = vpop.eup %5866  ;;  %v5013_v43 = vor.u32 %v5700_v9, %v5012_v23  ;;  %v4989_v17 = vor.u32 %v5693_v10, %v4988_v44  ;;  %v5691_v13 = vld [vmem:[#allocation9 + $0xac] sm:$0xf]  ;;  %2366 = vmatpush.bf16.msrb.mxu1 %v4985_v8  ;;  %v4972_v23 = vld [vmem:[#allocation9 + $0x88] sm:$0xf]  ;;  %v5689_v9 = vld [vmem:[#allocation9 + $0x94] sm:$0xf0] }
 0x387   :  { %v6430_v34 = vadd.f32 %v1877_v31, %v1876_v19  ;;  %v1871_v16 = vmul.f32 0.5, %v5867_v62  ;;  %v4990_v19 = vld [vmem:[#allocation9 + $0xb8] sm:$0xf0]  ;;  %v4964_v62 = vld [vmem:[#allocation9 + $0x80] sm:$0xf] }
 0x388   :  { %2351 = vmatpush.bf16.msrb.mxu0 %v5013_v43  ;;  %v4993_v31 = vor.u32 %v5691_v13, %v4990_v19  ;;  %2379 = vmatpush.bf16.msrb.mxu2 %v4989_v17  ;;  %v4973_v43 = vor.u32 %v5689_v9, %v4972_v23  ;;  %v4942_v44 = vld [vmem:[#allocation9 + $0x58] sm:$0xf0]  ;;  %v4916_v8 = vld [vmem:[#allocation9 + $0x20] sm:$0xf]  ;;  %v5676_v17 = vld [vmem:[#allocation9 + $0x2c] sm:$0xf0] }
 0x389   :  { %5868 = vtanh.f32 %v6430_v34  ;;  %v1874_v35 = vadd.f32 0.5, %v1871_v16  ;;  %v5688_v16 = vld [vmem:[#allocation9 + $0x8c] sm:$0xf0]  ;;  %v4945_v10 = vor.u32 %v5679_v38, %v4942_v44  ;;  %v5674_v13 = vld [vmem:[#allocation9 + $0x24] sm:$0xf]  ;;  %v4917_v19 = vor.u32 %v5676_v17, %v4916_v8 }
 0x38a   :  { %2392 = vmatpush.bf16.msrb.mxu3 %v4993_v31  ;;  %v4918_v31 = vld [vmem:[#allocation9 + $0x30] sm:$0xf0]  ;;  %v4926_v23 = vld [vmem:[#allocation9 + $0x38] sm:$0xf0]  ;;  %v4900_v9 = vld [vmem:[#allocation9] sm:$0xf] }
 0x38b   :  { %v5150_v8 = vld [vmem:[#allocation9 + $0xf8] sm:$0xf0]  ;;  %v5124_v17 = vld [vmem:[#allocation9 + $0xc0] sm:$0xf]  ;;  %v5722_v25 = vld [vmem:[#allocation9 + $0xa4] sm:$0xf] }
 0x38c   :  { %2352 = vmatpush.bf16.msrb.mxu0 %v4997_v33  ;;  %2380 = vmatpush.bf16.msrb.mxu2 %v4973_v43  ;;  %v4957_v33 = vor.u32 %v5685_v55, %v4956_v6  ;;  %v5672_v43 = vld [vmem:[#allocation9 + $0xc] sm:$0xf0]  ;;  %v4910_v6 = vld [vmem:[#allocation9 + $0x18] sm:$0xf0]  ;;  %v5092_v28 = vld [vmem:[#allocation9 + $0x80] sm:$0xf] }
 0x38d   :  { %v4913_v55 = vor.u32 %v5671_v50, %v4910_v6  ;;  %v5110_v50 = vld [vmem:[#allocation9 + $0xb0] sm:$0xf0]  ;;  %v5720_v3 = vld [vmem:[#allocation9 + $0x8c] sm:$0xf0] }
 0x38e   :  { %2393 = vmatpush.bf16.msrb.mxu3 %v4977_v5  ;;  %v4901_v5 = vor.u32 %v5672_v43, %v4900_v9  ;;  %v5134_v43 = vld [vmem:[#allocation9 + $0xd8] sm:$0xf0] }
 0x38f   :  { %v5869_v37 = vpop.eup %5868 }
 0x390   :  { %v6433_v41 = vmul.f32 %v5869_v37, %v1874_v35  ;;  %2353 = vmatpush.bf16.msrb.mxu0 %v4981_v29  ;;  %v5686_v35 = vld [vmem:[#allocation9 + $0x84] sm:$0xf]  ;;  %v4965_v37 = vor.u32 %v5688_v16, %v4964_v62  ;;  %2381 = vmatpush.bf16.msrb.mxu2 %v4957_v33  ;;  %v4941_v29 = vor.u32 %v5681_v7, %v4940_v22  ;;  %v4924_v62 = vld [vmem:[#allocation9 + $0x28] sm:$0xf]  ;;  %v5677_v16 = vld [vmem:[#allocation9 + $0x34] sm:$0xf0] }
 0x391   :  { %v426_v33 = vadd.f32 %v6340_v18, %v6298_v14  ;;  %v5142_v22 = vld [vmem:[#allocation9 + $0xf0] sm:$0xf0]  ;;  %v5148_v7 = vld [vmem:[#allocation9 + $0xe8] sm:$0xf] }
 0x392   :  { %v1886_v42 = vpack.c.bf16 %v6433_v41, %v6433_v41  ;;  %2394 = vmatpush.bf16.msrb.mxu3 %v4961_v63 }
 0x394   :  { %2087 = vmatmul.bf16.vlgmr.msra.gmra.mxu0 %v1886_v42  ;;  %2100 = vmatmul.bf16.vlgmr.msra.gmra.mxu1 %v1886_v42 }
 0x395   :  { %2113 = vmatmul.bf16.vlgmr.msra.gmra.mxu2 %v1886_v42  ;;  %2126 = vmatmul.bf16.vlgmr.msra.gmra.mxu3 %v1886_v42  ;;  %v4966_v42 = vld [vmem:[#allocation9 + $0x90] sm:$0xf0] }
 0x396   :  { %v4969_v26 = vor.u32 %v5686_v35, %v4966_v42  ;;  %2354 = vmatpush.bf16.msrb.mxu0 %v4965_v37  ;;  %2382 = vmatpush.bf16.msrb.mxu2 %v4941_v29  ;;  %v4921_v35 = vor.u32 %v5674_v13, %v4918_v31  ;;  %v4925_v37 = vor.u32 %v5677_v16, %v4924_v62  ;;  %v5675_v42 = vld [vmem:[#allocation9 + $0x2c] sm:$0xf]  ;;  %v5728_v13 = vld [vmem:[#allocation9 + $0xcc] sm:$0xf0]  ;;  %v5126_v16 = vld [vmem:[#allocation9 + $0xd0] sm:$0xf0] }
 0x397   :  { %2395 = vmatpush.bf16.msrb.mxu3 %v4945_v10  ;;  %v455_v31 = vadd.f32 %v6342_v47, %v6308_v20  ;;  %v5125_v62 = vor.u32 %v5728_v13, %v5124_v17 }
 0x398   :  { %2367 = vmatpush.bf16.msrb.mxu1 %v4969_v26  ;;  %v4929_v26 = vor.u32 %v5675_v42, %v4926_v23  ;;  %v484_v42 = vadd.f32 %v6344_v51, %v6310_v21  ;;  %v5116_v51 = vld [vmem:[#allocation9 + $0xa8] sm:$0xf] }
 0x39a   :  { %2355 = vmatpush.bf16.msrb.mxu0 %v4949_v53  ;;  %2383 = vmatpush.bf16.msrb.mxu2 %v4925_v37  ;;  %v4905_v53 = vor.u32 %v5670_v45, %v4902_v46  ;;  %v5729_v37 = vld [vmem:[#allocation9 + $0xd4] sm:$0xf0]  ;;  %v5108_v45 = vld [vmem:[#allocation9 + $0xa0] sm:$0xf] }
 0x39b   :  { %2396 = vmatpush.bf16.msrb.mxu3 %v4929_v26  ;;  %v5727_v26 = vld [vmem:[#allocation9 + $0xcc] sm:$0xf] }
 0x39c   :  { %2368 = vmatpush.bf16.msrb.mxu1 %v4953_v56  ;;  %v397_v56 = vadd.f32 %v6335_v0, %v6294_v12  ;;  %v5731_v0 = vld [vmem:[#allocation9 + $0xec] sm:$0xf]  ;;  %v5137_v47 = vor.u32 %v5727_v26, %v5134_v43 }
 0x39d   :  { %v5153_v18 = vor.u32 %v5731_v0, %v5150_v8  ;;  %v5093_v8 = vor.u32 %v5720_v3, %v5092_v28  ;;  %v5710_v28 = vld [vmem:[#allocation9 + $0x44] sm:$0xf] }
 0x39e   :  { %2356 = vmatpush.bf16.msrb.mxu0 %v4933_v11  ;;  %2384 = vmatpush.bf16.msrb.mxu2 %v4909_v27  ;;  %v5730_v11 = vld [vmem:[#allocation9 + $0xe4] sm:$0xf] }
 0x39f   :  { %2397 = vmatpush.bf16.msrb.mxu3 %v4913_v55  ;;  %v5145_v44 = vor.u32 %v5730_v11, %v5142_v22  ;;  %v5718_v22 = vld [vmem:[#allocation9 + $0x84] sm:$0xf] }
 0x3a0   :  { %2369 = vmatpush.bf16.msrb.mxu1 %v4937_v24  ;;  %v5733_v24 = vld [vmem:[#allocation9 + $0xf4] sm:$0xf0] }
 0x3a1   :  { %v5149_v10 = vor.u32 %v5733_v24, %v5148_v7  ;;  %v5094_v7 = vld [vmem:[#allocation9 + $0x90] sm:$0xf0] }
 0x3a2   :  { %2357 = vmatpush.bf16.msrb.mxu0 %v4917_v19  ;;  %v5726_v19 = vld [vmem:[#allocation9 + $0xc4] sm:$0xf]  ;;  %v5097_v13 = vor.u32 %v5718_v22, %v5094_v7  ;;  %v5713_v22 = vld [vmem:[#allocation9 + $0x54] sm:$0xf0] }
 0x3a3   :  { %2649 = vmatpush.bf16.msra.mxu2 %v5149_v10  ;;  %2662 = vmatpush.bf16.msra.mxu3 %v5153_v18  ;;  %v5129_v23 = vor.u32 %v5726_v19, %v5126_v16  ;;  %v5102_v18 = vld [vmem:[#allocation9 + $0x98] sm:$0xf0] }
 0x3a4   :  { %2370 = vmatpush.bf16.msrb.mxu1 %v4921_v35  ;;  %v5132_v35 = vld [vmem:[#allocation9 + $0xc8] sm:$0xf] }
 0x3a5   :  { %v5133_v9 = vor.u32 %v5729_v37, %v5132_v35 }
 0x3a6   :  { %2358 = vmatpush.bf16.msrb.mxu0 %v4901_v5 }
 0x3a7   :  { %2650 = vmatpush.bf16.msra.mxu2 %v5133_v9  ;;  %2663 = vmatpush.bf16.msra.mxu3 %v5137_v47 }
 0x3a8   :  { %2371 = vmatpush.bf16.msrb.mxu1 %v4905_v53 }
 0x3aa   :  { %2623 = vmatpush.bf16.msra.mxu0 %v5141_v32 }
 0x3ac   :  { %2636 = vmatpush.bf16.msra.mxu1 %v5145_v44  ;;  %v5719_v44 = vld [vmem:[#allocation9 + $0x8c] sm:$0xf] }
 0x3ae   :  { %2624 = vmatpush.bf16.msra.mxu0 %v5125_v62  ;;  %v5105_v62 = vor.u32 %v5719_v44, %v5102_v18 }
 0x3b0   :  { %2637 = vmatpush.bf16.msra.mxu1 %v5129_v23 }
 0x411   :  { %v2088_v58 = vpop.f32.mrf.mxu0  ;;  %v2101_v61 = vpop.f32.mrf.mxu1 }
 0x412   :  { %v2131_v63 = vadd.f32 %v2088_v58, %v397_v56  ;;  %v2132_v2 = vadd.f32 %v2101_v61, %v426_v33  ;;  %v5109_v56 = vor.u32 %v5724_v48, %v5108_v45  ;;  %v5725_v33 = vld [vmem:[#allocation9 + $0xb4] sm:$0xf0]  ;;  %v5723_v58 = vld [vmem:[#allocation9 + $0xac] sm:$0xf]  ;;  %v5113_v61 = vor.u32 %v5722_v25, %v5110_v50  ;;  %v5716_v25 = vld [vmem:[#allocation9 + $0x6c] sm:$0xf0] }
 0x413   :  { %v5714_v50 = vld [vmem:[#allocation9 + $0x64] sm:$0xf] }
 0x414   :  { %v2135_v29 = vmul.f32 0.5, %v2131_v63  ;;  %v2136_v38 = vmul.f32 0.5, %v2132_v2  ;;  %v5117_v63 = vor.u32 %v5725_v33, %v5116_v51  ;;  %v5118_v2 = vld [vmem:[#allocation9 + $0xb8] sm:$0xf0]  ;;  %2625 = vmatpush.bf16.msra.mxu0 %v5109_v56  ;;  %2638 = vmatpush.bf16.msra.mxu1 %v5113_v61  ;;  %v5715_v33 = vld [vmem:[#allocation9 + $0x6c] sm:$0xf] }
 0x415   :  { %v5121_v32 = vor.u32 %v5723_v58, %v5118_v2  ;;  %v5086_v58 = vld [vmem:[#allocation9 + $0x78] sm:$0xf0]  ;;  %v5712_v2 = vld [vmem:[#allocation9 + $0x4c] sm:$0xf0] }
 0x416   :  { %5870 = vtanh.f32 %v2135_v29  ;;  %v5100_v29 = vld [vmem:[#allocation9 + $0x88] sm:$0xf]  ;;  %2651 = vmatpush.bf16.msra.mxu2 %v5117_v63  ;;  %v5089_v61 = vor.u32 %v5715_v33, %v5086_v58  ;;  %v5060_v63 = vld [vmem:[#allocation9 + $0x40] sm:$0xf]  ;;  %v5276_v58 = vld [vmem:[#allocation12 + $0xe8] sm:$0xf] }
 0x417   :  { %5872 = vtanh.f32 %v2136_v38  ;;  %v5721_v38 = vld [vmem:[#allocation9 + $0x94] sm:$0xf0]  ;;  %2664 = vmatpush.bf16.msra.mxu3 %v5121_v32  ;;  %v5061_v3 = vor.u32 %v5712_v2, %v5060_v63  ;;  %v5068_v32 = vld [vmem:[#allocation9 + $0x48] sm:$0xf]  ;;  %v5763_v63 = vld [vmem:[#allocation12 + $0xec] sm:$0xf] }
 0x418   :  { %v2114_v46 = vpop.f32.mrf.mxu2  ;;  %v2127_v5 = vpop.f32.mrf.mxu3  ;;  %v5101_v19 = vor.u32 %v5721_v38, %v5100_v29  ;;  %2626 = vmatpush.bf16.msra.mxu0 %v5093_v8  ;;  %2639 = vmatpush.bf16.msra.mxu1 %v5097_v13  ;;  %v5711_v29 = vld [vmem:[#allocation9 + $0x4c] sm:$0xf]  ;;  %v5070_v38 = vld [vmem:[#allocation9 + $0x58] sm:$0xf0]  ;;  %v5706_v8 = vld [vmem:[#allocation9 + $0x24] sm:$0xf] }
 0x419   :  { %v2133_v53 = vadd.f32 %v2114_v46, %v455_v31  ;;  %v2134_v27 = vadd.f32 %v2127_v5, %v484_v42  ;;  %v2090_v6 = vpop.f32.mrf.mxu0  ;;  %v2103_v55 = vpop.f32.mrf.mxu1  ;;  %v5073_v44 = vor.u32 %v5711_v29, %v5070_v38  ;;  %v5052_v13 = vld [vmem:[#allocation9 + $0x28] sm:$0xf]  ;;  %v5260_v29 = vld [vmem:[#allocation12 + $0xc8] sm:$0xf] }
 0x41a   :  { %2652 = vmatpush.bf16.msra.mxu2 %v5101_v19  ;;  %v5084_v6 = vld [vmem:[#allocation9 + $0x68] sm:$0xf]  ;;  %v5717_v55 = vld [vmem:[#allocation9 + $0x74] sm:$0xf0] }
 0x41b   :  { %v2137_v11 = vmul.f32 0.5, %v2133_v53  ;;  %5874 = vtanh.f32 %v2134_v27  ;;  %2665 = vmatpush.bf16.msra.mxu3 %v5105_v62  ;;  %v5078_v27 = vld [vmem:[#allocation9 + $0x70] sm:$0xf0]  ;;  %v5085_v51 = vor.u32 %v5717_v55, %v5084_v6  ;;  %v5709_v19 = vld [vmem:[#allocation9 + $0x34] sm:$0xf0] }
 0x41c   :  { %v5871_v24 = vpop.eup %5870  ;;  %v5081_v56 = vor.u32 %v5714_v50, %v5078_v27  ;;  %v5053_v62 = vor.u32 %v5709_v19, %v5052_v13  ;;  %v5038_v50 = vld [vmem:[#allocation9 + $0x18] sm:$0xf0]  ;;  %v5764_v6 = vld [vmem:[#allocation12 + $0xec] sm:$0xf0]  ;;  %v5762_v55 = vld [vmem:[#allocation12 + $0xe4] sm:$0xf] }
 0x41d   :  { %v5873_v10 = vpop.eup %5872  ;;  %v2141_v0 = vmul.f32 0.5, %v5871_v24  ;;  %5876 = vtanh.f32 %v2137_v11  ;;  %v5062_v11 = vld [vmem:[#allocation9 + $0x50] sm:$0xf0]  ;;  %v5069_v24 = vor.u32 %v5713_v22, %v5068_v32  ;;  %v5754_v19 = vld [vmem:[#allocation12 + $0xa4] sm:$0xf] }
 0x41e   :  { %v2142_v17 = vmul.f32 0.5, %v5873_v10  ;;  %2640 = vmatpush.bf16.msra.mxu1 %v5081_v56  ;;  %2653 = vmatpush.bf16.msra.mxu2 %v5085_v51  ;;  %v5065_v7 = vor.u32 %v5710_v28, %v5062_v11  ;;  %v5044_v10 = vld [vmem:[#allocation9 + $0x20] sm:$0xf]  ;;  %v5270_v56 = vld [vmem:[#allocation12 + $0xf0] sm:$0xf0] }
 0x41f   :  { %v2144_v31 = vadd.f32 0.5, %v2141_v0  ;;  %2666 = vmatpush.bf16.msra.mxu3 %v5089_v61  ;;  %v5708_v0 = vld [vmem:[#allocation9 + $0x2c] sm:$0xf0]  ;;  %v5273_v33 = vor.u32 %v5762_v55, %v5270_v56  ;;  %v5765_v61 = vld [vmem:[#allocation12 + $0xf4] sm:$0xf0] }
 0x420   :  { %v2145_v16 = vadd.f32 0.5, %v2142_v17  ;;  %v2116_v35 = vpop.f32.mrf.mxu2  ;;  %v2129_v37 = vpop.f32.mrf.mxu3  ;;  %v5045_v18 = vor.u32 %v5708_v0, %v5044_v10  ;;  %v5046_v17 = vld [vmem:[#allocation9 + $0x30] sm:$0xf0]  ;;  %v5277_v2 = vor.u32 %v5765_v61, %v5276_v58  ;;  %v5278_v28 = vld [vmem:[#allocation12 + $0xf8] sm:$0xf0] }
 0x421   :  { %v5875_v42 = vpop.eup %5874  ;;  %v5054_v35 = vld [vmem:[#allocation9 + $0x38] sm:$0xf0]  ;;  %v5760_v11 = vld [vmem:[#allocation12 + $0xcc] sm:$0xf0]  ;;  %v5281_v32 = vor.u32 %v5763_v63, %v5278_v28  ;;  %v5759_v10 = vld [vmem:[#allocation12 + $0xcc] sm:$0xf] }
 0x422   :  { %v2148_v23 = vmul.f32 %v2145_v16, %v6430_v34  ;;  %v2149_v9 = vmul.f32 %v5875_v42, %v2144_v31  ;;  %v5076_v34 = vld [vmem:[#allocation9 + $0x60] sm:$0xf]  ;;  %2641 = vmatpush.bf16.msra.mxu1 %v5065_v7  ;;  %2654 = vmatpush.bf16.msra.mxu2 %v5069_v24  ;;  %v5049_v31 = vor.u32 %v5706_v8, %v5046_v17  ;;  %v5707_v16 = vld [vmem:[#allocation9 + $0x2c] sm:$0xf]  ;;  %v5758_v7 = vld [vmem:[#allocation12 + $0xc4] sm:$0xf] }
 0x423   :  { %v5877_v26 = vpop.eup %5876  ;;  %v5077_v53 = vor.u32 %v5716_v25, %v5076_v34  ;;  %2667 = vmatpush.bf16.msra.mxu3 %v5073_v44  ;;  %v5057_v37 = vor.u32 %v5707_v16, %v5054_v35  ;;  %v5028_v42 = vld [vmem:[#allocation9] sm:$0xf]  ;;  %v5703_v25 = vld [vmem:[#allocation9 + $0xc] sm:$0xf]  ;;  %v5254_v24 = vld [vmem:[#allocation12 + $0xd0] sm:$0xf0] }
 0x424   :  { %v6446_v43 = vadd.f32 %v2149_v9, %v2148_v23  ;;  %v2143_v45 = vmul.f32 0.5, %v5877_v26  ;;  %v5704_v23 = vld [vmem:[#allocation9 + $0xc] sm:$0xf0]  ;;  %v5702_v9 = vld [vmem:[#allocation9 + $0x4] sm:$0xf]  ;;  %v5041_v27 = vor.u32 %v5703_v25, %v5038_v50  ;;  %v5257_v38 = vor.u32 %v5758_v7, %v5254_v24 }
 0x425   :  { %2627 = vmatpush.bf16.msra.mxu0 %v5077_v53  ;;  %v5029_v26 = vor.u32 %v5704_v23, %v5028_v42  ;;  %v5268_v53 = vld [vmem:[#allocation12 + $0xe0] sm:$0xf]  ;;  %v5761_v44 = vld [vmem:[#allocation12 + $0xd4] sm:$0xf0]  ;;  %v5262_v0 = vld [vmem:[#allocation12 + $0xd8] sm:$0xf0] }
 0x426   :  { %5878 = vtanh.f32 %v6446_v43  ;;  %v2146_v46 = vadd.f32 0.5, %v2143_v45  ;;  %2642 = vmatpush.bf16.msra.mxu1 %v5049_v31  ;;  %2655 = vmatpush.bf16.msra.mxu2 %v5053_v62  ;;  %v5030_v45 = vld [vmem:[#allocation9 + $0x10] sm:$0xf0]  ;;  %v5269_v51 = vor.u32 %v5764_v6, %v5268_v53  ;;  %v5261_v8 = vor.u32 %v5761_v44, %v5260_v29  ;;  %v5236_v17 = vld [vmem:[#allocation12 + $0xa0] sm:$0xf] }
 0x427   :  { %2668 = vmatpush.bf16.msra.mxu3 %v5057_v37  ;;  %v5756_v13 = vld [vmem:[#allocation12 + $0xac] sm:$0xf0]  ;;  %v5238_v31 = vld [vmem:[#allocation12 + $0xb0] sm:$0xf0]  ;;  %v5244_v62 = vld [vmem:[#allocation12 + $0xa8] sm:$0xf] }
 0x428   :  { %v5757_v16 = vld [vmem:[#allocation12 + $0xb4] sm:$0xf0]  ;;  %v5237_v35 = vor.u32 %v5756_v13, %v5236_v17  ;;  %v5241_v37 = vor.u32 %v5754_v19, %v5238_v31  ;;  %v5755_v42 = vld [vmem:[#allocation12 + $0xac] sm:$0xf]  ;;  %v5246_v23 = vld [vmem:[#allocation12 + $0xb8] sm:$0xf0] }
 0x429   :  { %2628 = vmatpush.bf16.msra.mxu0 %v5061_v3  ;;  %v5252_v3 = vld [vmem:[#allocation12 + $0xc0] sm:$0xf]  ;;  %v5753_v25 = vld [vmem:[#allocation12 + $0x94] sm:$0xf0]  ;;  %v5751_v50 = vld [vmem:[#allocation12 + $0x8c] sm:$0xf] }
 0x42a   :  { %v5253_v22 = vor.u32 %v5760_v11, %v5252_v3  ;;  %v5230_v53 = vld [vmem:[#allocation12 + $0x98] sm:$0xf0]  ;;  %v5746_v58 = vld [vmem:[#allocation12 + $0x64] sm:$0xf]  ;;  %v5206_v28 = vld [vmem:[#allocation12 + $0x70] sm:$0xf0] }
 0x42b   :  { %2669 = vmatpush.bf16.msra.mxu3 %v5041_v27  ;;  %v5233_v56 = vor.u32 %v5751_v50, %v5230_v53  ;;  %v5212_v3 = vld [vmem:[#allocation12 + $0x68] sm:$0xf]  ;;  %v5749_v11 = vld [vmem:[#allocation12 + $0x74] sm:$0xf0]  ;;  %v5209_v7 = vor.u32 %v5746_v58, %v5206_v28  ;;  %v5747_v29 = vld [vmem:[#allocation12 + $0x6c] sm:$0xf] }
 0x42c   :  { %v5879_v5 = vpop.eup %5878  ;;  %v5213_v24 = vor.u32 %v5749_v11, %v5212_v3  ;;  %v5188_v44 = vld [vmem:[#allocation12 + $0x40] sm:$0xf]  ;;  %v5182_v53 = vld [vmem:[#allocation12 + $0x38] sm:$0xf0]  ;;  %v5736_v58 = vld [vmem:[#allocation12 + $0xc] sm:$0xf0] }
 0x42d   :  { %v6449_v47 = vmul.f32 %v5879_v5, %v2146_v46  ;;  %2629 = vmatpush.bf16.msra.mxu0 %v5045_v18  ;;  %v5036_v46 = vld [vmem:[#allocation9 + $0x8] sm:$0xf]  ;;  %v5705_v5 = vld [vmem:[#allocation9 + $0x14] sm:$0xf0]  ;;  %v5265_v18 = vor.u32 %v5759_v10, %v5262_v0  ;;  %v5744_v0 = vld [vmem:[#allocation12 + $0x4c] sm:$0xf0] }
 0x42e   :  { %v5037_v34 = vor.u32 %v5705_v5, %v5036_v46  ;;  %v5750_v46 = vld [vmem:[#allocation12 + $0x84] sm:$0xf]  ;;  %v5222_v5 = vld [vmem:[#allocation12 + $0x90] sm:$0xf0]  ;;  %v5189_v19 = vor.u32 %v5744_v0, %v5188_v44  ;;  %v5164_v28 = vld [vmem:[#allocation12 + $0x8] sm:$0xf] }
 0x42f   :  { %v2158_v48 = vpack.c.bf16 %v6449_v47, %v6449_v47  ;;  %v5225_v6 = vor.u32 %v5750_v46, %v5222_v5  ;;  %v5741_v46 = vld [vmem:[#allocation12 + $0x34] sm:$0xf0]  ;;  %v5739_v5 = vld [vmem:[#allocation12 + $0x2c] sm:$0xf] }
 0x430   :  { %2656 = vmatpush.bf16.msra.mxu2 %v5037_v34  ;;  %v5228_v34 = vld [vmem:[#allocation12 + $0x88] sm:$0xf]  ;;  %v5737_v3 = vld [vmem:[#allocation12 + $0x14] sm:$0xf0] }
 0x431   :  { %2359 = vmatmul.bf16.vlgmr.msrb.gmra.mxu0 %v2158_v48  ;;  %2372 = vmatmul.bf16.vlgmr.msrb.gmra.mxu1 %v2158_v48  ;;  %v5229_v55 = vor.u32 %v5753_v25, %v5228_v34 }
 0x432   :  { %2385 = vmatmul.bf16.vlgmr.msrb.gmra.mxu2 %v2158_v48  ;;  %2398 = vmatmul.bf16.vlgmr.msrb.gmra.mxu3 %v2158_v48  ;;  %v5033_v48 = vor.u32 %v5702_v9, %v5030_v45  ;;  %v5220_v9 = vld [vmem:[#allocation12 + $0x80] sm:$0xf]  ;;  %v5752_v45 = vld [vmem:[#allocation12 + $0x8c] sm:$0xf0] }
 0x433   :  { %2630 = vmatpush.bf16.msra.mxu0 %v5029_v26  ;;  %2999 = vmatpush.bf16.msrb.mxu3 %v5281_v32  ;;  %v5245_v26 = vor.u32 %v5757_v16, %v5244_v62  ;;  %v5221_v27 = vor.u32 %v5752_v45, %v5220_v9  ;;  %v5196_v62 = vld [vmem:[#allocation12 + $0x48] sm:$0xf]  ;;  %v5743_v16 = vld [vmem:[#allocation12 + $0x4c] sm:$0xf]  ;;  %v5738_v9 = vld [vmem:[#allocation12 + $0x24] sm:$0xf] }
 0x434   :  { %2643 = vmatpush.bf16.msra.mxu1 %v5033_v48  ;;  %2970 = vmatpush.bf16.msrb.mxu2 %v5277_v2  ;;  %v5249_v48 = vor.u32 %v5755_v42, %v5246_v23  ;;  %v5740_v23 = vld [vmem:[#allocation12 + $0x2c] sm:$0xf0]  ;;  %v5180_v45 = vld [vmem:[#allocation12 + $0x28] sm:$0xf] }
 0x437   :  { %2912 = vmatpush.bf16.msrb.mxu0 %v5269_v51  ;;  %3000 = vmatpush.bf16.msrb.mxu3 %v5265_v18  ;;  %v5204_v51 = vld [vmem:[#allocation12 + $0x60] sm:$0xf]  ;;  %v5190_v18 = vld [vmem:[#allocation12 + $0x50] sm:$0xf0] }
 0x438   :  { %2941 = vmatpush.bf16.msrb.mxu1 %v5273_v33  ;;  %2971 = vmatpush.bf16.msrb.mxu2 %v5261_v8  ;;  %v5748_v33 = vld [vmem:[#allocation12 + $0x6c] sm:$0xf0]  ;;  %v5742_v8 = vld [vmem:[#allocation12 + $0x44] sm:$0xf] }
 0x439   :  { %v5205_v2 = vor.u32 %v5748_v33, %v5204_v51  ;;  %v5193_v31 = vor.u32 %v5742_v8, %v5190_v18  ;;  %v5181_v33 = vor.u32 %v5741_v46, %v5180_v45  ;;  %v5398_v46 = vld [vmem:[#allocation13 + $0xf0] sm:$0xf0] }
 0x43b   :  { %2913 = vmatpush.bf16.msrb.mxu0 %v5253_v22  ;;  %3001 = vmatpush.bf16.msrb.mxu3 %v5249_v48 }
 0x43c   :  { %2942 = vmatpush.bf16.msrb.mxu1 %v5257_v38  ;;  %2972 = vmatpush.bf16.msrb.mxu2 %v5245_v26  ;;  %v5214_v38 = vld [vmem:[#allocation12 + $0x78] sm:$0xf0]  ;;  %v5174_v26 = vld [vmem:[#allocation12 + $0x30] sm:$0xf0] }
 0x43d   :  { %v5217_v10 = vor.u32 %v5747_v29, %v5214_v38  ;;  %v5177_v50 = vor.u32 %v5738_v9, %v5174_v26  ;;  %v5165_v38 = vor.u32 %v5737_v3, %v5164_v28  ;;  %v5796_v9 = vld [vmem:[#allocation13 + $0xec] sm:$0xf0]  ;;  %v5794_v26 = vld [vmem:[#allocation13 + $0xe4] sm:$0xf]  ;;  %v5364_v28 = vld [vmem:[#allocation13 + $0xa0] sm:$0xf] }
 0x43e   :  { %v5788_v3 = vld [vmem:[#allocation13 + $0xac] sm:$0xf0] }
 0x43f   :  { %2914 = vmatpush.bf16.msrb.mxu0 %v5237_v35  ;;  %3002 = vmatpush.bf16.msrb.mxu3 %v5233_v56  ;;  %v5198_v35 = vld [vmem:[#allocation12 + $0x58] sm:$0xf0] }
 0x440   :  { %2943 = vmatpush.bf16.msrb.mxu1 %v5241_v37  ;;  %2973 = vmatpush.bf16.msrb.mxu2 %v5229_v55  ;;  %v5172_v37 = vld [vmem:[#allocation12 + $0x20] sm:$0xf]  ;;  %v5201_v42 = vor.u32 %v5743_v16, %v5198_v35 }
 0x441   :  { %v5173_v25 = vor.u32 %v5740_v23, %v5172_v37  ;;  %v5396_v23 = vld [vmem:[#allocation13 + $0xe0] sm:$0xf] }
 0x442   :  { %v6467_v45 = vor.u32 %v5796_v9, %v5396_v23  ;;  %v5334_v23 = vld [vmem:[#allocation13 + $0x70] sm:$0xf0] }
 0x443   :  { %2915 = vmatpush.bf16.msrb.mxu0 %v5221_v27  ;;  %3003 = vmatpush.bf16.msrb.mxu3 %v5217_v10  ;;  %v5156_v27 = vld [vmem:[#allocation12] sm:$0xf] }
 0x444   :  { %2944 = vmatpush.bf16.msrb.mxu1 %v5225_v6  ;;  %2974 = vmatpush.bf16.msrb.mxu2 %v5213_v24 }
 0x447   :  { %2916 = vmatpush.bf16.msrb.mxu0 %v5205_v2  ;;  %3004 = vmatpush.bf16.msrb.mxu3 %v5201_v42  ;;  %v5185_v2 = vor.u32 %v5739_v5, %v5182_v53  ;;  %v5795_v5 = vld [vmem:[#allocation13 + $0xec] sm:$0xf]  ;;  %v5797_v53 = vld [vmem:[#allocation13 + $0xf4] sm:$0xf0] }
 0x448   :  { %2945 = vmatpush.bf16.msrb.mxu1 %v5209_v7 }
 0x44b   :  { %2917 = vmatpush.bf16.msrb.mxu0 %v5189_v19  ;;  %3005 = vmatpush.bf16.msrb.mxu3 %v5185_v2  ;;  %v5793_v2 = vld [vmem:[#allocation13 + $0xd4] sm:$0xf0] }
 0x44c   :  { %2946 = vmatpush.bf16.msrb.mxu1 %v5193_v31 }
 0x44f   :  { %2918 = vmatpush.bf16.msrb.mxu0 %v5173_v25 }
 0x450   :  { %2947 = vmatpush.bf16.msrb.mxu1 %v5177_v50  ;;  %v5404_v50 = vld [vmem:[#allocation13 + $0xe8] sm:$0xf] }
 0x4ae   :  { %v2360_v61 = vpop.f32.mrf.mxu0  ;;  %v2373_v63 = vpop.f32.mrf.mxu1 }
 0x4af   :  { %v2403_v32 = vadd.f32 %v2360_v61, %v6347_v57  ;;  %v2404_v22 = vadd.f32 %v2373_v63, %v6350_v1  ;;  %v5745_v57 = vld [vmem:[#allocation12 + $0x54] sm:$0xf0]  ;;  %v5734_v61 = vld [vmem:[#allocation12 + $0x4] sm:$0xf]  ;;  %v5158_v63 = vld [vmem:[#allocation12 + $0x10] sm:$0xf0] }
 0x4b0   :  { %v5197_v1 = vor.u32 %v5745_v57, %v5196_v62 }
 0x4b1   :  { %v2407_v17 = vmul.f32 0.5, %v2403_v32  ;;  %v2408_v13 = vmul.f32 0.5, %v2404_v22  ;;  %v5735_v32 = vld [vmem:[#allocation12 + $0xc] sm:$0xf]  ;;  %v5166_v22 = vld [vmem:[#allocation12 + $0x18] sm:$0xf0] }
 0x4b2   :  { %2975 = vmatpush.bf16.msrb.mxu2 %v5197_v1  ;;  %v5169_v10 = vor.u32 %v5735_v32, %v5166_v22  ;;  %v5786_v32 = vld [vmem:[#allocation13 + $0xa4] sm:$0xf]  ;;  %v5366_v22 = vld [vmem:[#allocation13 + $0xb0] sm:$0xf0] }
 0x4b3   :  { %5880 = vtanh.f32 %v2407_v17 }
 0x4b4   :  { %5882 = vtanh.f32 %v2408_v13  ;;  %3006 = vmatpush.bf16.msrb.mxu3 %v5169_v10  ;;  %v5372_v10 = vld [vmem:[#allocation13 + $0xa8] sm:$0xf] }
 0x4b5   :  { %v2386_v48 = vpop.f32.mrf.mxu2  ;;  %v2399_v34 = vpop.f32.mrf.mxu3 }
 0x4b6   :  { %v2405_v6 = vadd.f32 %v2386_v48, %v6353_v49  ;;  %v2406_v55 = vadd.f32 %v2399_v34, %v6358_v59  ;;  %v2362_v56 = vpop.f32.mrf.mxu0  ;;  %v2375_v51 = vpop.f32.mrf.mxu1  ;;  %v5157_v49 = vor.u32 %v5736_v58, %v5156_v27  ;;  %v5161_v59 = vor.u32 %v5734_v61, %v5158_v63  ;;  %2976 = vmatpush.bf16.msrb.mxu2 %v5181_v33  ;;  %v5406_v48 = vld [vmem:[#allocation13 + $0xf8] sm:$0xf0]  ;;  %v5380_v27 = vld [vmem:[#allocation13 + $0xc0] sm:$0xf]  ;;  %v5791_v33 = vld [vmem:[#allocation13 + $0xcc] sm:$0xf] }
 0x4b7   :  { %v6469_v34 = vor.u32 %v5794_v26, %v5398_v46  ;;  %v6471_v25 = vor.u32 %v5795_v5, %v5406_v48  ;;  %v5390_v58 = vld [vmem:[#allocation13 + $0xd8] sm:$0xf0]  ;;  %v5388_v61 = vld [vmem:[#allocation13 + $0xc8] sm:$0xf]  ;;  %v5779_v46 = vld [vmem:[#allocation13 + $0x6c] sm:$0xf] }
 0x4b8   :  { %v2409_v11 = vmul.f32 0.5, %v2405_v6  ;;  %5884 = vtanh.f32 %v2406_v55  ;;  %2919 = vmatpush.bf16.msrb.mxu0 %v5157_v49  ;;  %2948 = vmatpush.bf16.msrb.mxu1 %v5161_v59  ;;  %v5790_v6 = vld [vmem:[#allocation13 + $0xc4] sm:$0xf]  ;;  %v5382_v55 = vld [vmem:[#allocation13 + $0xd0] sm:$0xf0]  ;;  %v6483_v63 = vor.u32 %v5791_v33, %v5390_v58  ;;  %v6488_v49 = vor.u32 %v5788_v3, %v5364_v28 }
 0x4b9   :  { %v5881_v7 = vpop.eup %5880  ;;  %v6480_v51 = vor.u32 %v5790_v6, %v5382_v55  ;;  %v5374_v59 = vld [vmem:[#allocation13 + $0xb8] sm:$0xf0]  ;;  %v5340_v48 = vld [vmem:[#allocation13 + $0x68] sm:$0xf]  ;;  %v5776_v6 = vld [vmem:[#allocation13 + $0x4c] sm:$0xf0] }
 0x4ba   :  { %v5883_v24 = vpop.eup %5882  ;;  %v2413_v29 = vmul.f32 0.5, %v5881_v7  ;;  %5886 = vtanh.f32 %v2409_v11  ;;  %2977 = vmatpush.bf16.msrb.mxu2 %v5165_v38  ;;  %v6485_v11 = vor.u32 %v5793_v2, %v5388_v61  ;;  %v5787_v7 = vld [vmem:[#allocation13 + $0xac] sm:$0xf]  ;;  %v2707_v38 = vpack.c.bf16 %v6421_v30, %v6405_v15  ;;  %v5782_v15 = vld [vmem:[#allocation13 + $0x84] sm:$0xf] }
 0x4bb   :  { %v2414_v44 = vmul.f32 0.5, %v5883_v24  ;;  %v6492_v24 = vor.u32 %v5786_v32, %v5366_v22  ;;  %v5342_v5 = vld [vmem:[#allocation13 + $0x78] sm:$0xf0]  ;;  %v5774_v55 = vld [vmem:[#allocation13 + $0x44] sm:$0xf] }
 0x4bc   :  { %v2416_v0 = vadd.f32 0.5, %v2413_v29  ;;  %v6494_v29 = vor.u32 %v5787_v7, %v5374_v59  ;;  %v5318_v33 = vld [vmem:[#allocation13 + $0x50] sm:$0xf0]  ;;  %v5775_v61 = vld [vmem:[#allocation13 + $0x4c] sm:$0xf]  ;;  %v402_v59 = vadd.f32 %v6355_v52, %v6294_v12 }
 0x4bd   :  { %v2417_v8 = vadd.f32 0.5, %v2414_v44  ;;  %v2388_v18 = vpop.f32.mrf.mxu2  ;;  %v2401_v17 = vpop.f32.mrf.mxu3  ;;  %v2708_v44 = vpack.c.bf16 %v6449_v47, %v6433_v41  ;;  %v5356_v47 = vld [vmem:[#allocation13 + $0x88] sm:$0xf]  ;;  %v5326_v2 = vld [vmem:[#allocation13 + $0x58] sm:$0xf0]  ;;  %v6532_v3 = vor.u32 %v5774_v55, %v5318_v33 }
 0x4be   :  { %v5885_v13 = vpop.eup %5884  ;;  %v5348_v18 = vld [vmem:[#allocation13 + $0x80] sm:$0xf]  ;;  %v5784_v17 = vld [vmem:[#allocation13 + $0x8c] sm:$0xf0]  ;;  %v5324_v28 = vld [vmem:[#allocation13 + $0x48] sm:$0xf]  ;;  %v6534_v32 = vor.u32 %v5775_v61, %v5326_v2 }
 0x4bf   :  { %v2420_v19 = vmul.f32 %v2417_v8, %v6446_v43  ;;  %v2421_v31 = vmul.f32 %v5885_v13, %v2416_v0  ;;  %v2706_v43 = vpack.c.bf16 %v6393_v54, %v6377_v40  ;;  %v6474_v40 = vor.u32 %v5797_v53, %v5404_v50  ;;  %v5792_v54 = vld [vmem:[#allocation13 + $0xcc] sm:$0xf0]  ;;  %v5789_v0 = vld [vmem:[#allocation13 + $0xb4] sm:$0xf0]  ;;  %v5350_v13 = vld [vmem:[#allocation13 + $0x90] sm:$0xf0] }
 0x4c0   :  { %v5887_v62 = vpop.eup %5886  ;;  %v6478_v56 = vor.u32 %v5792_v54, %v5380_v27  ;;  %v6504_v8 = vor.u32 %v5789_v0, %v5372_v10  ;;  %v6507_v30 = vor.u32 %v5784_v17, %v5348_v18  ;;  %v6523_v50 = vor.u32 %v5779_v46, %v5342_v5  ;;  %v5781_v53 = vld [vmem:[#allocation13 + $0x74] sm:$0xf0]  ;;  %v5316_v27 = vld [vmem:[#allocation13 + $0x40] sm:$0xf]  ;;  %v5302_v12 = vld [vmem:[#allocation13 + $0x30] sm:$0xf0] }
 0x4c1   :  { %v6458_v57 = vadd.f32 %v2421_v31, %v2420_v19  ;;  %v2415_v1 = vmul.f32 0.5, %v5887_v62  ;;  %v5783_v19 = vld [vmem:[#allocation13 + $0x8c] sm:$0xf]  ;;  %v5358_v31 = vld [vmem:[#allocation13 + $0x98] sm:$0xf0]  ;;  %v6509_v62 = vor.u32 %v5782_v15, %v5350_v13  ;;  %v6525_v54 = vor.u32 %v5781_v53, %v5340_v48 }
 0x4c2   :  { %v6511_v41 = vor.u32 %v5783_v19, %v5358_v31  ;;  %v6528_v58 = vor.u32 %v5776_v6, %v5316_v27  ;;  %v5777_v22 = vld [vmem:[#allocation13 + $0x54] sm:$0xf0]  ;;  %v5300_v17 = vld [vmem:[#allocation13 + $0x20] sm:$0xf]  ;;  %v5772_v15 = vld [vmem:[#allocation13 + $0x2c] sm:$0xf0]  ;;  %v489_v46 = vadd.f32 %v6368_v39, %v6310_v21 }
 0x4c3   :  { %5888 = vtanh.f32 %v6458_v57  ;;  %v2418_v16 = vadd.f32 0.5, %v2415_v1  ;;  %v5785_v1 = vld [vmem:[#allocation13 + $0x94] sm:$0xf0]  ;;  %v6537_v7 = vor.u32 %v5777_v22, %v5324_v28  ;;  %v5770_v13 = vld [vmem:[#allocation13 + $0x24] sm:$0xf]  ;;  %v6547_v19 = vor.u32 %v5772_v15, %v5300_v17 }
 0x4c4   :  { %v5771_v52 = vld [vmem:[#allocation13 + $0x2c] sm:$0xf]  ;;  %v5284_v33 = vld [vmem:[#allocation13] sm:$0xf]  ;;  %v5768_v61 = vld [vmem:[#allocation13 + $0xc] sm:$0xf0] }
 0x4c5   :  { %v5766_v2 = vld [vmem:[#allocation13 + $0x4] sm:$0xf]  ;;  %v6563_v28 = vor.u32 %v5768_v61, %v5284_v33  ;;  %v5286_v22 = vld [vmem:[#allocation13 + $0x10] sm:$0xf0] }
 0x4c6   :  { %v6565_v21 = vor.u32 %v5766_v2, %v5286_v22 }
 0x4c9   :  { %v5889_v35 = vpop.eup %5888 }
 0x4ca   :  { %v6461_v37 = vmul.f32 %v5889_v35, %v2418_v16  ;;  %v5332_v16 = vld [vmem:[#allocation13 + $0x60] sm:$0xf]  ;;  %v6514_v35 = vor.u32 %v5785_v1, %v5356_v47  ;;  %v6549_v47 = vor.u32 %v5770_v13, %v5302_v12 }
 0x4cc   :  { %v2430_v42 = vpack.c.bf16 %v6461_v37, %v6461_v37 }
 0x4ce   :  { %2631 = vmatmul.bf16.vlgmr.msra.gmra.mxu0 %v2430_v42  ;;  %2644 = vmatmul.bf16.vlgmr.msra.gmra.mxu1 %v2430_v42 }
 0x4cf   :  { %2657 = vmatmul.bf16.vlgmr.msra.gmra.mxu2 %v2430_v42  ;;  %2670 = vmatmul.bf16.vlgmr.msra.gmra.mxu3 %v2430_v42  ;;  %v5780_v42 = vld [vmem:[#allocation13 + $0x6c] sm:$0xf0] }
 0x4d0   :  { %3256 = vmatpush.bf16.msra.mxu0 %v6467_v45  ;;  %3269 = vmatpush.bf16.msra.mxu1 %v6469_v34  ;;  %v6518_v9 = vor.u32 %v5780_v42, %v5332_v16  ;;  %v5308_v16 = vld [vmem:[#allocation13 + $0x28] sm:$0xf]  ;;  %v5773_v42 = vld [vmem:[#allocation13 + $0x34] sm:$0xf0] }
 0x4d1   :  { %3295 = vmatpush.bf16.msra.mxu3 %v6471_v25  ;;  %3282 = vmatpush.bf16.msra.mxu2 %v6474_v40 }
 0x4d4   :  { %3257 = vmatpush.bf16.msra.mxu0 %v6478_v56  ;;  %3270 = vmatpush.bf16.msra.mxu1 %v6480_v51 }
 0x4d5   :  { %3296 = vmatpush.bf16.msra.mxu3 %v6483_v63  ;;  %3283 = vmatpush.bf16.msra.mxu2 %v6485_v11 }
 0x4d8   :  { %3258 = vmatpush.bf16.msra.mxu0 %v6488_v49  ;;  %3271 = vmatpush.bf16.msra.mxu1 %v6492_v24 }
 0x4d9   :  { %3297 = vmatpush.bf16.msra.mxu3 %v6494_v29  ;;  %3284 = vmatpush.bf16.msra.mxu2 %v6504_v8 }
 0x4dc   :  { %3259 = vmatpush.bf16.msra.mxu0 %v6507_v30  ;;  %3272 = vmatpush.bf16.msra.mxu1 %v6509_v62 }
 0x4dd   :  { %3298 = vmatpush.bf16.msra.mxu3 %v6511_v41  ;;  %3285 = vmatpush.bf16.msra.mxu2 %v6514_v35 }
 0x4de   :  { %2920 = vmatmul.bf16.vlgmr.msrb.gmra.mxu0 %v2706_v43  ;;  %2949 = vmatmul.bf16.vlgmr.msrb.gmra.mxu1 %v2706_v43 }
 0x4df   :  { %2978 = vmatmul.bf16.vlgmr.msrb.gmra.mxu2 %v2706_v43  ;;  %3007 = vmatmul.bf16.vlgmr.msrb.gmra.mxu3 %v2706_v43  ;;  %v5778_v43 = vld [vmem:[#allocation13 + $0x64] sm:$0xf] }
 0x4e0   :  { %v6520_v26 = vor.u32 %v5778_v43, %v5334_v23  ;;  %3260 = vmatpush.bf16.msra.mxu0 %v6518_v9  ;;  %v6554_v43 = vor.u32 %v5773_v42, %v5308_v16  ;;  %v460_v23 = vadd.f32 %v6364_v36, %v6308_v20  ;;  %v5294_v20 = vld [vmem:[#allocation13 + $0x18] sm:$0xf0] }
 0x4e1   :  { %3299 = vmatpush.bf16.msra.mxu3 %v6523_v50  ;;  %3286 = vmatpush.bf16.msra.mxu2 %v6525_v54 }
 0x4e2   :  { %3273 = vmatpush.bf16.msra.mxu1 %v6520_v26 }
 0x4e4   :  { %3261 = vmatpush.bf16.msra.mxu0 %v6528_v58 }
 0x4e5   :  { %3300 = vmatpush.bf16.msra.mxu3 %v6534_v32  ;;  %3287 = vmatpush.bf16.msra.mxu2 %v6537_v7 }
 0x4e6   :  { %3274 = vmatpush.bf16.msra.mxu1 %v6532_v3 }
 0x4e8   :  { %3262 = vmatpush.bf16.msra.mxu0 %v6547_v19 }
 0x4e9   :  { %3288 = vmatpush.bf16.msra.mxu2 %v6554_v43 }
 0x4ea   :  { %3275 = vmatpush.bf16.msra.mxu1 %v6549_v47 }
 0x4ec   :  { %3263 = vmatpush.bf16.msra.mxu0 %v6563_v28 }
 0x4ee   :  { %2925 = vmatmul.bf16.gmra.mxu0 %v2707_v38  ;;  %2954 = vmatmul.bf16.gmra.mxu1 %v2707_v38 }
 0x4ef   :  { %2983 = vmatmul.bf16.gmra.mxu2 %v2707_v38  ;;  %3012 = vmatmul.bf16.gmra.mxu3 %v2707_v38  ;;  %v431_v38 = vadd.f32 %v6360_v60, %v6298_v14  ;;  %v5310_v14 = vld [vmem:[#allocation13 + $0x38] sm:$0xf0] }
 0x4f0   :  { %v6551_v1 = vor.u32 %v5771_v52, %v5310_v14  ;;  %3276 = vmatpush.bf16.msra.mxu1 %v6565_v21  ;;  %3335 = vmatpush.bf16.msrb.mxu0 %v6467_v45 }
 0x4f2   :  { %3301 = vmatpush.bf16.msra.mxu3 %v6551_v1 }
 0x4f4   :  { %3348 = vmatpush.bf16.msrb.mxu1 %v6469_v34  ;;  %3336 = vmatpush.bf16.msrb.mxu0 %v6478_v56 }
 0x4f8   :  { %3349 = vmatpush.bf16.msrb.mxu1 %v6480_v51  ;;  %3337 = vmatpush.bf16.msrb.mxu0 %v6488_v49 }
 0x4fc   :  { %3350 = vmatpush.bf16.msrb.mxu1 %v6492_v24  ;;  %3338 = vmatpush.bf16.msrb.mxu0 %v6507_v30 }
 0x4fe   :  { %2930 = vmatmul.bf16.gmra.mxu0 %v2708_v44  ;;  %2959 = vmatmul.bf16.gmra.mxu1 %v2708_v44 }
 0x4ff   :  { %2988 = vmatmul.bf16.gmra.mxu2 %v2708_v44  ;;  %3017 = vmatmul.bf16.gmra.mxu3 %v2708_v44 }
 0x500   :  { %3351 = vmatpush.bf16.msrb.mxu1 %v6509_v62  ;;  %3339 = vmatpush.bf16.msrb.mxu0 %v6518_v9 }
 0x504   :  { %3352 = vmatpush.bf16.msrb.mxu1 %v6520_v26  ;;  %3340 = vmatpush.bf16.msrb.mxu0 %v6528_v58 }
 0x508   :  { %3353 = vmatpush.bf16.msrb.mxu1 %v6532_v3  ;;  %3341 = vmatpush.bf16.msrb.mxu0 %v6547_v19 }
 0x50c   :  { %3354 = vmatpush.bf16.msrb.mxu1 %v6549_v47  ;;  %3342 = vmatpush.bf16.msrb.mxu0 %v6563_v28 }
 0x510   :  { %3355 = vmatpush.bf16.msrb.mxu1 %v6565_v21 }
 0x54b   :  { %v2632_v44 = vpop.f32.mrf.mxu0  ;;  %v2645_v10 = vpop.f32.mrf.mxu1 }
 0x54c   :  { %v2675_v0 = vadd.f32 %v2632_v44, %v402_v59  ;;  %v2676_v18 = vadd.f32 %v2645_v10, %v431_v38  ;;  %v5767_v59 = vld [vmem:[#allocation13 + $0xc] sm:$0xf]  ;;  %v5292_v38 = vld [vmem:[#allocation13 + $0x8] sm:$0xf]  ;;  %v5769_v44 = vld [vmem:[#allocation13 + $0x14] sm:$0xf0] }
 0x54d   :  { %v6567_v39 = vor.u32 %v5767_v59, %v5294_v20 }
 0x54e   :  { %v2679_v60 = vmul.f32 0.5, %v2675_v0  ;;  %v2680_v31 = vmul.f32 0.5, %v2676_v18  ;;  %v6570_v0 = vor.u32 %v5769_v44, %v5292_v38 }
 0x54f   :  { %3302 = vmatpush.bf16.msra.mxu3 %v6567_v39 }
 0x550   :  { %5890 = vtanh.f32 %v2679_v60  ;;  %3289 = vmatpush.bf16.msra.mxu2 %v6570_v0 }
 0x551   :  { %5892 = vtanh.f32 %v2680_v31 }
 0x552   :  { %v2658_v5 = vpop.f32.mrf.mxu2  ;;  %v2671_v48 = vpop.f32.mrf.mxu3 }
 0x553   :  { %v2677_v53 = vadd.f32 %v2658_v5, %v460_v23  ;;  %v2678_v27 = vadd.f32 %v2671_v48, %v489_v46  ;;  %v2634_v6 = vpop.f32.mrf.mxu0  ;;  %v2647_v55 = vpop.f32.mrf.mxu1  ;;  %3374 = vmatpush.bf16.msrb.mxu3 %v6471_v25 }
 0x554   :  { %3361 = vmatpush.bf16.msrb.mxu2 %v6474_v40 }
 0x555   :  { %v2681_v36 = vmul.f32 0.5, %v2677_v53  ;;  %5894 = vtanh.f32 %v2678_v27 }
 0x556   :  { %v5891_v10 = vpop.eup %5890 }
 0x557   :  { %v5893_v18 = vpop.eup %5892  ;;  %v2685_v17 = vmul.f32 0.5, %v5891_v10  ;;  %5896 = vtanh.f32 %v2681_v36  ;;  %3375 = vmatpush.bf16.msrb.mxu3 %v6483_v63 }
 0x558   :  { %v2686_v15 = vmul.f32 0.5, %v5893_v18  ;;  %3362 = vmatpush.bf16.msrb.mxu2 %v6485_v11 }
 0x559   :  { %v2688_v13 = vadd.f32 0.5, %v2685_v17 }
 0x55a   :  { %v2689_v12 = vadd.f32 0.5, %v2686_v15  ;;  %v2660_v52 = vpop.f32.mrf.mxu2  ;;  %v2673_v14 = vpop.f32.mrf.mxu3 }
 0x55b   :  { %v5895_v60 = vpop.eup %5894  ;;  %3376 = vmatpush.bf16.msrb.mxu3 %v6494_v29 }
 0x55c   :  { %v2692_v31 = vmul.f32 %v2689_v12, %v6458_v57  ;;  %v2693_v16 = vmul.f32 %v5895_v60, %v2688_v13  ;;  %3363 = vmatpush.bf16.msrb.mxu2 %v6504_v8 }
 0x55d   :  { %v5897_v42 = vpop.eup %5896 }
 0x55e   :  { %v2694_v23 = vadd.f32 %v2693_v16, %v2692_v31  ;;  %v2687_v46 = vmul.f32 0.5, %v5897_v42 }
 0x55f   :  { %3377 = vmatpush.bf16.msrb.mxu3 %v6511_v41 }
 0x560   :  { %5898 = vtanh.f32 %v2694_v23  ;;  %v2690_v57 = vadd.f32 0.5, %v2687_v46  ;;  %3364 = vmatpush.bf16.msrb.mxu2 %v6514_v35 }
 0x562   :  { %v2979_v27 = vpop.f32.mrf.mxu2  ;;  %v3008_v6 = vpop.f32.mrf.mxu3 }
 0x563   :  { %3378 = vmatpush.bf16.msrb.mxu3 %v6523_v50 }
 0x564   :  { %3365 = vmatpush.bf16.msrb.mxu2 %v6525_v54 }
 0x566   :  { %v5899_v5 = vpop.eup %5898 }
 0x567   :  { %v2696_v48 = vmul.f32 %v5899_v5, %v2690_v57  ;;  %3379 = vmatpush.bf16.msrb.mxu3 %v6534_v32  ;;  %v2742_v57 = vld [vmem:[%s6964_s6] sm:$0xf] }
 0x568   :  { %3366 = vmatpush.bf16.msrb.mxu2 %v6537_v7 }
 0x569   :  { %v2709_v53 = vpack.c.bf16 %v2696_v48, %v6461_v37  ;;  %v2950_v37 = vpop.f32.mrf.mxu1 }
 0x56a   :  { %v6649_v61 = vpop.f32.mrf.mxu2  ;;  %v6651_v2 = vpop.f32.mrf.mxu3 }
 0x56b   :  { %2935 = vmatmul.bf16.gmra.mxu0 %v2709_v53  ;;  %2964 = vmatmul.bf16.gmra.mxu1 %v2709_v53 }
 0x56c   :  { %2993 = vmatmul.bf16.gmra.mxu2 %v2709_v53  ;;  %3022 = vmatmul.bf16.gmra.mxu3 %v2709_v53  ;;  %v6700_v53 = vperm.slane %v2742_v57, 0 }
 0x56d   :  { %3367 = vmatpush.bf16.msrb.mxu2 %v6554_v43  ;;  %3380 = vmatpush.bf16.msrb.mxu3 %v6551_v1 }
 0x571   :  { %3368 = vmatpush.bf16.msrb.mxu2 %v6570_v0  ;;  %3381 = vmatpush.bf16.msrb.mxu3 %v6567_v39  ;;  %v6647_v33 = vpop.f32.mrf.mxu1 }
 0x572   :  { %v6657_v20 = vpop.f32.mrf.mxu2  ;;  %v6659_v36 = vpop.f32.mrf.mxu3 }
 0x573   :  { %6968 = vst [vmem:[#allocation22_spill] sm:$0xff] %v6657_v20 }
 0x574   :  { %6969 = vst [vmem:[#allocation23_spill] sm:$0xff] %v6659_v36 }
 0x579   :  { %v6655_v59 = vpop.f32.mrf.mxu1 }
 0x57a   :  { %v6665_v10 = vpop.f32.mrf.mxu2  ;;  %v6667_v18 = vpop.f32.mrf.mxu3 }
 0x57b   :  { %3264 = vmatmul.bf16.vlgmr.msra.gmra.mxu0 %v6193_v4  ;;  %3277 = vmatmul.bf16.vlgmr.msra.gmra.mxu1 %v6193_v4  ;;  %6972 = vst [vmem:[#allocation26_spill] sm:$0xff] %v6665_v10 }
 0x57c   :  { %3290 = vmatmul.bf16.vlgmr.msra.gmra.mxu2 %v6193_v4  ;;  %3303 = vmatmul.bf16.vlgmr.msra.gmra.mxu3 %v6193_v4  ;;  %v2921_v4 = vpop.f32.mrf.mxu0  ;;  %6973 = vst [vmem:[#allocation27_spill] sm:$0xff] %v6667_v18 }
 0x57d   :  { %3414 = vmatpush.bf16.msra.mxu0 %v6467_v45  ;;  %3427 = vmatpush.bf16.msra.mxu1 %v6469_v34 }
 0x57e   :  { %3440 = vmatpush.bf16.msra.mxu2 %v6474_v40  ;;  %3453 = vmatpush.bf16.msra.mxu3 %v6471_v25 }
 0x581   :  { %3415 = vmatpush.bf16.msra.mxu0 %v6478_v56  ;;  %3428 = vmatpush.bf16.msra.mxu1 %v6480_v51  ;;  %v6663_v44 = vpop.f32.mrf.mxu1 }
 0x582   :  { %3441 = vmatpush.bf16.msra.mxu2 %v6485_v11  ;;  %3454 = vmatpush.bf16.msra.mxu3 %v6483_v63  ;;  %6971 = vst [vmem:[#allocation25_spill] sm:$0xff] %v6663_v44  ;;  %v6673_v13 = vpop.f32.mrf.mxu2  ;;  %v6675_v12 = vpop.f32.mrf.mxu3 }
 0x583   :  { %6976 = vst [vmem:[#allocation30_spill] sm:$0xff] %v6673_v13  ;;  %v6710_v13 = vperm.slane %v2742_v57, 2 }
 0x584   :  { %v6645_v55 = vpop.f32.mrf.mxu0  ;;  %6977 = vst [vmem:[#allocation31_spill] sm:$0xff] %v6675_v12 }
 0x585   :  { %3416 = vmatpush.bf16.msra.mxu0 %v6488_v49  ;;  %3429 = vmatpush.bf16.msra.mxu1 %v6492_v24 }
 0x586   :  { %3442 = vmatpush.bf16.msra.mxu2 %v6504_v8  ;;  %3455 = vmatpush.bf16.msra.mxu3 %v6494_v29 }
 0x589   :  { %3417 = vmatpush.bf16.msra.mxu0 %v6507_v30  ;;  %3430 = vmatpush.bf16.msra.mxu1 %v6509_v62  ;;  %v6671_v15 = vpop.f32.mrf.mxu1 }
 0x58a   :  { %3443 = vmatpush.bf16.msra.mxu2 %v6514_v35  ;;  %3456 = vmatpush.bf16.msra.mxu3 %v6511_v41  ;;  %6975 = vst [vmem:[#allocation29_spill] sm:$0xff] %v6671_v15  ;;  %v6681_v60 = vpop.f32.mrf.mxu2  ;;  %v6683_v31 = vpop.f32.mrf.mxu3 }
 0x58b   :  { %6980 = vst [vmem:[#allocation34_spill] sm:$0xff] %v6681_v60  ;;  %v6702_v60 = vperm.slane %v2742_v57, 1 }
 0x58c   :  { %v6653_v22 = vpop.f32.mrf.mxu0  ;;  %6981 = vst [vmem:[#allocation35_spill] sm:$0xff] %v6683_v31 }
 0x58d   :  { %3418 = vmatpush.bf16.msra.mxu0 %v6518_v9  ;;  %3431 = vmatpush.bf16.msra.mxu1 %v6520_v26 }
 0x58e   :  { %3444 = vmatpush.bf16.msra.mxu2 %v6525_v54  ;;  %3457 = vmatpush.bf16.msra.mxu3 %v6523_v50 }
 0x591   :  { %3419 = vmatpush.bf16.msra.mxu0 %v6528_v58  ;;  %3432 = vmatpush.bf16.msra.mxu1 %v6532_v3  ;;  %v6679_v14 = vpop.f32.mrf.mxu1 }
 0x592   :  { %3445 = vmatpush.bf16.msra.mxu2 %v6537_v7  ;;  %3458 = vmatpush.bf16.msra.mxu3 %v6534_v32  ;;  %6979 = vst [vmem:[#allocation33_spill] sm:$0xff] %v6679_v14 }
 0x594   :  { %v6661_v38 = vpop.f32.mrf.mxu0 }
 0x595   :  { %3420 = vmatpush.bf16.msra.mxu0 %v6547_v19  ;;  %3433 = vmatpush.bf16.msra.mxu1 %v6549_v47  ;;  %6970 = vst [vmem:[#allocation24_spill] sm:$0xff] %v6661_v38 }
 0x596   :  { %3446 = vmatpush.bf16.msra.mxu2 %v6554_v43  ;;  %3459 = vmatpush.bf16.msra.mxu3 %v6551_v1 }
 0x599   :  { %3421 = vmatpush.bf16.msra.mxu0 %v6563_v28  ;;  %3434 = vmatpush.bf16.msra.mxu1 %v6565_v21 }
 0x59a   :  { %3447 = vmatpush.bf16.msra.mxu2 %v6570_v0  ;;  %3460 = vmatpush.bf16.msra.mxu3 %v6567_v39 }
 0x59c   :  { %v6669_v17 = vpop.f32.mrf.mxu0 }
 0x59d   :  { %6974 = vst [vmem:[#allocation28_spill] sm:$0xff] %v6669_v17  ;;  %v2980_v17 = vadd.f32 %v2979_v27, %v6710_v13 }
 0x5a4   :  { %v6677_v52 = vpop.f32.mrf.mxu0 }
 0x5a5   :  { %6978 = vst [vmem:[#allocation32_spill] sm:$0xff] %v6677_v52 }
 0x5e8   :  { %v6685_v16 = vpop.f32.mrf.mxu0  ;;  %v6687_v42 = vpop.f32.mrf.mxu1 }
 0x5e9   :  { %6982 = vst [vmem:[#allocation36_spill] sm:$0xff] %v6685_v16  ;;  %v2922_v16 = vadd.f32 %v2921_v4, %v6700_v53 }
 0x5ea   :  { %6983 = vst [vmem:[#allocation37_spill] sm:$0xff] %v6687_v42  ;;  %v2951_v42 = vadd.f32 %v2950_v37, %v6702_v60 }
 0x5ef   :  { %v6689_v23 = vpop.f32.mrf.mxu2  ;;  %v6691_v46 = vpop.f32.mrf.mxu3 }
 0x5f0   :  { %6984 = vst [vmem:[#allocation38_spill] sm:$0xff] %v6689_v23  ;;  %v6696_v5 = vpop.f32.mrf.mxu0  ;;  %v6698_v48 = vpop.f32.mrf.mxu1 }
 0x5f1   :  { %6985 = vst [vmem:[#allocation39_spill] sm:$0xff] %v6691_v46 }
 0x5f2   :  { %6986 = vst [vmem:[#allocation40_spill] sm:$0xff] %v6696_v5  ;;  %v6712_v5 = vperm.slane %v2742_v57, 3 }
 0x5f3   :  { %6987 = vst [vmem:[#allocation41_spill] sm:$0xff] %v6698_v48 }
 0x5f4   :  { %v3009_v4 = vadd.f32 %v3008_v6, %v6712_v5 }
 0x5f7   :  { %v6706_v31 = vpop.f32.mrf.mxu2  ;;  %v6708_v23 = vpop.f32.mrf.mxu3 }
 0x5f8   :  { %6988 = vst [vmem:[#allocation42_spill] sm:$0xff] %v6706_v31  ;;  %v3265_v46 = vpop.f32.mrf.mxu0  ;;  %v3278_v14 = vpop.f32.mrf.mxu1 }
 0x5f9   :  { %6989 = vst [vmem:[#allocation43_spill] sm:$0xff] %v6708_v23  ;;  %v3308_v52 = vadd.f32 %v3265_v46, %v2922_v16  ;;  %v3309_v12 = vadd.f32 %v3278_v14, %v2951_v42 }
 0x5fb   :  { %v3312_v48 = vmul.f32 0.5, %v3308_v52  ;;  %v3313_v15 = vmul.f32 0.5, %v3309_v12 }
 0x5fd   :  { %5900 = vtanh.f32 %v3312_v48 }
 0x5fe   :  { %5902 = vtanh.f32 %v3313_v15 }
 0x5ff   :  { %v3291_v37 = vpop.f32.mrf.mxu2  ;;  %v3304_v31 = vpop.f32.mrf.mxu3 }
 0x600   :  { %v3310_v18 = vadd.f32 %v3291_v37, %v2980_v17  ;;  %v3311_v23 = vadd.f32 %v3304_v31, %v3009_v4  ;;  %v3267_v10 = vpop.f32.mrf.mxu0  ;;  %v3280_v44 = vpop.f32.mrf.mxu1 }
 0x602   :  { %v3314_v16 = vmul.f32 0.5, %v3310_v18  ;;  %5904 = vtanh.f32 %v3311_v23 }
 0x603   :  { %v5901_v14 = vpop.eup %5900 }
 0x604   :  { %v5903_v42 = vpop.eup %5902  ;;  %v3318_v46 = vmul.f32 0.5, %v5901_v14  ;;  %5906 = vtanh.f32 %v3314_v16 }
 0x605   :  { %v3319_v57 = vmul.f32 0.5, %v5903_v42 }
 0x606   :  { %v3321_v12 = vadd.f32 0.5, %v3318_v46  ;;  %v2982_v46 = vadd.f32 %v6649_v61, %v6710_v13 }
 0x607   :  { %v3322_v52 = vadd.f32 0.5, %v3319_v57  ;;  %v3293_v48 = vpop.f32.mrf.mxu2  ;;  %v3306_v27 = vpop.f32.mrf.mxu3  ;;  %v3011_v57 = vadd.f32 %v6651_v2, %v6712_v5 }
 0x608   :  { %v5905_v38 = vpop.eup %5904 }
 0x609   :  { %v3325_v6 = vmul.f32 0.0, %v3322_v52  ;;  %v3326_v15 = vmul.f32 %v5905_v38, %v3321_v12  ;;  %v2953_v38 = vadd.f32 %v6647_v33, %v6702_v60 }
 0x60a   :  { %v5907_v36 = vpop.eup %5906 }
 0x60b   :  { %v6716_v20 = vadd.f32 %v3326_v15, %v3325_v6  ;;  %v3320_v44 = vmul.f32 0.5, %v5907_v36  ;;  %v2924_v36 = vadd.f32 %v6645_v55, %v6700_v53 }
 0x60d   :  { %5908 = vtanh.f32 %v6716_v20  ;;  %v3323_v10 = vadd.f32 0.5, %v3320_v44 }
 0x613   :  { %v5909_v18 = vpop.eup %5908 }
 0x614   :  { %v3329_v17 = vmul.f32 %v5909_v18, %v3323_v10 }
 0x616   :  { %v3334_v31 = vpack.c.bf16 %v3329_v17, %v3329_v17 }
 0x618   :  { %3343 = vmatmul.bf16.vlgmr.msrb.gmra.mxu0 %v3334_v31  ;;  %3356 = vmatmul.bf16.vlgmr.msrb.gmra.mxu1 %v3334_v31 }
 0x619   :  { %3369 = vmatmul.bf16.vlgmr.msrb.gmra.mxu2 %v3334_v31  ;;  %3382 = vmatmul.bf16.vlgmr.msrb.gmra.mxu3 %v3334_v31 }
 0x61a   :  { %3493 = vmatpush.bf16.msrb.mxu0 %v6467_v45  ;;  %3506 = vmatpush.bf16.msrb.mxu1 %v6469_v34 }
 0x61b   :  { %3519 = vmatpush.bf16.msrb.mxu2 %v6474_v40  ;;  %3532 = vmatpush.bf16.msrb.mxu3 %v6471_v25 }
 0x61e   :  { %3494 = vmatpush.bf16.msrb.mxu0 %v6478_v56  ;;  %3507 = vmatpush.bf16.msrb.mxu1 %v6480_v51 }
 0x61f   :  { %3520 = vmatpush.bf16.msrb.mxu2 %v6485_v11  ;;  %3533 = vmatpush.bf16.msrb.mxu3 %v6483_v63 }
 0x622   :  { %3495 = vmatpush.bf16.msrb.mxu0 %v6488_v49  ;;  %3508 = vmatpush.bf16.msrb.mxu1 %v6492_v24 }
 0x623   :  { %3521 = vmatpush.bf16.msrb.mxu2 %v6504_v8  ;;  %3534 = vmatpush.bf16.msrb.mxu3 %v6494_v29 }
 0x626   :  { %3496 = vmatpush.bf16.msrb.mxu0 %v6507_v30  ;;  %3509 = vmatpush.bf16.msrb.mxu1 %v6509_v62 }
 0x627   :  { %3522 = vmatpush.bf16.msrb.mxu2 %v6514_v35  ;;  %3535 = vmatpush.bf16.msrb.mxu3 %v6511_v41 }
 0x62a   :  { %3497 = vmatpush.bf16.msrb.mxu0 %v6518_v9  ;;  %3510 = vmatpush.bf16.msrb.mxu1 %v6520_v26 }
 0x62b   :  { %3523 = vmatpush.bf16.msrb.mxu2 %v6525_v54  ;;  %3536 = vmatpush.bf16.msrb.mxu3 %v6523_v50 }
 0x62e   :  { %3498 = vmatpush.bf16.msrb.mxu0 %v6528_v58  ;;  %3511 = vmatpush.bf16.msrb.mxu1 %v6532_v3 }
 0x62f   :  { %3524 = vmatpush.bf16.msrb.mxu2 %v6537_v7  ;;  %3537 = vmatpush.bf16.msrb.mxu3 %v6534_v32 }
 0x632   :  { %3499 = vmatpush.bf16.msrb.mxu0 %v6547_v19  ;;  %3512 = vmatpush.bf16.msrb.mxu1 %v6549_v47 }
 0x633   :  { %3525 = vmatpush.bf16.msrb.mxu2 %v6554_v43  ;;  %3538 = vmatpush.bf16.msrb.mxu3 %v6551_v1 }
 0x636   :  { %3500 = vmatpush.bf16.msrb.mxu0 %v6563_v28  ;;  %3513 = vmatpush.bf16.msrb.mxu1 %v6565_v21 }
 0x637   :  { %3526 = vmatpush.bf16.msrb.mxu2 %v6570_v0  ;;  %3539 = vmatpush.bf16.msrb.mxu3 %v6567_v39 }
 0x695   :  { %v3344_v23 = vpop.f32.mrf.mxu0  ;;  %v3357_v4 = vpop.f32.mrf.mxu1 }
 0x696   :  { %v3387_v37 = vadd.f32 %v3344_v23, %v2924_v36  ;;  %v3388_v16 = vadd.f32 %v3357_v4, %v2953_v38 }
 0x698   :  { %v3391_v14 = vmul.f32 0.5, %v3387_v37  ;;  %v3392_v42 = vmul.f32 0.5, %v3388_v16 }
 0x69a   :  { %5910 = vtanh.f32 %v3391_v14 }
 0x69b   :  { %5912 = vtanh.f32 %v3392_v42 }
 0x69c   :  { %v3370_v12 = vpop.f32.mrf.mxu2  ;;  %v3383_v52 = vpop.f32.mrf.mxu3 }
 0x69d   :  { %v3389_v55 = vadd.f32 %v3370_v12, %v2982_v46  ;;  %v3390_v48 = vadd.f32 %v3383_v52, %v3011_v57  ;;  %v3346_v27 = vpop.f32.mrf.mxu0  ;;  %v3359_v33 = vpop.f32.mrf.mxu1  ;;  %v2956_v12 = vadd.f32 %v6655_v59, %v6702_v60 }
 0x69f   :  { %v3393_v6 = vmul.f32 0.5, %v3389_v55  ;;  %5914 = vtanh.f32 %v3390_v48 }
 0x6a0   :  { %v5911_v15 = vpop.eup %5910 }
 0x6a1   :  { %v5913_v44 = vpop.eup %5912  ;;  %v3397_v10 = vmul.f32 0.5, %v5911_v15  ;;  %5916 = vtanh.f32 %v3393_v6  ;;  %v6990_v15 = vld [vmem:[#allocation22_spill] sm:$0xff] }
 0x6a2   :  { %v3398_v18 = vmul.f32 0.5, %v5913_v44  ;;  %v2985_v44 = vadd.f32 %v6990_v15, %v6710_v13 }
 0x6a3   :  { %v3400_v17 = vadd.f32 0.5, %v3397_v10  ;;  %v6991_v10 = vld [vmem:[#allocation23_spill] sm:$0xff] }
 0x6a4   :  { %v3401_v31 = vadd.f32 0.5, %v3398_v18  ;;  %v3372_v61 = vpop.f32.mrf.mxu2  ;;  %v3385_v36 = vpop.f32.mrf.mxu3  ;;  %v3014_v18 = vadd.f32 %v6991_v10, %v6712_v5 }
 0x6a5   :  { %v5915_v38 = vpop.eup %5914 }
 0x6a6   :  { %v3404_v2 = vmul.f32 %v3401_v31, %v6716_v20  ;;  %v3405_v23 = vmul.f32 %v5915_v38, %v3400_v17  ;;  %v2927_v20 = vadd.f32 %v6653_v22, %v6700_v53 }
 0x6a7   :  { %v5917_v4 = vpop.eup %5916 }
 0x6a8   :  { %v6760_v37 = vadd.f32 %v3405_v23, %v3404_v2  ;;  %v3399_v16 = vmul.f32 0.5, %v5917_v4 }
 0x6aa   :  { %5918 = vtanh.f32 %v6760_v37  ;;  %v3402_v14 = vadd.f32 0.5, %v3399_v16 }
 0x6b0   :  { %v5919_v42 = vpop.eup %5918 }
 0x6b1   :  { %v3408_v46 = vmul.f32 %v5919_v42, %v3402_v14 }
 0x6b3   :  { %v3413_v57 = vpack.c.bf16 %v3408_v46, %v3408_v46 }
 0x6b5   :  { %3422 = vmatmul.bf16.vlgmr.msra.gmra.mxu0 %v3413_v57  ;;  %3435 = vmatmul.bf16.vlgmr.msra.gmra.mxu1 %v3413_v57 }
 0x6b6   :  { %3448 = vmatmul.bf16.vlgmr.msra.gmra.mxu2 %v3413_v57  ;;  %3461 = vmatmul.bf16.vlgmr.msra.gmra.mxu3 %v3413_v57 }
 0x6b7   :  { %3572 = vmatpush.bf16.msra.mxu0 %v6467_v45  ;;  %3585 = vmatpush.bf16.msra.mxu1 %v6469_v34 }
 0x6b8   :  { %3598 = vmatpush.bf16.msra.mxu2 %v6474_v40  ;;  %3611 = vmatpush.bf16.msra.mxu3 %v6471_v25 }
 0x6bb   :  { %3573 = vmatpush.bf16.msra.mxu0 %v6478_v56  ;;  %3586 = vmatpush.bf16.msra.mxu1 %v6480_v51 }
 0x6bc   :  { %3599 = vmatpush.bf16.msra.mxu2 %v6485_v11  ;;  %3612 = vmatpush.bf16.msra.mxu3 %v6483_v63 }
 0x6bf   :  { %3574 = vmatpush.bf16.msra.mxu0 %v6488_v49  ;;  %3587 = vmatpush.bf16.msra.mxu1 %v6492_v24 }
 0x6c0   :  { %3600 = vmatpush.bf16.msra.mxu2 %v6504_v8  ;;  %3613 = vmatpush.bf16.msra.mxu3 %v6494_v29 }
 0x6c3   :  { %3575 = vmatpush.bf16.msra.mxu0 %v6507_v30  ;;  %3588 = vmatpush.bf16.msra.mxu1 %v6509_v62 }
 0x6c4   :  { %3601 = vmatpush.bf16.msra.mxu2 %v6514_v35  ;;  %3614 = vmatpush.bf16.msra.mxu3 %v6511_v41 }
 0x6c7   :  { %3576 = vmatpush.bf16.msra.mxu0 %v6518_v9  ;;  %3589 = vmatpush.bf16.msra.mxu1 %v6520_v26 }
 0x6c8   :  { %3602 = vmatpush.bf16.msra.mxu2 %v6525_v54  ;;  %3615 = vmatpush.bf16.msra.mxu3 %v6523_v50 }
 0x6cb   :  { %3577 = vmatpush.bf16.msra.mxu0 %v6528_v58  ;;  %3590 = vmatpush.bf16.msra.mxu1 %v6532_v3 }
 0x6cc   :  { %3603 = vmatpush.bf16.msra.mxu2 %v6537_v7  ;;  %3616 = vmatpush.bf16.msra.mxu3 %v6534_v32 }
 0x6cf   :  { %3578 = vmatpush.bf16.msra.mxu0 %v6547_v19  ;;  %3591 = vmatpush.bf16.msra.mxu1 %v6549_v47 }
 0x6d0   :  { %3604 = vmatpush.bf16.msra.mxu2 %v6554_v43  ;;  %3617 = vmatpush.bf16.msra.mxu3 %v6551_v1 }
 0x6d3   :  { %3579 = vmatpush.bf16.msra.mxu0 %v6563_v28  ;;  %3592 = vmatpush.bf16.msra.mxu1 %v6565_v21 }
 0x6d4   :  { %3605 = vmatpush.bf16.msra.mxu2 %v6570_v0  ;;  %3618 = vmatpush.bf16.msra.mxu3 %v6567_v39 }
 0x732   :  { %v3423_v52 = vpop.f32.mrf.mxu0  ;;  %v3436_v55 = vpop.f32.mrf.mxu1 }
 0x733   :  { %v3466_v48 = vadd.f32 %v3423_v52, %v2927_v20  ;;  %v3467_v27 = vadd.f32 %v3436_v55, %v2956_v12 }
 0x735   :  { %v3470_v33 = vmul.f32 0.5, %v3466_v48  ;;  %v3471_v6 = vmul.f32 0.5, %v3467_v27 }
 0x737   :  { %5920 = vtanh.f32 %v3470_v33 }
 0x738   :  { %5922 = vtanh.f32 %v3471_v6 }
 0x739   :  { %v3449_v17 = vpop.f32.mrf.mxu2  ;;  %v3462_v31 = vpop.f32.mrf.mxu3 }
 0x73a   :  { %v3468_v22 = vadd.f32 %v3449_v17, %v2985_v44  ;;  %v3469_v61 = vadd.f32 %v3462_v31, %v3014_v18  ;;  %v3425_v36 = vpop.f32.mrf.mxu0  ;;  %v3438_v59 = vpop.f32.mrf.mxu1  ;;  %v6993_v18 = vld [vmem:[#allocation25_spill] sm:$0xff] }
 0x73b   :  { %v2958_v17 = vadd.f32 %v6993_v18, %v6702_v60 }
 0x73c   :  { %v3472_v38 = vmul.f32 0.5, %v3468_v22  ;;  %5924 = vtanh.f32 %v3469_v61 }
 0x73d   :  { %v5921_v2 = vpop.eup %5920 }
 0x73e   :  { %v5923_v23 = vpop.eup %5922  ;;  %v3476_v4 = vmul.f32 0.5, %v5921_v2  ;;  %5926 = vtanh.f32 %v3472_v38  ;;  %v6994_v2 = vld [vmem:[#allocation26_spill] sm:$0xff] }
 0x73f   :  { %v3477_v16 = vmul.f32 0.5, %v5923_v23  ;;  %v2987_v23 = vadd.f32 %v6994_v2, %v6710_v13 }
 0x740   :  { %v3479_v14 = vadd.f32 0.5, %v3476_v4  ;;  %v6995_v4 = vld [vmem:[#allocation27_spill] sm:$0xff] }
 0x741   :  { %v3480_v42 = vadd.f32 0.5, %v3477_v16  ;;  %v3451_v46 = vpop.f32.mrf.mxu2  ;;  %v3464_v57 = vpop.f32.mrf.mxu3  ;;  %v3016_v16 = vadd.f32 %v6995_v4, %v6712_v5 }
 0x742   :  { %v5925_v20 = vpop.eup %5924 }
 0x743   :  { %v3483_v12 = vmul.f32 %v3480_v42, %v6760_v37  ;;  %v3484_v52 = vmul.f32 %v5925_v20, %v3479_v14  ;;  %v6992_v37 = vld [vmem:[#allocation24_spill] sm:$0xff] }
 0x744   :  { %v5927_v55 = vpop.eup %5926  ;;  %v2929_v10 = vadd.f32 %v6992_v37, %v6700_v53 }
 0x745   :  { %v6804_v48 = vadd.f32 %v3484_v52, %v3483_v12  ;;  %v3478_v27 = vmul.f32 0.5, %v5927_v55 }
 0x747   :  { %5928 = vtanh.f32 %v6804_v48  ;;  %v3481_v33 = vadd.f32 0.5, %v3478_v27 }
 0x74d   :  { %v5929_v6 = vpop.eup %5928 }
 0x74e   :  { %v3487_v15 = vmul.f32 %v5929_v6, %v3481_v33 }
 0x750   :  { %v3492_v44 = vpack.c.bf16 %v3487_v15, %v3487_v15 }
 0x752   :  { %3501 = vmatmul.bf16.vlgmr.msrb.gmra.mxu0 %v3492_v44  ;;  %3514 = vmatmul.bf16.vlgmr.msrb.gmra.mxu1 %v3492_v44 }
 0x753   :  { %3527 = vmatmul.bf16.vlgmr.msrb.gmra.mxu2 %v3492_v44  ;;  %3540 = vmatmul.bf16.vlgmr.msrb.gmra.mxu3 %v3492_v44 }
 0x754   :  { %3651 = vmatpush.bf16.msrb.mxu0 %v6467_v45  ;;  %3664 = vmatpush.bf16.msrb.mxu1 %v6469_v34 }
 0x755   :  { %3677 = vmatpush.bf16.msrb.mxu2 %v6474_v40  ;;  %3690 = vmatpush.bf16.msrb.mxu3 %v6471_v25 }
 0x758   :  { %3652 = vmatpush.bf16.msrb.mxu0 %v6478_v56  ;;  %3665 = vmatpush.bf16.msrb.mxu1 %v6480_v51 }
 0x759   :  { %3678 = vmatpush.bf16.msrb.mxu2 %v6485_v11  ;;  %3691 = vmatpush.bf16.msrb.mxu3 %v6483_v63 }
 0x75c   :  { %3653 = vmatpush.bf16.msrb.mxu0 %v6488_v49  ;;  %3666 = vmatpush.bf16.msrb.mxu1 %v6492_v24 }
 0x75d   :  { %3679 = vmatpush.bf16.msrb.mxu2 %v6504_v8  ;;  %3692 = vmatpush.bf16.msrb.mxu3 %v6494_v29 }
 0x760   :  { %3654 = vmatpush.bf16.msrb.mxu0 %v6507_v30  ;;  %3667 = vmatpush.bf16.msrb.mxu1 %v6509_v62 }
 0x761   :  { %3680 = vmatpush.bf16.msrb.mxu2 %v6514_v35  ;;  %3693 = vmatpush.bf16.msrb.mxu3 %v6511_v41 }
 0x764   :  { %3655 = vmatpush.bf16.msrb.mxu0 %v6518_v9  ;;  %3668 = vmatpush.bf16.msrb.mxu1 %v6520_v26 }
 0x765   :  { %3681 = vmatpush.bf16.msrb.mxu2 %v6525_v54  ;;  %3694 = vmatpush.bf16.msrb.mxu3 %v6523_v50 }
 0x768   :  { %3656 = vmatpush.bf16.msrb.mxu0 %v6528_v58  ;;  %3669 = vmatpush.bf16.msrb.mxu1 %v6532_v3 }
 0x769   :  { %3682 = vmatpush.bf16.msrb.mxu2 %v6537_v7  ;;  %3695 = vmatpush.bf16.msrb.mxu3 %v6534_v32 }
 0x76c   :  { %3657 = vmatpush.bf16.msrb.mxu0 %v6547_v19  ;;  %3670 = vmatpush.bf16.msrb.mxu1 %v6549_v47 }
 0x76d   :  { %3683 = vmatpush.bf16.msrb.mxu2 %v6554_v43  ;;  %3696 = vmatpush.bf16.msrb.mxu3 %v6551_v1 }
 0x770   :  { %3658 = vmatpush.bf16.msrb.mxu0 %v6563_v28  ;;  %3671 = vmatpush.bf16.msrb.mxu1 %v6565_v21 }
 0x771   :  { %3684 = vmatpush.bf16.msrb.mxu2 %v6570_v0  ;;  %3697 = vmatpush.bf16.msrb.mxu3 %v6567_v39 }
 0x7cf   :  { %v3502_v31 = vpop.f32.mrf.mxu0  ;;  %v3515_v22 = vpop.f32.mrf.mxu1 }
 0x7d0   :  { %v3545_v61 = vadd.f32 %v3502_v31, %v2929_v10  ;;  %v3546_v36 = vadd.f32 %v3515_v22, %v2958_v17 }
 0x7d2   :  { %v3549_v59 = vmul.f32 0.5, %v3545_v61  ;;  %v3550_v38 = vmul.f32 0.5, %v3546_v36 }
 0x7d4   :  { %5930 = vtanh.f32 %v3549_v59 }
 0x7d5   :  { %5932 = vtanh.f32 %v3550_v38 }
 0x7d6   :  { %v3528_v14 = vpop.f32.mrf.mxu2  ;;  %v3541_v42 = vpop.f32.mrf.mxu3 }
 0x7d7   :  { %v3547_v46 = vadd.f32 %v3528_v14, %v2987_v23  ;;  %v3548_v57 = vadd.f32 %v3541_v42, %v3016_v16  ;;  %v3504_v20 = vpop.f32.mrf.mxu0  ;;  %v3517_v12 = vpop.f32.mrf.mxu1  ;;  %v6997_v16 = vld [vmem:[#allocation29_spill] sm:$0xff] }
 0x7d8   :  { %v2961_v14 = vadd.f32 %v6997_v16, %v6702_v60 }
 0x7d9   :  { %v3551_v52 = vmul.f32 0.5, %v3547_v46  ;;  %5934 = vtanh.f32 %v3548_v57 }
 0x7da   :  { %v5931_v55 = vpop.eup %5930 }
 0x7db   :  { %v5933_v27 = vpop.eup %5932  ;;  %v3555_v33 = vmul.f32 0.5, %v5931_v55  ;;  %5936 = vtanh.f32 %v3551_v52  ;;  %v6998_v55 = vld [vmem:[#allocation30_spill] sm:$0xff] }
 0x7dc   :  { %v3556_v6 = vmul.f32 0.5, %v5933_v27  ;;  %v2990_v27 = vadd.f32 %v6998_v55, %v6710_v13 }
 0x7dd   :  { %v3558_v15 = vadd.f32 0.5, %v3555_v33  ;;  %v6999_v33 = vld [vmem:[#allocation31_spill] sm:$0xff] }
 0x7de   :  { %v3559_v44 = vadd.f32 0.5, %v3556_v6  ;;  %v3530_v37 = vpop.f32.mrf.mxu2  ;;  %v3543_v10 = vpop.f32.mrf.mxu3  ;;  %v3019_v6 = vadd.f32 %v6999_v33, %v6712_v5 }
 0x7df   :  { %v5935_v18 = vpop.eup %5934 }
 0x7e0   :  { %v3562_v17 = vmul.f32 %v3559_v44, %v6804_v48  ;;  %v3563_v31 = vmul.f32 %v5935_v18, %v3558_v15  ;;  %v6996_v48 = vld [vmem:[#allocation28_spill] sm:$0xff] }
 0x7e1   :  { %v5937_v22 = vpop.eup %5936  ;;  %v2932_v4 = vadd.f32 %v6996_v48, %v6700_v53 }
 0x7e2   :  { %v6848_v61 = vadd.f32 %v3563_v31, %v3562_v17  ;;  %v3557_v36 = vmul.f32 0.5, %v5937_v22 }
 0x7e4   :  { %5938 = vtanh.f32 %v6848_v61  ;;  %v3560_v59 = vadd.f32 0.5, %v3557_v36 }
 0x7ea   :  { %v5939_v38 = vpop.eup %5938 }
 0x7eb   :  { %v3566_v2 = vmul.f32 %v5939_v38, %v3560_v59 }
 0x7ed   :  { %v3571_v23 = vpack.c.bf16 %v3566_v2, %v3566_v2 }
 0x7ef   :  { %3580 = vmatmul.bf16.vlgmr.msra.gmra.mxu0 %v3571_v23  ;;  %3593 = vmatmul.bf16.vlgmr.msra.gmra.mxu1 %v3571_v23 }
 0x7f0   :  { %3606 = vmatmul.bf16.vlgmr.msra.gmra.mxu2 %v3571_v23  ;;  %3619 = vmatmul.bf16.vlgmr.msra.gmra.mxu3 %v3571_v23 }
 0x7f1   :  { %3730 = vmatpush.bf16.msra.mxu0 %v6467_v45  ;;  %3743 = vmatpush.bf16.msra.mxu1 %v6469_v34 }
 0x7f2   :  { %3756 = vmatpush.bf16.msra.mxu2 %v6474_v40  ;;  %3769 = vmatpush.bf16.msra.mxu3 %v6471_v25 }
 0x7f5   :  { %3731 = vmatpush.bf16.msra.mxu0 %v6478_v56  ;;  %3744 = vmatpush.bf16.msra.mxu1 %v6480_v51 }
 0x7f6   :  { %3757 = vmatpush.bf16.msra.mxu2 %v6485_v11  ;;  %3770 = vmatpush.bf16.msra.mxu3 %v6483_v63 }
 0x7f9   :  { %3732 = vmatpush.bf16.msra.mxu0 %v6488_v49  ;;  %3745 = vmatpush.bf16.msra.mxu1 %v6492_v24 }
 0x7fa   :  { %3758 = vmatpush.bf16.msra.mxu2 %v6504_v8  ;;  %3771 = vmatpush.bf16.msra.mxu3 %v6494_v29 }
 0x7fd   :  { %3733 = vmatpush.bf16.msra.mxu0 %v6507_v30  ;;  %3746 = vmatpush.bf16.msra.mxu1 %v6509_v62 }
 0x7fe   :  { %3759 = vmatpush.bf16.msra.mxu2 %v6514_v35  ;;  %3772 = vmatpush.bf16.msra.mxu3 %v6511_v41 }
 0x801   :  { %3734 = vmatpush.bf16.msra.mxu0 %v6518_v9  ;;  %3747 = vmatpush.bf16.msra.mxu1 %v6520_v26 }
 0x802   :  { %3760 = vmatpush.bf16.msra.mxu2 %v6525_v54  ;;  %3773 = vmatpush.bf16.msra.mxu3 %v6523_v50 }
 0x805   :  { %3735 = vmatpush.bf16.msra.mxu0 %v6528_v58  ;;  %3748 = vmatpush.bf16.msra.mxu1 %v6532_v3 }
 0x806   :  { %3761 = vmatpush.bf16.msra.mxu2 %v6537_v7  ;;  %3774 = vmatpush.bf16.msra.mxu3 %v6534_v32 }
 0x809   :  { %3736 = vmatpush.bf16.msra.mxu0 %v6547_v19  ;;  %3749 = vmatpush.bf16.msra.mxu1 %v6549_v47 }
 0x80a   :  { %3762 = vmatpush.bf16.msra.mxu2 %v6554_v43  ;;  %3775 = vmatpush.bf16.msra.mxu3 %v6551_v1 }
 0x80d   :  { %3737 = vmatpush.bf16.msra.mxu0 %v6563_v28  ;;  %3750 = vmatpush.bf16.msra.mxu1 %v6565_v21 }
 0x80e   :  { %3763 = vmatpush.bf16.msra.mxu2 %v6570_v0  ;;  %3776 = vmatpush.bf16.msra.mxu3 %v6567_v39 }
 0x86c   :  { %v3581_v42 = vpop.f32.mrf.mxu0  ;;  %v3594_v46 = vpop.f32.mrf.mxu1 }
 0x86d   :  { %v3624_v57 = vadd.f32 %v3581_v42, %v2932_v4  ;;  %v3625_v20 = vadd.f32 %v3594_v46, %v2961_v14 }
 0x86f   :  { %v3628_v12 = vmul.f32 0.5, %v3624_v57  ;;  %v3629_v52 = vmul.f32 0.5, %v3625_v20 }
 0x871   :  { %5940 = vtanh.f32 %v3628_v12 }
 0x872   :  { %5942 = vtanh.f32 %v3629_v52 }
 0x873   :  { %v3607_v15 = vpop.f32.mrf.mxu2  ;;  %v3620_v44 = vpop.f32.mrf.mxu3 }
 0x874   :  { %v3626_v37 = vadd.f32 %v3607_v15, %v2990_v27  ;;  %v3627_v10 = vadd.f32 %v3620_v44, %v3019_v6  ;;  %v3583_v18 = vpop.f32.mrf.mxu0  ;;  %v3596_v17 = vpop.f32.mrf.mxu1 }
 0x875   :  { %v7004_v18 = vld [vmem:[#allocation36_spill] sm:$0xff] }
 0x876   :  { %v3630_v31 = vmul.f32 0.5, %v3626_v37  ;;  %5944 = vtanh.f32 %v3627_v10  ;;  %v2937_v17 = vadd.f32 %v7004_v18, %v6700_v53 }
 0x877   :  { %v5941_v22 = vpop.eup %5940 }
 0x878   :  { %v5943_v36 = vpop.eup %5942  ;;  %v3634_v59 = vmul.f32 0.5, %v5941_v22  ;;  %5946 = vtanh.f32 %v3630_v31  ;;  %v7005_v31 = vld [vmem:[#allocation37_spill] sm:$0xff] }
 0x879   :  { %v3635_v38 = vmul.f32 0.5, %v5943_v36  ;;  %v2966_v22 = vadd.f32 %v7005_v31, %v6702_v60 }
 0x87a   :  { %v3637_v2 = vadd.f32 0.5, %v3634_v59 }
 0x87b   :  { %v3638_v23 = vadd.f32 0.5, %v3635_v38  ;;  %v3609_v48 = vpop.f32.mrf.mxu2  ;;  %v3622_v4 = vpop.f32.mrf.mxu3 }
 0x87c   :  { %v5945_v16 = vpop.eup %5944  ;;  %v7006_v4 = vld [vmem:[#allocation38_spill] sm:$0xff] }
 0x87d   :  { %v3641_v14 = vmul.f32 %v3638_v23, %v6848_v61  ;;  %v3642_v42 = vmul.f32 %v5945_v16, %v3637_v2  ;;  %v2995_v16 = vadd.f32 %v7006_v4, %v6710_v13 }
 0x87e   :  { %v5947_v46 = vpop.eup %5946 }
 0x87f   :  { %v6892_v57 = vadd.f32 %v3642_v42, %v3641_v14  ;;  %v3636_v20 = vmul.f32 0.5, %v5947_v46  ;;  %v7007_v14 = vld [vmem:[#allocation39_spill] sm:$0xff] }
 0x880   :  { %v3024_v42 = vadd.f32 %v7007_v14, %v6712_v5 }
 0x881   :  { %5948 = vtanh.f32 %v6892_v57  ;;  %v3639_v12 = vadd.f32 0.5, %v3636_v20 }
 0x887   :  { %v5949_v52 = vpop.eup %5948 }
 0x888   :  { %v3645_v55 = vmul.f32 %v5949_v52, %v3639_v12 }
 0x88a   :  { %v3650_v27 = vpack.c.bf16 %v3645_v55, %v3645_v55 }
 0x88c   :  { %3659 = vmatmul.bf16.vlgmr.msrb.gmra.mxu0 %v3650_v27  ;;  %3672 = vmatmul.bf16.vlgmr.msrb.gmra.mxu1 %v3650_v27 }
 0x88d   :  { %3685 = vmatmul.bf16.vlgmr.msrb.gmra.mxu2 %v3650_v27  ;;  %3698 = vmatmul.bf16.vlgmr.msrb.gmra.mxu3 %v3650_v27 }
 0x88e   :  { %3809 = vmatpush.bf16.msrb.mxu0 %v6467_v45  ;;  %3822 = vmatpush.bf16.msrb.mxu1 %v6469_v34  ;;  %v7000_v45 = vld [vmem:[#allocation32_spill] sm:$0xff] }
 0x88f   :  { %3835 = vmatpush.bf16.msrb.mxu2 %v6474_v40  ;;  %3848 = vmatpush.bf16.msrb.mxu3 %v6471_v25  ;;  %v2934_v34 = vadd.f32 %v7000_v45, %v6700_v53  ;;  %v7001_v25 = vld [vmem:[#allocation33_spill] sm:$0xff] }
 0x890   :  { %v2963_v40 = vadd.f32 %v7001_v25, %v6702_v60 }
 0x892   :  { %3810 = vmatpush.bf16.msrb.mxu0 %v6478_v56  ;;  %3823 = vmatpush.bf16.msrb.mxu1 %v6480_v51 }
 0x893   :  { %3836 = vmatpush.bf16.msrb.mxu2 %v6485_v11  ;;  %3849 = vmatpush.bf16.msrb.mxu3 %v6483_v63 }
 0x896   :  { %3811 = vmatpush.bf16.msrb.mxu0 %v6488_v49  ;;  %3824 = vmatpush.bf16.msrb.mxu1 %v6492_v24 }
 0x897   :  { %3837 = vmatpush.bf16.msrb.mxu2 %v6504_v8  ;;  %3850 = vmatpush.bf16.msrb.mxu3 %v6494_v29  ;;  %v7002_v29 = vld [vmem:[#allocation34_spill] sm:$0xff] }
 0x898   :  { %v2992_v8 = vadd.f32 %v7002_v29, %v6710_v13 }
 0x89a   :  { %3812 = vmatpush.bf16.msrb.mxu0 %v6507_v30  ;;  %3825 = vmatpush.bf16.msrb.mxu1 %v6509_v62  ;;  %v7003_v30 = vld [vmem:[#allocation35_spill] sm:$0xff] }
 0x89b   :  { %3838 = vmatpush.bf16.msrb.mxu2 %v6514_v35  ;;  %3851 = vmatpush.bf16.msrb.mxu3 %v6511_v41  ;;  %v3021_v62 = vadd.f32 %v7003_v30, %v6712_v5 }
 0x89e   :  { %3813 = vmatpush.bf16.msrb.mxu0 %v6518_v9  ;;  %3826 = vmatpush.bf16.msrb.mxu1 %v6520_v26 }
 0x89f   :  { %3839 = vmatpush.bf16.msrb.mxu2 %v6525_v54  ;;  %3852 = vmatpush.bf16.msrb.mxu3 %v6523_v50 }
 0x8a2   :  { %3814 = vmatpush.bf16.msrb.mxu0 %v6528_v58  ;;  %3827 = vmatpush.bf16.msrb.mxu1 %v6532_v3 }
 0x8a3   :  { %3840 = vmatpush.bf16.msrb.mxu2 %v6537_v7  ;;  %3853 = vmatpush.bf16.msrb.mxu3 %v6534_v32 }
 0x8a6   :  { %3815 = vmatpush.bf16.msrb.mxu0 %v6547_v19  ;;  %3828 = vmatpush.bf16.msrb.mxu1 %v6549_v47 }
 0x8a7   :  { %3841 = vmatpush.bf16.msrb.mxu2 %v6554_v43  ;;  %3854 = vmatpush.bf16.msrb.mxu3 %v6551_v1 }
 0x8aa   :  { %3816 = vmatpush.bf16.msrb.mxu0 %v6563_v28  ;;  %3829 = vmatpush.bf16.msrb.mxu1 %v6565_v21 }
 0x8ab   :  { %3842 = vmatpush.bf16.msrb.mxu2 %v6570_v0  ;;  %3855 = vmatpush.bf16.msrb.mxu3 %v6567_v39 }
 0x909   :  { %v3660_v56 = vpop.f32.mrf.mxu0  ;;  %v3673_v51 = vpop.f32.mrf.mxu1 }
 0x90a   :  { %v3703_v63 = vadd.f32 %v3660_v56, %v2934_v34  ;;  %v3704_v11 = vadd.f32 %v3673_v51, %v2963_v40 }
 0x90c   :  { %v3707_v49 = vmul.f32 0.5, %v3703_v63  ;;  %v3708_v24 = vmul.f32 0.5, %v3704_v11 }
 0x90e   :  { %5950 = vtanh.f32 %v3707_v49 }
 0x90f   :  { %5952 = vtanh.f32 %v3708_v24 }
 0x910   :  { %v3686_v41 = vpop.f32.mrf.mxu2  ;;  %v3699_v35 = vpop.f32.mrf.mxu3 }
 0x911   :  { %v3705_v9 = vadd.f32 %v3686_v41, %v2992_v8  ;;  %v3706_v26 = vadd.f32 %v3699_v35, %v3021_v62  ;;  %v3662_v50 = vpop.f32.mrf.mxu0  ;;  %v3675_v54 = vpop.f32.mrf.mxu1 }
 0x912   :  { %v5805_v50 = vld [vmem:[#allocation15 + $0x38] sm:$0xff]  ;;  %v5804_v54 = vld [vmem:[#allocation15 + $0x30] sm:$0xff] }
 0x913   :  { %v3709_v58 = vmul.f32 0.5, %v3705_v9  ;;  %5954 = vtanh.f32 %v3706_v26 }
 0x914   :  { %v5951_v3 = vpop.eup %5950 }
 0x915   :  { %v5953_v32 = vpop.eup %5952  ;;  %v3713_v7 = vmul.f32 0.5, %v5951_v3  ;;  %5956 = vtanh.f32 %v3709_v58  ;;  %v5803_v58 = vld [vmem:[#allocation15 + $0x28] sm:$0xff]  ;;  %v5802_v3 = vld [vmem:[#allocation15 + $0x20] sm:$0xff] }
 0x916   :  { %v3714_v19 = vmul.f32 0.5, %v5953_v32  ;;  %v5801_v32 = vld [vmem:[#allocation15 + $0x18] sm:$0xff] }
 0x917   :  { %v3716_v47 = vadd.f32 0.5, %v3713_v7  ;;  %v5800_v7 = vld [vmem:[#allocation15 + $0x10] sm:$0xff] }
 0x918   :  { %v3717_v1 = vadd.f32 0.5, %v3714_v19  ;;  %v3688_v43 = vpop.f32.mrf.mxu2  ;;  %v3701_v28 = vpop.f32.mrf.mxu3  ;;  %v5799_v19 = vld [vmem:[#allocation15 + $0x8] sm:$0xff] }
 0x919   :  { %v5955_v21 = vpop.eup %5954  ;;  %v7009_v28 = vld [vmem:[#allocation41_spill] sm:$0xff] }
 0x91a   :  { %v3720_v39 = vmul.f32 %v3717_v1, %v6892_v57  ;;  %v3721_v0 = vmul.f32 %v5955_v21, %v3716_v47  ;;  %v5798_v47 = vld [vmem:[#allocation15] sm:$0xff]  ;;  %v7008_v1 = vld [vmem:[#allocation40_spill] sm:$0xff]  ;;  %v2968_v21 = vadd.f32 %v7009_v28, %v6702_v60 }
 0x91b   :  { %v5957_v61 = vpop.eup %5956  ;;  %v2939_v43 = vadd.f32 %v7008_v1, %v6700_v53 }
 0x91c   :  { %v3722_v33 = vadd.f32 %v3721_v0, %v3720_v39  ;;  %v3715_v6 = vmul.f32 0.5, %v5957_v61 }
 0x91e   :  { %5958 = vtanh.f32 %v3722_v33  ;;  %v3718_v15 = vadd.f32 0.5, %v3715_v6 }
 0x924   :  { %v5959_v44 = vpop.eup %5958 }
 0x925   :  { %v3724_v37 = vmul.f32 %v5959_v44, %v3718_v15  ;;  %v7010_v44 = vld [vmem:[#allocation42_spill] sm:$0xff] }
 0x927   :  { %v3729_v10 = vpack.c.bf16 %v3724_v37, %v3724_v37  ;;  %v2997_v37 = vadd.f32 %v7010_v44, %v6710_v13 }
 0x929   :  { %3738 = vmatmul.bf16.vlgmr.msra.gmra.mxu0 %v3729_v10  ;;  %3751 = vmatmul.bf16.vlgmr.msra.gmra.mxu1 %v3729_v10 }
 0x92a   :  { %3764 = vmatmul.bf16.vlgmr.msra.gmra.mxu2 %v3729_v10  ;;  %3777 = vmatmul.bf16.vlgmr.msra.gmra.mxu3 %v3729_v10  ;;  %v7011_v10 = vld [vmem:[#allocation43_spill] sm:$0xff] }
 0x92b   :  { %3952 = vmatpush.bf16.msra.mxu0 %v5805_v50  ;;  %v3026_v18 = vadd.f32 %v7011_v10, %v6712_v5 }
 0x92f   :  { %3953 = vmatpush.bf16.msra.mxu0 %v5804_v54 }
 0x933   :  { %3954 = vmatpush.bf16.msra.mxu0 %v5803_v58 }
 0x937   :  { %3955 = vmatpush.bf16.msra.mxu0 %v5802_v3 }
 0x93b   :  { %3956 = vmatpush.bf16.msra.mxu0 %v5801_v32 }
 0x93f   :  { %3957 = vmatpush.bf16.msra.mxu0 %v5800_v7 }
 0x943   :  { %3958 = vmatpush.bf16.msra.mxu0 %v5799_v19 }
 0x947   :  { %3959 = vmatpush.bf16.msra.mxu0 %v5798_v47 }
 0x9a6   :  { %v3739_v36 = vpop.f32.mrf.mxu0  ;;  %v3752_v59 = vpop.f32.mrf.mxu1 }
 0x9a7   :  { %v3782_v38 = vadd.f32 %v3739_v36, %v2937_v17  ;;  %v3783_v2 = vadd.f32 %v3752_v59, %v2966_v22 }
 0x9a9   :  { %v3786_v23 = vmul.f32 0.5, %v3782_v38  ;;  %v3787_v48 = vmul.f32 0.5, %v3783_v2 }
 0x9ab   :  { %5960 = vtanh.f32 %v3786_v23 }
 0x9ac   :  { %5962 = vtanh.f32 %v3787_v48 }
 0x9ad   :  { %v3765_v46 = vpop.f32.mrf.mxu2  ;;  %v3778_v57 = vpop.f32.mrf.mxu3 }
 0x9ae   :  { %v3784_v20 = vadd.f32 %v3765_v46, %v2995_v16  ;;  %v3785_v12 = vadd.f32 %v3778_v57, %v3024_v42  ;;  %v3741_v52 = vpop.f32.mrf.mxu0  ;;  %v3754_v55 = vpop.f32.mrf.mxu1 }
 0x9b0   :  { %v3788_v27 = vmul.f32 0.5, %v3784_v20  ;;  %5964 = vtanh.f32 %v3785_v12 }
 0x9b1   :  { %v5961_v45 = vpop.eup %5960 }
 0x9b2   :  { %v5963_v34 = vpop.eup %5962  ;;  %v3792_v25 = vmul.f32 0.5, %v5961_v45  ;;  %5966 = vtanh.f32 %v3788_v27 }
 0x9b3   :  { %v3793_v40 = vmul.f32 0.5, %v5963_v34  ;;  %v5819_v34 = vld [vmem:[%s6966_s8] ss:$0 sm:$0xff] }
 0x9b4   :  { %v3795_v56 = vadd.f32 0.5, %v3792_v25 }
 0x9b5   :  { %v3796_v51 = vadd.f32 0.5, %v3793_v40  ;;  %v3767_v63 = vpop.f32.mrf.mxu2  ;;  %v3780_v11 = vpop.f32.mrf.mxu3 }
 0x9b6   :  { %v5965_v49 = vpop.eup %5964 }
 0x9b7   :  { %v3799_v24 = vmul.f32 %v3796_v51, %v3722_v33  ;;  %v3800_v29 = vmul.f32 %v5965_v49, %v3795_v56 }
 0x9b8   :  { %v5967_v8 = vpop.eup %5966 }
 0x9b9   :  { %v3801_v30 = vadd.f32 %v3800_v29, %v3799_v24  ;;  %v3794_v62 = vmul.f32 0.5, %v5967_v8 }
 0x9bb   :  { %5968 = vtanh.f32 %v3801_v30  ;;  %v3797_v41 = vadd.f32 0.5, %v3794_v62 }
 0x9c1   :  { %v5969_v35 = vpop.eup %5968 }
 0x9c2   :  { %v3803_v9 = vmul.f32 %v5969_v35, %v3797_v41 }
 0x9c4   :  { %v3808_v26 = vpack.c.bf16 %v3803_v9, %v3803_v9 }
 0x9c6   :  { %3817 = vmatmul.bf16.vlgmr.msrb.gmra.mxu0 %v3808_v26  ;;  %3830 = vmatmul.bf16.vlgmr.msrb.gmra.mxu1 %v3808_v26 }
 0x9c7   :  { %3843 = vmatmul.bf16.vlgmr.msrb.gmra.mxu2 %v3808_v26  ;;  %3856 = vmatmul.bf16.vlgmr.msrb.gmra.mxu3 %v3808_v26 }
 0xa43   :  { %v3818_v39 = vpop.f32.mrf.mxu0  ;;  %v3831_v0 = vpop.f32.mrf.mxu1 }
 0xa44   :  { %v3861_v61 = vadd.f32 %v3818_v39, %v2939_v43  ;;  %v3862_v33 = vadd.f32 %v3831_v0, %v2968_v21 }
 0xa46   :  { %v3865_v6 = vmul.f32 0.5, %v3861_v61  ;;  %v3866_v15 = vmul.f32 0.5, %v3862_v33 }
 0xa48   :  { %5970 = vtanh.f32 %v3865_v6 }
 0xa49   :  { %5972 = vtanh.f32 %v3866_v15 }
 0xa4a   :  { %v3844_v17 = vpop.f32.mrf.mxu2  ;;  %v3857_v31 = vpop.f32.mrf.mxu3 }
 0xa4b   :  { %v3863_v53 = vadd.f32 %v3844_v17, %v2997_v37  ;;  %v3864_v22 = vadd.f32 %v3857_v31, %v3026_v18  ;;  %v3820_v36 = vpop.f32.mrf.mxu0  ;;  %v3833_v60 = vpop.f32.mrf.mxu1 }
 0xa4d   :  { %v3867_v59 = vmul.f32 0.5, %v3863_v53  ;;  %5974 = vtanh.f32 %v3864_v22 }
 0xa4e   :  { %v5971_v38 = vpop.eup %5970 }
 0xa4f   :  { %v5973_v2 = vpop.eup %5972  ;;  %v3871_v23 = vmul.f32 0.5, %v5971_v38  ;;  %5976 = vtanh.f32 %v3867_v59 }
 0xa50   :  { %v3872_v48 = vmul.f32 0.5, %v5973_v2 }
 0xa51   :  { %v3874_v4 = vadd.f32 0.5, %v3871_v23 }
 0xa52   :  { %v3875_v16 = vadd.f32 0.5, %v3872_v48  ;;  %v3846_v13 = vpop.f32.mrf.mxu2  ;;  %v3859_v14 = vpop.f32.mrf.mxu3 }
 0xa53   :  { %v5975_v42 = vpop.eup %5974 }
 0xa54   :  { %v3878_v5 = vmul.f32 %v3875_v16, %v3801_v30  ;;  %v3879_v46 = vmul.f32 %v5975_v42, %v3874_v4 }
 0xa55   :  { %v5977_v57 = vpop.eup %5976 }
 0xa56   :  { %v3880_v20 = vadd.f32 %v3879_v46, %v3878_v5  ;;  %v3873_v12 = vmul.f32 0.5, %v5977_v57 }
 0xa58   :  { %5978 = vtanh.f32 %v3880_v20  ;;  %v3876_v52 = vadd.f32 0.5, %v3873_v12 }
 0xa5e   :  { %v5979_v55 = vpop.eup %5978 }
 0xa5f   :  { %v3882_v27 = vmul.f32 %v5979_v55, %v3876_v52 }
 0xa61   :  { %v3883_v45 = vpack.c.bf16 %v3882_v27, %v3882_v27 }
 0xa63   :  { %3960 = vmatmul.bf16.vlgmr.msra.gmra.mxu0 %v3883_v45 }
 0xae0   :  { %v3961_v25 = vpop.f32.mrf.mxu0 }
 0xae1   :  { %v3962_v40 = vadd.f32 %v5819_v34, %v3961_v25 }
 0xae3   :  { %3965 = vst [vmem:[#allocation16] sm:$0xff] %v3962_v40 }
 0xae4   :  { %3976 = dma.vmem_to_hbm [thread:$0]  %s3972_s23, 128, %s3974_s25, [#allocation6]  }
 0xae8   :  { %v3963_v56 = vpop.f32.mrf.mxu0 }
 0xae9   :  { %6180 = dma.done.wait [#allocation6], 128  }
 0xaea   :  { %6181 = vsyncadd [#allocation6], 4294967168 }
 0xaeb   :  { %3981 = vsyncpa [#allocation5], 1 }
 0xaec   :  { %3982 = vsyncpa [#allocation8], 1 }
 0xaed   :  { %3983 = vsyncpa [#allocation11], 1 }
 0xaee   :  { %3984 = vsyncpa [#allocation14], 1 }
 0xaef   :  { %3985 = vsyncpa [#allocation6], 1 }

</bundles_post_ra>
